<compile_context>
chip_gen: v5e
topology: v5e:2x2
jax: 0.10.0
libtpu: 0.0.40
codegen_flags: <defaults>
</compile_context>

<pallas_src>
import functools
import math

import jax
import jax.numpy as jnp
from jax.experimental import pallas as pl
from jax.experimental.pallas import tpu as pltpu

LANE = 128


def _round_up(x, m):
    return (x + m - 1) // m * m


def _pick_tile(dim):
    # Prefer 256-wide tiles (full-width v6e/v7x MXU) when they divide evenly.
    return 256 if dim % 256 == 0 else 128


# ---------------------------------------------------------------------------
# Pallas kernels
# ---------------------------------------------------------------------------
def _conv_bn_relu_kernel(x_ref, w_ref, scale_ref, bias_ref, o_ref, acc_ref,
                         *, stride, ho, wo_pad, num_k):
    """Fused 3x3 conv + folded-BN + ReLU for one (image, cout-tile, cin-tile).

    x_ref     : (s*s, Hph, Wph, tck)  bf16 phase-decomposed padded activations
    w_ref     : (9, tck, tn)          bf16 tap-major weights
    scale/bias: (1, tn)               f32 folded BN params
    o_ref     : (1, ho*wo_pad, tn)    bf16 output tile
    acc_ref   : f32 accumulator scratch (only used when num_k > 1)
    """
    k = pl.program_id(2)

    # 9 shifted taps, statically unrolled: each is a lane-dense bf16 MXU matmul
    # against this tap's weight tile (no im2col materialization anywhere).
    partial = None
    for dh in range(3):
        for dw in range(3):
            phase = (dh % stride) * stride + (dw % stride)
            ro, co = dh // stride, dw // stride
            tap = x_ref[phase, ro:ro + ho, co:co + wo_pad, :]
            d = jnp.dot(tap.reshape(ho * wo_pad, tap.shape[-1]),
                        w_ref[dh * 3 + dw],
                        preferred_element_type=jnp.float32)
            partial = d if partial is None else partial + d

    if num_k == 1:
        # Single reduction step: keep the accumulator in registers, fuse the
        # BN + ReLU epilogue and cast to bf16 only at the final store.
        y = partial * scale_ref[...] + bias_ref[...]
        o_ref[0] = jnp.maximum(y, 0.0).astype(o_ref.dtype)
    else:
        # Write-first accumulation (no zero-init pass), epilogue once at the
        # last reduction step, in f32.
        @pl.when(k == 0)
        def _first():
            acc_ref[...] = partial

        @pl.when(k != 0)
        def _rest():
            acc_ref[...] += partial

        @pl.when(k == num_k - 1)
        def _finalize():
            y = acc_ref[...] * scale_ref[...] + bias_ref[...]
            o_ref[0] = jnp.maximum(y, 0.0).astype(o_ref.dtype)


def _head_kernel(x_ref, w_ref, b_ref, o_ref, acc_ref, *, inv_hw, num_k):
    """Global average pool + linear, tiled over (class-tile, channel-tile)."""
    k = pl.program_id(1)

    pooled = jnp.sum(x_ref[...].astype(jnp.float32), axis=1) * inv_hw  # (N, tck)
    partial = jnp.dot(pooled.astype(jnp.bfloat16), w_ref[...],
                      preferred_element_type=jnp.float32)

    if num_k == 1:
        o_ref[...] = (partial + b_ref[...]).astype(o_ref.dtype)
    else:
        @pl.when(k == 0)
        def _first():
            acc_ref[...] = partial

        @pl.when(k != 0)
        def _rest():
            acc_ref[...] += partial

        @pl.when(k == num_k - 1)
        def _finalize():
            o_ref[...] = (acc_ref[...] + b_ref[...]).astype(o_ref.dtype)


# ---------------------------------------------------------------------------
# Layer wrappers (glue in plain JAX, hot path in Pallas)
# ---------------------------------------------------------------------------
def conv3x3_bn_relu(x_nhwc, w9, scale, bias, stride):
    """Conv2d(3x3, pad=1, bias=False) + BatchNorm2d(eval) + ReLU.

    x_nhwc : (N, H, W, Cin_p)   bf16, channels zero-padded to a 128 multiple
    w9     : (9, Cin_p, Cout_p) bf16 tap-major weights (padded entries zero)
    scale  : (1, Cout_p) f32, bias: (1, Cout_p) f32 (zero on padded channels)
    returns (N, Ho, Wo, Cout_p) bf16
    """
    N, H, W, Cin = x_nhwc.shape
    Cout = w9.shape[-1]
    s = stride
    ho = (H - 1) // s + 1
    wo = (W - 1) // s + 1
    wo_pad = _round_up(wo, 8)          # keep flattened M rows sublane-aligned
    r = 2 // s                         # per-phase tap reach (2 for s=1, 1 for s=2)
    hph, wph = ho + r, wo_pad + r

    # Zero-pad (conv padding of 1 + alignment) and phase-decompose so the
    # kernel only takes stride-1 shifted windows of a ~1x copy (no 9x im2col).
    xp = jnp.pad(x_nhwc,
                 ((0, 0), (1, s * hph - H - 1), (1, s * wph - W - 1), (0, 0)))
    xph = xp.reshape(N, hph, s, wph, s, Cin).transpose(0, 2, 4, 1, 3, 5)
    xph = xph.reshape(N * s * s, hph, wph, Cin)

    tn = _pick_tile(Cout)
    tck = _pick_tile(Cin)
    m_pad = ho * wo_pad
    num_k = Cin // tck
    grid = (N, Cout // tn, num_k)

    acc_shape = (m_pad, tn) if num_k > 1 else (8, LANE)

    x_blk = s * s * hph * wph * tck * 2
    w_blk = 9 * tck * tn * 2
    o_blk = m_pad * tn * 2
    acc_b = acc_shape[0] * acc_shape[1] * 4
    vmem_limit = min(48 * 1024 * 1024,
                     max(8 * 1024 * 1024, 3 * (x_blk + w_blk + o_blk) + acc_b))

    cost = pl.CostEstimate(
        flops=2 * N * m_pad * 9 * Cin * Cout,
        transcendentals=0,
        bytes_accessed=int(xph.size * 2 + w9.size * 2 + N * m_pad * Cout * 2
                           + scale.size * 4 + bias.size * 4),
    )

    out = pl.pallas_call(
        functools.partial(_conv_bn_relu_kernel, stride=s, ho=ho,
                          wo_pad=wo_pad, num_k=num_k),
        out_shape=jax.ShapeDtypeStruct((N, m_pad, Cout), jnp.bfloat16),
        grid=grid,
        in_specs=[
            pl.BlockSpec((s * s, hph, wph, tck), lambda n, j, k: (n, 0, 0, k)),
            pl.BlockSpec((9, tck, tn), lambda n, j, k: (0, k, j)),
            pl.BlockSpec((1, tn), lambda n, j, k: (0, j)),
            pl.BlockSpec((1, tn), lambda n, j, k: (0, j)),
        ],
        out_specs=pl.BlockSpec((1, m_pad, tn), lambda n, j, k: (n, 0, j)),
        scratch_shapes=[pltpu.VMEM(acc_shape, jnp.float32)],
        compiler_params=pltpu.CompilerParams(
            dimension_semantics=("parallel", "parallel", "arbitrary"),
            vmem_limit_bytes=int(vmem_limit)),
        cost_estimate=cost,
    )(xph, w9, scale, bias)

    # Drop the alignment-only output columns before the next layer.
    return out.reshape(N, ho, wo_pad, Cout)[:, :, :wo, :]


def head(x_nhwc, w, b, num_classes):
    """AdaptiveAvgPool2d(1) + Linear with a lane-dense padded class dim."""
    N, H, W, C = x_nhwc.shape
    cls_pad = w.shape[-1]
    feats = x_nhwc.reshape(N, H * W, C)

    tn = _pick_tile(cls_pad)
    tck = _pick_tile(C)
    num_k = C // tck
    grid = (cls_pad // tn, num_k)

    acc_shape = (N, tn) if num_k > 1 else (8, LANE)

    cost = pl.CostEstimate(
        flops=2 * N * C * cls_pad + N * H * W * C,
        transcendentals=0,
        bytes_accessed=int(feats.size * 2 + w.size * 2
                           + N * cls_pad * 4 + cls_pad * 4),
    )

    out = pl.pallas_call(
        functools.partial(_head_kernel, inv_hw=1.0 / (H * W), num_k=num_k),
        out_shape=jax.ShapeDtypeStruct((N, cls_pad), jnp.float32),
        grid=grid,
        in_specs=[
            pl.BlockSpec((N, H * W, tck), lambda j, k: (0, 0, k)),
            pl.BlockSpec((tck, tn), lambda j, k: (k, j)),
            pl.BlockSpec((1, tn), lambda j, k: (0, j)),
        ],
        out_specs=pl.BlockSpec((N, tn), lambda j, k: (0, j)),
        scratch_shapes=[pltpu.VMEM(acc_shape, jnp.float32)],
        compiler_params=pltpu.CompilerParams(
            dimension_semantics=("parallel", "arbitrary"),
            vmem_limit_bytes=16 * 1024 * 1024),
        cost_estimate=cost,
    )(feats, w, b)
    return out[:, :num_classes]


# ---------------------------------------------------------------------------
# Parameter construction (mirrors AnyNet._initialize_weights, eval-mode BN)
# ---------------------------------------------------------------------------
def init_anynet_params(key, stem_w, depths, widths, strides, num_classes):
    keys = iter(jax.random.split(key, 64))

    def conv_block(cin, cout):
        # nn.Conv2d: normal(0, sqrt(2 / (kh*kw*out_channels)))
        std = math.sqrt(2.0 / (3 * 3 * cout))
        w = jax.random.normal(next(keys), (3, 3, cin, cout), jnp.float32) * std
        # BatchNorm2d eval-mode fold: gamma=1, beta=0, mean=0, var=1, eps=1e-5
        gamma = jnp.ones((cout,), jnp.float32)
        beta = jnp.zeros((cout,), jnp.float32)
        mean = jnp.zeros((cout,), jnp.float32)
        var = jnp.ones((cout,), jnp.float32)
        scale = gamma / jnp.sqrt(var + 1e-5)
        bias = beta - mean * scale
        # Pad channels to lane-dense 128 multiples; padded entries are zero so
        # padded lanes stay exactly zero through the whole network.
        cin_p, cout_p = _round_up(cin, LANE), _round_up(cout, LANE)
        w = jnp.pad(w, ((0, 0), (0, 0), (0, cin_p - cin), (0, cout_p - cout)))
        return {
            "w": w.reshape(9, cin_p, cout_p).astype(jnp.bfloat16),
            "scale": jnp.pad(scale, (0, cout_p - cout)).reshape(1, cout_p),
            "bias": jnp.pad(bias, (0, cout_p - cout)).reshape(1, cout_p),
        }

    params = {"stem": conv_block(3, stem_w)}
    prev = stem_w
    stages = []
    for d, w, _s in zip(depths, widths, strides):
        blocks = []
        for bi in range(d):
            cin = prev if bi == 0 else w
            blocks.append({"conv1": conv_block(cin, w),
                           "conv2": conv_block(w, w)})
        stages.append(blocks)
        prev = w
    params["stages"] = stages

    # Head: nn.Linear weight ~ normal(0, 0.01), bias = 0
    c_p = _round_up(prev, LANE)
    cls_p = _round_up(num_classes, LANE)
    hw = jax.random.normal(next(keys), (prev, num_classes), jnp.float32) * 0.01
    params["head"] = {
        "w": jnp.pad(hw, ((0, c_p - prev),
                          (0, cls_p - num_classes))).astype(jnp.bfloat16),
        "b": jnp.zeros((1, cls_p), jnp.float32),
    }
    return params


# ---------------------------------------------------------------------------
# Forward
# ---------------------------------------------------------------------------
@functools.partial(jax.jit, static_argnames=("strides_per_block", "num_classes"))
def anynet_forward(params, x_nchw, *, strides_per_block, num_classes):
    x = jnp.transpose(x_nchw, (0, 2, 3, 1))            # NCHW -> NHWC
    cin_p = _round_up(x.shape[-1], LANE)
    x = jnp.pad(x, ((0, 0), (0, 0), (0, 0), (0, cin_p - x.shape[-1])))
    x = x.astype(jnp.bfloat16)

    # Stem: conv3x3 stride 2 + BN + ReLU
    st = params["stem"]
    x = conv3x3_bn_relu(x, st["w"], st["scale"], st["bias"], stride=2)

    # Stages: vanilla blocks (conv3x3[s]+BN+ReLU) -> (conv3x3[1]+BN+ReLU)
    bi = 0
    for blocks in params["stages"]:
        for blk in blocks:
            s = strides_per_block[bi]; bi += 1
            c1, c2 = blk["conv1"], blk["conv2"]
            x = conv3x3_bn_relu(x, c1["w"], c1["scale"], c1["bias"], stride=s)
            x = conv3x3_bn_relu(x, c2["w"], c2["scale"], c2["bias"], stride=1)

    # Head: global average pool + linear
    return head(x, params["head"]["w"], params["head"]["b"], num_classes)


if __name__ == "__main__":
    key = jax.random.PRNGKey(0)
    k_params, k_x = jax.random.split(key)

    cfg = dict(stem_w=8, depths=[1, 1], widths=[8, 16], strides=[1, 2],
               block="vanilla_block", bottlenecks=None, group_widths=None,
               se_ratio=None, num_classes=10)

    params = init_anynet_params(k_params, cfg["stem_w"], cfg["depths"],
                                cfg["widths"], cfg["strides"],
                                cfg["num_classes"])
    strides_per_block = tuple(
        (s if bi == 0 else 1)
        for d, s in zip(cfg["depths"], cfg["strides"]) for bi in range(d))

    # PyTorch-convention NCHW input (Stem(3, stem_w) implies 3 input channels).
    x = jax.random.normal(k_x, (2, 3, 16, 16), jnp.float32)

    logits = anynet_forward(params, x,
                            strides_per_block=strides_per_block,
                            num_classes=cfg["num_classes"])
    jax.block_until_ready(logits)
    assert logits.shape == (2, cfg["num_classes"]), logits.shape
    assert bool(jnp.all(jnp.isfinite(logits)))
    print("KERNEL_OK")
</pallas_src>

<mosaic_0001>
module attributes {stable_mosaic.version = 11 : i64} {
  func.func @_conv_bn_relu_kernel(%arg0: i32, %arg1: i32, %arg2: i32, %arg3: memref<4x9x9x128xbf16, #tpu.memory_space<vmem>>, %arg4: memref<9x128x128xbf16, #tpu.memory_space<vmem>>, %arg5: memref<1x128xf32, #tpu.memory_space<vmem>>, %arg6: memref<1x128xf32, #tpu.memory_space<vmem>>, %arg7: memref<1x64x128xbf16, #tpu.memory_space<vmem>>, %arg8: memref<8x128xf32, #tpu.memory_space<vmem>>) attributes {dimension_semantics = [#tpu.dimension_semantics<parallel>, #tpu.dimension_semantics<parallel>, #tpu.dimension_semantics<arbitrary>], iteration_bounds = array<i64: 2, 1, 1>, scalar_prefetch = 0 : i64, scratch_operands = 1 : i64, tpu.core_type = #tpu.core_type<tc>, window_params = [{transform_indices = @transform_0, window_bounds = array<i64: 4, 9, 9, 128>}, {transform_indices = @transform_1, window_bounds = array<i64: 9, 128, 128>}, {transform_indices = @transform_2, window_bounds = array<i64: 1, 128>}, {transform_indices = @transform_3, window_bounds = array<i64: 1, 128>}, {transform_indices = @transform_4, window_bounds = array<i64: 1, 64, 128>}]} {
    %c0 = arith.constant 0 : index
    %c0_0 = arith.constant 0 : index
    %c0_1 = arith.constant 0 : index
    %c0_2 = arith.constant 0 : index
    %0 = vector.load %arg3[%c0, %c0_0, %c0_1, %c0_2] : memref<4x9x9x128xbf16, #tpu.memory_space<vmem>>, vector<1x8x8x128xbf16>
    %1 = vector.shape_cast %0 : vector<1x8x8x128xbf16> to vector<8x8x128xbf16>
    %2 = vector.shape_cast %1 : vector<8x8x128xbf16> to vector<64x128xbf16>
    %c0_3 = arith.constant 0 : index
    %c0_4 = arith.constant 0 : index
    %c0_5 = arith.constant 0 : index
    %3 = vector.load %arg4[%c0_3, %c0_4, %c0_5] : memref<9x128x128xbf16, #tpu.memory_space<vmem>>, vector<1x128x128xbf16>
    %4 = vector.shape_cast %3 : vector<1x128x128xbf16> to vector<128x128xbf16>
    %cst = arith.constant dense<0.000000e+00> : vector<64x128xf32>
    %5 = tpu.matmul %2, %4, %cst {dimension_numbers = #tpu.dot_dimension_numbers<[1], [0], [0], [1], [0, 0, 1, 1], [], []>} : vector<64x128xbf16>, vector<128x128xbf16>, vector<64x128xf32> -> vector<64x128xf32>
    %c1 = arith.constant 1 : index
    %c0_6 = arith.constant 0 : index
    %c0_7 = arith.constant 0 : index
    %c0_8 = arith.constant 0 : index
    %6 = vector.load %arg3[%c1, %c0_6, %c0_7, %c0_8] : memref<4x9x9x128xbf16, #tpu.memory_space<vmem>>, vector<1x8x8x128xbf16>
    %7 = vector.shape_cast %6 : vector<1x8x8x128xbf16> to vector<8x8x128xbf16>
    %8 = vector.shape_cast %7 : vector<8x8x128xbf16> to vector<64x128xbf16>
    %c1_9 = arith.constant 1 : index
    %c0_10 = arith.constant 0 : index
    %c0_11 = arith.constant 0 : index
    %9 = vector.load %arg4[%c1_9, %c0_10, %c0_11] : memref<9x128x128xbf16, #tpu.memory_space<vmem>>, vector<1x128x128xbf16>
    %10 = vector.shape_cast %9 : vector<1x128x128xbf16> to vector<128x128xbf16>
    %cst_12 = arith.constant dense<0.000000e+00> : vector<64x128xf32>
    %11 = tpu.matmul %8, %10, %cst_12 {dimension_numbers = #tpu.dot_dimension_numbers<[1], [0], [0], [1], [0, 0, 1, 1], [], []>} : vector<64x128xbf16>, vector<128x128xbf16>, vector<64x128xf32> -> vector<64x128xf32>
    %12 = arith.addf %5, %11 : vector<64x128xf32>
    %c0_13 = arith.constant 0 : index
    %c0_14 = arith.constant 0 : index
    %c1_15 = arith.constant 1 : index
    %c0_16 = arith.constant 0 : index
    %13 = vector.load %arg3[%c0_13, %c0_14, %c1_15, %c0_16] : memref<4x9x9x128xbf16, #tpu.memory_space<vmem>>, vector<1x8x8x128xbf16>
    %14 = vector.shape_cast %13 : vector<1x8x8x128xbf16> to vector<8x8x128xbf16>
    %15 = vector.shape_cast %14 : vector<8x8x128xbf16> to vector<64x128xbf16>
    %c2 = arith.constant 2 : index
    %c0_17 = arith.constant 0 : index
    %c0_18 = arith.constant 0 : index
    %16 = vector.load %arg4[%c2, %c0_17, %c0_18] : memref<9x128x128xbf16, #tpu.memory_space<vmem>>, vector<1x128x128xbf16>
    %17 = vector.shape_cast %16 : vector<1x128x128xbf16> to vector<128x128xbf16>
    %cst_19 = arith.constant dense<0.000000e+00> : vector<64x128xf32>
    %18 = tpu.matmul %15, %17, %cst_19 {dimension_numbers = #tpu.dot_dimension_numbers<[1], [0], [0], [1], [0, 0, 1, 1], [], []>} : vector<64x128xbf16>, vector<128x128xbf16>, vector<64x128xf32> -> vector<64x128xf32>
    %19 = arith.addf %12, %18 : vector<64x128xf32>
    %c2_20 = arith.constant 2 : index
    %c0_21 = arith.constant 0 : index
    %c0_22 = arith.constant 0 : index
    %c0_23 = arith.constant 0 : index
    %20 = vector.load %arg3[%c2_20, %c0_21, %c0_22, %c0_23] : memref<4x9x9x128xbf16, #tpu.memory_space<vmem>>, vector<1x8x8x128xbf16>
    %21 = vector.shape_cast %20 : vector<1x8x8x128xbf16> to vector<8x8x128xbf16>
    %22 = vector.shape_cast %21 : vector<8x8x128xbf16> to vector<64x128xbf16>
    %c3 = arith.constant 3 : index
    %c0_24 = arith.constant 0 : index
    %c0_25 = arith.constant 0 : index
    %23 = vector.load %arg4[%c3, %c0_24, %c0_25] : memref<9x128x128xbf16, #tpu.memory_space<vmem>>, vector<1x128x128xbf16>
    %24 = vector.shape_cast %23 : vector<1x128x128xbf16> to vector<128x128xbf16>
    %cst_26 = arith.constant dense<0.000000e+00> : vector<64x128xf32>
    %25 = tpu.matmul %22, %24, %cst_26 {dimension_numbers = #tpu.dot_dimension_numbers<[1], [0], [0], [1], [0, 0, 1, 1], [], []>} : vector<64x128xbf16>, vector<128x128xbf16>, vector<64x128xf32> -> vector<64x128xf32>
    %26 = arith.addf %19, %25 : vector<64x128xf32>
    %c3_27 = arith.constant 3 : index
    %c0_28 = arith.constant 0 : index
    %c0_29 = arith.constant 0 : index
    %c0_30 = arith.constant 0 : index
    %27 = vector.load %arg3[%c3_27, %c0_28, %c0_29, %c0_30] : memref<4x9x9x128xbf16, #tpu.memory_space<vmem>>, vector<1x8x8x128xbf16>
    %28 = vector.shape_cast %27 : vector<1x8x8x128xbf16> to vector<8x8x128xbf16>
    %29 = vector.shape_cast %28 : vector<8x8x128xbf16> to vector<64x128xbf16>
    %c4 = arith.constant 4 : index
    %c0_31 = arith.constant 0 : index
    %c0_32 = arith.constant 0 : index
    %30 = vector.load %arg4[%c4, %c0_31, %c0_32] : memref<9x128x128xbf16, #tpu.memory_space<vmem>>, vector<1x128x128xbf16>
    %31 = vector.shape_cast %30 : vector<1x128x128xbf16> to vector<128x128xbf16>
    %cst_33 = arith.constant dense<0.000000e+00> : vector<64x128xf32>
    %32 = tpu.matmul %29, %31, %cst_33 {dimension_numbers = #tpu.dot_dimension_numbers<[1], [0], [0], [1], [0, 0, 1, 1], [], []>} : vector<64x128xbf16>, vector<128x128xbf16>, vector<64x128xf32> -> vector<64x128xf32>
    %33 = arith.addf %26, %32 : vector<64x128xf32>
    %c2_34 = arith.constant 2 : index
    %c0_35 = arith.constant 0 : index
    %c1_36 = arith.constant 1 : index
    %c0_37 = arith.constant 0 : index
    %34 = vector.load %arg3[%c2_34, %c0_35, %c1_36, %c0_37] : memref<4x9x9x128xbf16, #tpu.memory_space<vmem>>, vector<1x8x8x128xbf16>
    %35 = vector.shape_cast %34 : vector<1x8x8x128xbf16> to vector<8x8x128xbf16>
    %36 = vector.shape_cast %35 : vector<8x8x128xbf16> to vector<64x128xbf16>
    %c5 = arith.constant 5 : index
    %c0_38 = arith.constant 0 : index
    %c0_39 = arith.constant 0 : index
    %37 = vector.load %arg4[%c5, %c0_38, %c0_39] : memref<9x128x128xbf16, #tpu.memory_space<vmem>>, vector<1x128x128xbf16>
    %38 = vector.shape_cast %37 : vector<1x128x128xbf16> to vector<128x128xbf16>
    %cst_40 = arith.constant dense<0.000000e+00> : vector<64x128xf32>
    %39 = tpu.matmul %36, %38, %cst_40 {dimension_numbers = #tpu.dot_dimension_numbers<[1], [0], [0], [1], [0, 0, 1, 1], [], []>} : vector<64x128xbf16>, vector<128x128xbf16>, vector<64x128xf32> -> vector<64x128xf32>
    %40 = arith.addf %33, %39 : vector<64x128xf32>
    %c0_41 = arith.constant 0 : index
    %c1_42 = arith.constant 1 : index
    %c0_43 = arith.constant 0 : index
    %c0_44 = arith.constant 0 : index
    %41 = vector.load %arg3[%c0_41, %c1_42, %c0_43, %c0_44] : memref<4x9x9x128xbf16, #tpu.memory_space<vmem>>, vector<1x8x8x128xbf16>
    %42 = vector.shape_cast %41 : vector<1x8x8x128xbf16> to vector<8x8x128xbf16>
    %43 = vector.shape_cast %42 : vector<8x8x128xbf16> to vector<64x128xbf16>
    %c6 = arith.constant 6 : index
    %c0_45 = arith.constant 0 : index
    %c0_46 = arith.constant 0 : index
    %44 = vector.load %arg4[%c6, %c0_45, %c0_46] : memref<9x128x128xbf16, #tpu.memory_space<vmem>>, vector<1x128x128xbf16>
    %45 = vector.shape_cast %44 : vector<1x128x128xbf16> to vector<128x128xbf16>
    %cst_47 = arith.constant dense<0.000000e+00> : vector<64x128xf32>
    %46 = tpu.matmul %43, %45, %cst_47 {dimension_numbers = #tpu.dot_dimension_numbers<[1], [0], [0], [1], [0, 0, 1, 1], [], []>} : vector<64x128xbf16>, vector<128x128xbf16>, vector<64x128xf32> -> vector<64x128xf32>
    %47 = arith.addf %40, %46 : vector<64x128xf32>
    %c1_48 = arith.constant 1 : index
    %c1_49 = arith.constant 1 : index
    %c0_50 = arith.constant 0 : index
    %c0_51 = arith.constant 0 : index
    %48 = vector.load %arg3[%c1_48, %c1_49, %c0_50, %c0_51] : memref<4x9x9x128xbf16, #tpu.memory_space<vmem>>, vector<1x8x8x128xbf16>
    %49 = vector.shape_cast %48 : vector<1x8x8x128xbf16> to vector<8x8x128xbf16>
    %50 = vector.shape_cast %49 : vector<8x8x128xbf16> to vector<64x128xbf16>
    %c7 = arith.constant 7 : index
    %c0_52 = arith.constant 0 : index
    %c0_53 = arith.constant 0 : index
    %51 = vector.load %arg4[%c7, %c0_52, %c0_53] : memref<9x128x128xbf16, #tpu.memory_space<vmem>>, vector<1x128x128xbf16>
    %52 = vector.shape_cast %51 : vector<1x128x128xbf16> to vector<128x128xbf16>
    %cst_54 = arith.constant dense<0.000000e+00> : vector<64x128xf32>
    %53 = tpu.matmul %50, %52, %cst_54 {dimension_numbers = #tpu.dot_dimension_numbers<[1], [0], [0], [1], [0, 0, 1, 1], [], []>} : vector<64x128xbf16>, vector<128x128xbf16>, vector<64x128xf32> -> vector<64x128xf32>
    %54 = arith.addf %47, %53 : vector<64x128xf32>
    %c0_55 = arith.constant 0 : index
    %c1_56 = arith.constant 1 : index
    %c1_57 = arith.constant 1 : index
    %c0_58 = arith.constant 0 : index
    %55 = vector.load %arg3[%c0_55, %c1_56, %c1_57, %c0_58] : memref<4x9x9x128xbf16, #tpu.memory_space<vmem>>, vector<1x8x8x128xbf16>
    %56 = vector.shape_cast %55 : vector<1x8x8x128xbf16> to vector<8x8x128xbf16>
    %57 = vector.shape_cast %56 : vector<8x8x128xbf16> to vector<64x128xbf16>
    %c8 = arith.constant 8 : index
    %c0_59 = arith.constant 0 : index
    %c0_60 = arith.constant 0 : index
    %58 = vector.load %arg4[%c8, %c0_59, %c0_60] : memref<9x128x128xbf16, #tpu.memory_space<vmem>>, vector<1x128x128xbf16>
    %59 = vector.shape_cast %58 : vector<1x128x128xbf16> to vector<128x128xbf16>
    %cst_61 = arith.constant dense<0.000000e+00> : vector<64x128xf32>
    %60 = tpu.matmul %57, %59, %cst_61 {dimension_numbers = #tpu.dot_dimension_numbers<[1], [0], [0], [1], [0, 0, 1, 1], [], []>} : vector<64x128xbf16>, vector<128x128xbf16>, vector<64x128xf32> -> vector<64x128xf32>
    %61 = arith.addf %54, %60 : vector<64x128xf32>
    %c0_62 = arith.constant 0 : index
    %c0_63 = arith.constant 0 : index
    %62 = vector.load %arg5[%c0_62, %c0_63] : memref<1x128xf32, #tpu.memory_space<vmem>>, vector<1x128xf32>
    %63 = vector.broadcast %62 : vector<1x128xf32> to vector<64x128xf32>
    %64 = arith.mulf %61, %63 : vector<64x128xf32>
    %c0_64 = arith.constant 0 : index
    %c0_65 = arith.constant 0 : index
    %65 = vector.load %arg6[%c0_64, %c0_65] : memref<1x128xf32, #tpu.memory_space<vmem>>, vector<1x128xf32>
    %66 = vector.broadcast %65 : vector<1x128xf32> to vector<64x128xf32>
    %67 = arith.addf %64, %66 : vector<64x128xf32>
    %cst_66 = arith.constant 0.000000e+00 : f32
    %68 = vector.broadcast %cst_66 : f32 to vector<64x128xf32>
    %69 = arith.maximumf %67, %68 : vector<64x128xf32>
    %70 = arith.truncf %69 : vector<64x128xf32> to vector<64x128xbf16>
    %c0_67 = arith.constant 0 : index
    %c0_68 = arith.constant 0 : index
    %c0_69 = arith.constant 0 : index
    %71 = vector.load %arg7[%c0_67, %c0_68, %c0_69] : memref<1x64x128xbf16, #tpu.memory_space<vmem>>, vector<1x64x128xbf16>
    %72 = vector.shape_cast %71 : vector<1x64x128xbf16> to vector<64x128xbf16>
    %73 = vector.shape_cast %70 : vector<64x128xbf16> to vector<1x64x128xbf16>
    tpu.vector_store %arg7[%c0_67, %c0_68, %c0_69], %73 {strides = array<i32>} : memref<1x64x128xbf16, #tpu.memory_space<vmem>>, vector<1x64x128xbf16>,
    return
  }
  func.func @transform_0(%arg0: i32, %arg1: i32, %arg2: i32) -> (i32, i32, i32, i32) {
    %c0_i32 = arith.constant 0 : i32
    %c0_i32_0 = arith.constant 0 : i32
    %c0_i32_1 = arith.constant 0 : i32
    return %arg0, %c0_i32, %c0_i32_0, %arg2 : i32, i32, i32, i32
  }
  func.func @transform_1(%arg0: i32, %arg1: i32, %arg2: i32) -> (i32, i32, i32) {
    %c0_i32 = arith.constant 0 : i32
    %c0_i32_0 = arith.constant 0 : i32
    return %c0_i32, %arg2, %arg1 : i32, i32, i32
  }
  func.func @transform_2(%arg0: i32, %arg1: i32, %arg2: i32) -> (i32, i32) {
    %c0_i32 = arith.constant 0 : i32
    %c0_i32_0 = arith.constant 0 : i32
    return %c0_i32, %arg1 : i32, i32
  }
  func.func @transform_3(%arg0: i32, %arg1: i32, %arg2: i32) -> (i32, i32) {
    %c0_i32 = arith.constant 0 : i32
    %c0_i32_0 = arith.constant 0 : i32
    return %c0_i32, %arg1 : i32, i32
  }
  func.func @transform_4(%arg0: i32, %arg1: i32, %arg2: i32) -> (i32, i32, i32) {
    %c0_i32 = arith.constant 0 : i32
    %c0_i32_0 = arith.constant 0 : i32
    return %arg0, %c0_i32, %arg1 : i32, i32, i32
  }
}

module attributes {stable_mosaic.version = 11 : i64} {
  func.func @_conv_bn_relu_kernel(%arg0: i32, %arg1: i32, %arg2: i32, %arg3: memref<1x10x10x128xbf16, #tpu.memory_space<vmem>>, %arg4: memref<9x128x128xbf16, #tpu.memory_space<vmem>>, %arg5: memref<1x128xf32, #tpu.memory_space<vmem>>, %arg6: memref<1x128xf32, #tpu.memory_space<vmem>>, %arg7: memref<1x64x128xbf16, #tpu.memory_space<vmem>>, %arg8: memref<8x128xf32, #tpu.memory_space<vmem>>) attributes {dimension_semantics = [#tpu.dimension_semantics<parallel>, #tpu.dimension_semantics<parallel>, #tpu.dimension_semantics<arbitrary>], iteration_bounds = array<i64: 2, 1, 1>, scalar_prefetch = 0 : i64, scratch_operands = 1 : i64, tpu.core_type = #tpu.core_type<tc>, window_params = [{transform_indices = @transform_0, window_bounds = array<i64: 1, 10, 10, 128>}, {transform_indices = @transform_1, window_bounds = array<i64: 9, 128, 128>}, {transform_indices = @transform_2, window_bounds = array<i64: 1, 128>}, {transform_indices = @transform_3, window_bounds = array<i64: 1, 128>}, {transform_indices = @transform_4, window_bounds = array<i64: 1, 64, 128>}]} {
    %c0 = arith.constant 0 : index
    %c0_0 = arith.constant 0 : index
    %c0_1 = arith.constant 0 : index
    %c0_2 = arith.constant 0 : index
    %0 = vector.load %arg3[%c0, %c0_0, %c0_1, %c0_2] : memref<1x10x10x128xbf16, #tpu.memory_space<vmem>>, vector<1x8x8x128xbf16>
    %1 = vector.shape_cast %0 : vector<1x8x8x128xbf16> to vector<8x8x128xbf16>
    %2 = vector.shape_cast %1 : vector<8x8x128xbf16> to vector<64x128xbf16>
    %c0_3 = arith.constant 0 : index
    %c0_4 = arith.constant 0 : index
    %c0_5 = arith.constant 0 : index
    %3 = vector.load %arg4[%c0_3, %c0_4, %c0_5] : memref<9x128x128xbf16, #tpu.memory_space<vmem>>, vector<1x128x128xbf16>
    %4 = vector.shape_cast %3 : vector<1x128x128xbf16> to vector<128x128xbf16>
    %cst = arith.constant dense<0.000000e+00> : vector<64x128xf32>
    %5 = tpu.matmul %2, %4, %cst {dimension_numbers = #tpu.dot_dimension_numbers<[1], [0], [0], [1], [0, 0, 1, 1], [], []>} : vector<64x128xbf16>, vector<128x128xbf16>, vector<64x128xf32> -> vector<64x128xf32>
    %c0_6 = arith.constant 0 : index
    %c0_7 = arith.constant 0 : index
    %c1 = arith.constant 1 : index
    %c0_8 = arith.constant 0 : index
    %6 = vector.load %arg3[%c0_6, %c0_7, %c1, %c0_8] : memref<1x10x10x128xbf16, #tpu.memory_space<vmem>>, vector<1x8x8x128xbf16>
    %7 = vector.shape_cast %6 : vector<1x8x8x128xbf16> to vector<8x8x128xbf16>
    %8 = vector.shape_cast %7 : vector<8x8x128xbf16> to vector<64x128xbf16>
    %c1_9 = arith.constant 1 : index
    %c0_10 = arith.constant 0 : index
    %c0_11 = arith.constant 0 : index
    %9 = vector.load %arg4[%c1_9, %c0_10, %c0_11] : memref<9x128x128xbf16, #tpu.memory_space<vmem>>, vector<1x128x128xbf16>
    %10 = vector.shape_cast %9 : vector<1x128x128xbf16> to vector<128x128xbf16>
    %cst_12 = arith.constant dense<0.000000e+00> : vector<64x128xf32>
    %11 = tpu.matmul %8, %10, %cst_12 {dimension_numbers = #tpu.dot_dimension_numbers<[1], [0], [0], [1], [0, 0, 1, 1], [], []>} : vector<64x128xbf16>, vector<128x128xbf16>, vector<64x128xf32> -> vector<64x128xf32>
    %12 = arith.addf %5, %11 : vector<64x128xf32>
    %c0_13 = arith.constant 0 : index
    %c0_14 = arith.constant 0 : index
    %c2 = arith.constant 2 : index
    %c0_15 = arith.constant 0 : index
    %13 = vector.load %arg3[%c0_13, %c0_14, %c2, %c0_15] : memref<1x10x10x128xbf16, #tpu.memory_space<vmem>>, vector<1x8x8x128xbf16>
    %14 = vector.shape_cast %13 : vector<1x8x8x128xbf16> to vector<8x8x128xbf16>
    %15 = vector.shape_cast %14 : vector<8x8x128xbf16> to vector<64x128xbf16>
    %c2_16 = arith.constant 2 : index
    %c0_17 = arith.constant 0 : index
    %c0_18 = arith.constant 0 : index
    %16 = vector.load %arg4[%c2_16, %c0_17, %c0_18] : memref<9x128x128xbf16, #tpu.memory_space<vmem>>, vector<1x128x128xbf16>
    %17 = vector.shape_cast %16 : vector<1x128x128xbf16> to vector<128x128xbf16>
    %cst_19 = arith.constant dense<0.000000e+00> : vector<64x128xf32>
    %18 = tpu.matmul %15, %17, %cst_19 {dimension_numbers = #tpu.dot_dimension_numbers<[1], [0], [0], [1], [0, 0, 1, 1], [], []>} : vector<64x128xbf16>, vector<128x128xbf16>, vector<64x128xf32> -> vector<64x128xf32>
    %19 = arith.addf %12, %18 : vector<64x128xf32>
    %c0_20 = arith.constant 0 : index
    %c1_21 = arith.constant 1 : index
    %c0_22 = arith.constant 0 : index
    %c0_23 = arith.constant 0 : index
    %20 = vector.load %arg3[%c0_20, %c1_21, %c0_22, %c0_23] : memref<1x10x10x128xbf16, #tpu.memory_space<vmem>>, vector<1x8x8x128xbf16>
    %21 = vector.shape_cast %20 : vector<1x8x8x128xbf16> to vector<8x8x128xbf16>
    %22 = vector.shape_cast %21 : vector<8x8x128xbf16> to vector<64x128xbf16>
    %c3 = arith.constant 3 : index
    %c0_24 = arith.constant 0 : index
    %c0_25 = arith.constant 0 : index
    %23 = vector.load %arg4[%c3, %c0_24, %c0_25] : memref<9x128x128xbf16, #tpu.memory_space<vmem>>, vector<1x128x128xbf16>
    %24 = vector.shape_cast %23 : vector<1x128x128xbf16> to vector<128x128xbf16>
    %cst_26 = arith.constant dense<0.000000e+00> : vector<64x128xf32>
    %25 = tpu.matmul %22, %24, %cst_26 {dimension_numbers = #tpu.dot_dimension_numbers<[1], [0], [0], [1], [0, 0, 1, 1], [], []>} : vector<64x128xbf16>, vector<128x128xbf16>, vector<64x128xf32> -> vector<64x128xf32>
    %26 = arith.addf %19, %25 : vector<64x128xf32>
    %c0_27 = arith.constant 0 : index
    %c1_28 = arith.constant 1 : index
    %c1_29 = arith.constant 1 : index
    %c0_30 = arith.constant 0 : index
    %27 = vector.load %arg3[%c0_27, %c1_28, %c1_29, %c0_30] : memref<1x10x10x128xbf16, #tpu.memory_space<vmem>>, vector<1x8x8x128xbf16>
    %28 = vector.shape_cast %27 : vector<1x8x8x128xbf16> to vector<8x8x128xbf16>
    %29 = vector.shape_cast %28 : vector<8x8x128xbf16> to vector<64x128xbf16>
    %c4 = arith.constant 4 : index
    %c0_31 = arith.constant 0 : index
    %c0_32 = arith.constant 0 : index
    %30 = vector.load %arg4[%c4, %c0_31, %c0_32] : memref<9x128x128xbf16, #tpu.memory_space<vmem>>, vector<1x128x128xbf16>
    %31 = vector.shape_cast %30 : vector<1x128x128xbf16> to vector<128x128xbf16>
    %cst_33 = arith.constant dense<0.000000e+00> : vector<64x128xf32>
    %32 = tpu.matmul %29, %31, %cst_33 {dimension_numbers = #tpu.dot_dimension_numbers<[1], [0], [0], [1], [0, 0, 1, 1], [], []>} : vector<64x128xbf16>, vector<128x128xbf16>, vector<64x128xf32> -> vector<64x128xf32>
    %33 = arith.addf %26, %32 : vector<64x128xf32>
    %c0_34 = arith.constant 0 : index
    %c1_35 = arith.constant 1 : index
    %c2_36 = arith.constant 2 : index
    %c0_37 = arith.constant 0 : index
    %34 = vector.load %arg3[%c0_34, %c1_35, %c2_36, %c0_37] : memref<1x10x10x128xbf16, #tpu.memory_space<vmem>>, vector<1x8x8x128xbf16>
    %35 = vector.shape_cast %34 : vector<1x8x8x128xbf16> to vector<8x8x128xbf16>
    %36 = vector.shape_cast %35 : vector<8x8x128xbf16> to vector<64x128xbf16>
    %c5 = arith.constant 5 : index
    %c0_38 = arith.constant 0 : index
    %c0_39 = arith.constant 0 : index
    %37 = vector.load %arg4[%c5, %c0_38, %c0_39] : memref<9x128x128xbf16, #tpu.memory_space<vmem>>, vector<1x128x128xbf16>
    %38 = vector.shape_cast %37 : vector<1x128x128xbf16> to vector<128x128xbf16>
    %cst_40 = arith.constant dense<0.000000e+00> : vector<64x128xf32>
    %39 = tpu.matmul %36, %38, %cst_40 {dimension_numbers = #tpu.dot_dimension_numbers<[1], [0], [0], [1], [0, 0, 1, 1], [], []>} : vector<64x128xbf16>, vector<128x128xbf16>, vector<64x128xf32> -> vector<64x128xf32>
    %40 = arith.addf %33, %39 : vector<64x128xf32>
    %c0_41 = arith.constant 0 : index
    %c2_42 = arith.constant 2 : index
    %c0_43 = arith.constant 0 : index
    %c0_44 = arith.constant 0 : index
    %41 = vector.load %arg3[%c0_41, %c2_42, %c0_43, %c0_44] : memref<1x10x10x128xbf16, #tpu.memory_space<vmem>>, vector<1x8x8x128xbf16>
    %42 = vector.shape_cast %41 : vector<1x8x8x128xbf16> to vector<8x8x128xbf16>
    %43 = vector.shape_cast %42 : vector<8x8x128xbf16> to vector<64x128xbf16>
    %c6 = arith.constant 6 : index
    %c0_45 = arith.constant 0 : index
    %c0_46 = arith.constant 0 : index
    %44 = vector.load %arg4[%c6, %c0_45, %c0_46] : memref<9x128x128xbf16, #tpu.memory_space<vmem>>, vector<1x128x128xbf16>
    %45 = vector.shape_cast %44 : vector<1x128x128xbf16> to vector<128x128xbf16>
    %cst_47 = arith.constant dense<0.000000e+00> : vector<64x128xf32>
    %46 = tpu.matmul %43, %45, %cst_47 {dimension_numbers = #tpu.dot_dimension_numbers<[1], [0], [0], [1], [0, 0, 1, 1], [], []>} : vector<64x128xbf16>, vector<128x128xbf16>, vector<64x128xf32> -> vector<64x128xf32>
    %47 = arith.addf %40, %46 : vector<64x128xf32>
    %c0_48 = arith.constant 0 : index
    %c2_49 = arith.constant 2 : index
    %c1_50 = arith.constant 1 : index
    %c0_51 = arith.constant 0 : index
    %48 = vector.load %arg3[%c0_48, %c2_49, %c1_50, %c0_51] : memref<1x10x10x128xbf16, #tpu.memory_space<vmem>>, vector<1x8x8x128xbf16>
    %49 = vector.shape_cast %48 : vector<1x8x8x128xbf16> to vector<8x8x128xbf16>
    %50 = vector.shape_cast %49 : vector<8x8x128xbf16> to vector<64x128xbf16>
    %c7 = arith.constant 7 : index
    %c0_52 = arith.constant 0 : index
    %c0_53 = arith.constant 0 : index
    %51 = vector.load %arg4[%c7, %c0_52, %c0_53] : memref<9x128x128xbf16, #tpu.memory_space<vmem>>, vector<1x128x128xbf16>
    %52 = vector.shape_cast %51 : vector<1x128x128xbf16> to vector<128x128xbf16>
    %cst_54 = arith.constant dense<0.000000e+00> : vector<64x128xf32>
    %53 = tpu.matmul %50, %52, %cst_54 {dimension_numbers = #tpu.dot_dimension_numbers<[1], [0], [0], [1], [0, 0, 1, 1], [], []>} : vector<64x128xbf16>, vector<128x128xbf16>, vector<64x128xf32> -> vector<64x128xf32>
    %54 = arith.addf %47, %53 : vector<64x128xf32>
    %c0_55 = arith.constant 0 : index
    %c2_56 = arith.constant 2 : index
    %c2_57 = arith.constant 2 : index
    %c0_58 = arith.constant 0 : index
    %55 = vector.load %arg3[%c0_55, %c2_56, %c2_57, %c0_58] : memref<1x10x10x128xbf16, #tpu.memory_space<vmem>>, vector<1x8x8x128xbf16>
    %56 = vector.shape_cast %55 : vector<1x8x8x128xbf16> to vector<8x8x128xbf16>
    %57 = vector.shape_cast %56 : vector<8x8x128xbf16> to vector<64x128xbf16>
    %c8 = arith.constant 8 : index
    %c0_59 = arith.constant 0 : index
    %c0_60 = arith.constant 0 : index
    %58 = vector.load %arg4[%c8, %c0_59, %c0_60] : memref<9x128x128xbf16, #tpu.memory_space<vmem>>, vector<1x128x128xbf16>
    %59 = vector.shape_cast %58 : vector<1x128x128xbf16> to vector<128x128xbf16>
    %cst_61 = arith.constant dense<0.000000e+00> : vector<64x128xf32>
    %60 = tpu.matmul %57, %59, %cst_61 {dimension_numbers = #tpu.dot_dimension_numbers<[1], [0], [0], [1], [0, 0, 1, 1], [], []>} : vector<64x128xbf16>, vector<128x128xbf16>, vector<64x128xf32> -> vector<64x128xf32>
    %61 = arith.addf %54, %60 : vector<64x128xf32>
    %c0_62 = arith.constant 0 : index
    %c0_63 = arith.constant 0 : index
    %62 = vector.load %arg5[%c0_62, %c0_63] : memref<1x128xf32, #tpu.memory_space<vmem>>, vector<1x128xf32>
    %63 = vector.broadcast %62 : vector<1x128xf32> to vector<64x128xf32>
    %64 = arith.mulf %61, %63 : vector<64x128xf32>
    %c0_64 = arith.constant 0 : index
    %c0_65 = arith.constant 0 : index
    %65 = vector.load %arg6[%c0_64, %c0_65] : memref<1x128xf32, #tpu.memory_space<vmem>>, vector<1x128xf32>
    %66 = vector.broadcast %65 : vector<1x128xf32> to vector<64x128xf32>
    %67 = arith.addf %64, %66 : vector<64x128xf32>
    %cst_66 = arith.constant 0.000000e+00 : f32
    %68 = vector.broadcast %cst_66 : f32 to vector<64x128xf32>
    %69 = arith.maximumf %67, %68 : vector<64x128xf32>
    %70 = arith.truncf %69 : vector<64x128xf32> to vector<64x128xbf16>
    %c0_67 = arith.constant 0 : index
    %c0_68 = arith.constant 0 : index
    %c0_69 = arith.constant 0 : index
    %71 = vector.load %arg7[%c0_67, %c0_68, %c0_69] : memref<1x64x128xbf16, #tpu.memory_space<vmem>>, vector<1x64x128xbf16>
    %72 = vector.shape_cast %71 : vector<1x64x128xbf16> to vector<64x128xbf16>
    %73 = vector.shape_cast %70 : vector<64x128xbf16> to vector<1x64x128xbf16>
    tpu.vector_store %arg7[%c0_67, %c0_68, %c0_69], %73 {strides = array<i32>} : memref<1x64x128xbf16, #tpu.memory_space<vmem>>, vector<1x64x128xbf16>,
    return
  }
  func.func @transform_0(%arg0: i32, %arg1: i32, %arg2: i32) -> (i32, i32, i32, i32) {
    %c0_i32 = arith.constant 0 : i32
    %c0_i32_0 = arith.constant 0 : i32
    %c0_i32_1 = arith.constant 0 : i32
    return %arg0, %c0_i32, %c0_i32_0, %arg2 : i32, i32, i32, i32
  }
  func.func @transform_1(%arg0: i32, %arg1: i32, %arg2: i32) -> (i32, i32, i32) {
    %c0_i32 = arith.constant 0 : i32
    %c0_i32_0 = arith.constant 0 : i32
    return %c0_i32, %arg2, %arg1 : i32, i32, i32
  }
  func.func @transform_2(%arg0: i32, %arg1: i32, %arg2: i32) -> (i32, i32) {
    %c0_i32 = arith.constant 0 : i32
    %c0_i32_0 = arith.constant 0 : i32
    return %c0_i32, %arg1 : i32, i32
  }
  func.func @transform_3(%arg0: i32, %arg1: i32, %arg2: i32) -> (i32, i32) {
    %c0_i32 = arith.constant 0 : i32
    %c0_i32_0 = arith.constant 0 : i32
    return %c0_i32, %arg1 : i32, i32
  }
  func.func @transform_4(%arg0: i32, %arg1: i32, %arg2: i32) -> (i32, i32, i32) {
    %c0_i32 = arith.constant 0 : i32
    %c0_i32_0 = arith.constant 0 : i32
    return %arg0, %c0_i32, %arg1 : i32, i32, i32
  }
}

module attributes {stable_mosaic.version = 11 : i64} {
  func.func @_conv_bn_relu_kernel(%arg0: i32, %arg1: i32, %arg2: i32, %arg3: memref<1x6x10x128xbf16, #tpu.memory_space<vmem>>, %arg4: memref<9x128x128xbf16, #tpu.memory_space<vmem>>, %arg5: memref<1x128xf32, #tpu.memory_space<vmem>>, %arg6: memref<1x128xf32, #tpu.memory_space<vmem>>, %arg7: memref<1x32x128xbf16, #tpu.memory_space<vmem>>, %arg8: memref<8x128xf32, #tpu.memory_space<vmem>>) attributes {dimension_semantics = [#tpu.dimension_semantics<parallel>, #tpu.dimension_semantics<parallel>, #tpu.dimension_semantics<arbitrary>], iteration_bounds = array<i64: 2, 1, 1>, scalar_prefetch = 0 : i64, scratch_operands = 1 : i64, tpu.core_type = #tpu.core_type<tc>, window_params = [{transform_indices = @transform_0, window_bounds = array<i64: 1, 6, 10, 128>}, {transform_indices = @transform_1, window_bounds = array<i64: 9, 128, 128>}, {transform_indices = @transform_2, window_bounds = array<i64: 1, 128>}, {transform_indices = @transform_3, window_bounds = array<i64: 1, 128>}, {transform_indices = @transform_4, window_bounds = array<i64: 1, 32, 128>}]} {
    %c0 = arith.constant 0 : index
    %c0_0 = arith.constant 0 : index
    %c0_1 = arith.constant 0 : index
    %c0_2 = arith.constant 0 : index
    %0 = vector.load %arg3[%c0, %c0_0, %c0_1, %c0_2] : memref<1x6x10x128xbf16, #tpu.memory_space<vmem>>, vector<1x4x8x128xbf16>
    %1 = vector.shape_cast %0 : vector<1x4x8x128xbf16> to vector<4x8x128xbf16>
    %2 = vector.shape_cast %1 : vector<4x8x128xbf16> to vector<32x128xbf16>
    %c0_3 = arith.constant 0 : index
    %c0_4 = arith.constant 0 : index
    %c0_5 = arith.constant 0 : index
    %3 = vector.load %arg4[%c0_3, %c0_4, %c0_5] : memref<9x128x128xbf16, #tpu.memory_space<vmem>>, vector<1x128x128xbf16>
    %4 = vector.shape_cast %3 : vector<1x128x128xbf16> to vector<128x128xbf16>
    %cst = arith.constant dense<0.000000e+00> : vector<32x128xf32>
    %5 = tpu.matmul %2, %4, %cst {dimension_numbers = #tpu.dot_dimension_numbers<[1], [0], [0], [1], [0, 0, 1, 1], [], []>} : vector<32x128xbf16>, vector<128x128xbf16>, vector<32x128xf32> -> vector<32x128xf32>
    %c0_6 = arith.constant 0 : index
    %c0_7 = arith.constant 0 : index
    %c1 = arith.constant 1 : index
    %c0_8 = arith.constant 0 : index
    %6 = vector.load %arg3[%c0_6, %c0_7, %c1, %c0_8] : memref<1x6x10x128xbf16, #tpu.memory_space<vmem>>, vector<1x4x8x128xbf16>
    %7 = vector.shape_cast %6 : vector<1x4x8x128xbf16> to vector<4x8x128xbf16>
    %8 = vector.shape_cast %7 : vector<4x8x128xbf16> to vector<32x128xbf16>
    %c1_9 = arith.constant 1 : index
    %c0_10 = arith.constant 0 : index
    %c0_11 = arith.constant 0 : index
    %9 = vector.load %arg4[%c1_9, %c0_10, %c0_11] : memref<9x128x128xbf16, #tpu.memory_space<vmem>>, vector<1x128x128xbf16>
    %10 = vector.shape_cast %9 : vector<1x128x128xbf16> to vector<128x128xbf16>
    %cst_12 = arith.constant dense<0.000000e+00> : vector<32x128xf32>
    %11 = tpu.matmul %8, %10, %cst_12 {dimension_numbers = #tpu.dot_dimension_numbers<[1], [0], [0], [1], [0, 0, 1, 1], [], []>} : vector<32x128xbf16>, vector<128x128xbf16>, vector<32x128xf32> -> vector<32x128xf32>
    %12 = arith.addf %5, %11 : vector<32x128xf32>
    %c0_13 = arith.constant 0 : index
    %c0_14 = arith.constant 0 : index
    %c2 = arith.constant 2 : index
    %c0_15 = arith.constant 0 : index
    %13 = vector.load %arg3[%c0_13, %c0_14, %c2, %c0_15] : memref<1x6x10x128xbf16, #tpu.memory_space<vmem>>, vector<1x4x8x128xbf16>
    %14 = vector.shape_cast %13 : vector<1x4x8x128xbf16> to vector<4x8x128xbf16>
    %15 = vector.shape_cast %14 : vector<4x8x128xbf16> to vector<32x128xbf16>
    %c2_16 = arith.constant 2 : index
    %c0_17 = arith.constant 0 : index
    %c0_18 = arith.constant 0 : index
    %16 = vector.load %arg4[%c2_16, %c0_17, %c0_18] : memref<9x128x128xbf16, #tpu.memory_space<vmem>>, vector<1x128x128xbf16>
    %17 = vector.shape_cast %16 : vector<1x128x128xbf16> to vector<128x128xbf16>
    %cst_19 = arith.constant dense<0.000000e+00> : vector<32x128xf32>
    %18 = tpu.matmul %15, %17, %cst_19 {dimension_numbers = #tpu.dot_dimension_numbers<[1], [0], [0], [1], [0, 0, 1, 1], [], []>} : vector<32x128xbf16>, vector<128x128xbf16>, vector<32x128xf32> -> vector<32x128xf32>
    %19 = arith.addf %12, %18 : vector<32x128xf32>
    %c0_20 = arith.constant 0 : index
    %c1_21 = arith.constant 1 : index
    %c0_22 = arith.constant 0 : index
    %c0_23 = arith.constant 0 : index
    %20 = vector.load %arg3[%c0_20, %c1_21, %c0_22, %c0_23] : memref<1x6x10x128xbf16, #tpu.memory_space<vmem>>, vector<1x4x8x128xbf16>
    %21 = vector.shape_cast %20 : vector<1x4x8x128xbf16> to vector<4x8x128xbf16>
    %22 = vector.shape_cast %21 : vector<4x8x128xbf16> to vector<32x128xbf16>
    %c3 = arith.constant 3 : index
    %c0_24 = arith.constant 0 : index
    %c0_25 = arith.constant 0 : index
    %23 = vector.load %arg4[%c3, %c0_24, %c0_25] : memref<9x128x128xbf16, #tpu.memory_space<vmem>>, vector<1x128x128xbf16>
    %24 = vector.shape_cast %23 : vector<1x128x128xbf16> to vector<128x128xbf16>
    %cst_26 = arith.constant dense<0.000000e+00> : vector<32x128xf32>
    %25 = tpu.matmul %22, %24, %cst_26 {dimension_numbers = #tpu.dot_dimension_numbers<[1], [0], [0], [1], [0, 0, 1, 1], [], []>} : vector<32x128xbf16>, vector<128x128xbf16>, vector<32x128xf32> -> vector<32x128xf32>
    %26 = arith.addf %19, %25 : vector<32x128xf32>
    %c0_27 = arith.constant 0 : index
    %c1_28 = arith.constant 1 : index
    %c1_29 = arith.constant 1 : index
    %c0_30 = arith.constant 0 : index
    %27 = vector.load %arg3[%c0_27, %c1_28, %c1_29, %c0_30] : memref<1x6x10x128xbf16, #tpu.memory_space<vmem>>, vector<1x4x8x128xbf16>
    %28 = vector.shape_cast %27 : vector<1x4x8x128xbf16> to vector<4x8x128xbf16>
    %29 = vector.shape_cast %28 : vector<4x8x128xbf16> to vector<32x128xbf16>
    %c4 = arith.constant 4 : index
    %c0_31 = arith.constant 0 : index
    %c0_32 = arith.constant 0 : index
    %30 = vector.load %arg4[%c4, %c0_31, %c0_32] : memref<9x128x128xbf16, #tpu.memory_space<vmem>>, vector<1x128x128xbf16>
    %31 = vector.shape_cast %30 : vector<1x128x128xbf16> to vector<128x128xbf16>
    %cst_33 = arith.constant dense<0.000000e+00> : vector<32x128xf32>
    %32 = tpu.matmul %29, %31, %cst_33 {dimension_numbers = #tpu.dot_dimension_numbers<[1], [0], [0], [1], [0, 0, 1, 1], [], []>} : vector<32x128xbf16>, vector<128x128xbf16>, vector<32x128xf32> -> vector<32x128xf32>
    %33 = arith.addf %26, %32 : vector<32x128xf32>
    %c0_34 = arith.constant 0 : index
    %c1_35 = arith.constant 1 : index
    %c2_36 = arith.constant 2 : index
    %c0_37 = arith.constant 0 : index
    %34 = vector.load %arg3[%c0_34, %c1_35, %c2_36, %c0_37] : memref<1x6x10x128xbf16, #tpu.memory_space<vmem>>, vector<1x4x8x128xbf16>
    %35 = vector.shape_cast %34 : vector<1x4x8x128xbf16> to vector<4x8x128xbf16>
    %36 = vector.shape_cast %35 : vector<4x8x128xbf16> to vector<32x128xbf16>
    %c5 = arith.constant 5 : index
    %c0_38 = arith.constant 0 : index
    %c0_39 = arith.constant 0 : index
    %37 = vector.load %arg4[%c5, %c0_38, %c0_39] : memref<9x128x128xbf16, #tpu.memory_space<vmem>>, vector<1x128x128xbf16>
    %38 = vector.shape_cast %37 : vector<1x128x128xbf16> to vector<128x128xbf16>
    %cst_40 = arith.constant dense<0.000000e+00> : vector<32x128xf32>
    %39 = tpu.matmul %36, %38, %cst_40 {dimension_numbers = #tpu.dot_dimension_numbers<[1], [0], [0], [1], [0, 0, 1, 1], [], []>} : vector<32x128xbf16>, vector<128x128xbf16>, vector<32x128xf32> -> vector<32x128xf32>
    %40 = arith.addf %33, %39 : vector<32x128xf32>
    %c0_41 = arith.constant 0 : index
    %c2_42 = arith.constant 2 : index
    %c0_43 = arith.constant 0 : index
    %c0_44 = arith.constant 0 : index
    %41 = vector.load %arg3[%c0_41, %c2_42, %c0_43, %c0_44] : memref<1x6x10x128xbf16, #tpu.memory_space<vmem>>, vector<1x4x8x128xbf16>
    %42 = vector.shape_cast %41 : vector<1x4x8x128xbf16> to vector<4x8x128xbf16>
    %43 = vector.shape_cast %42 : vector<4x8x128xbf16> to vector<32x128xbf16>
    %c6 = arith.constant 6 : index
    %c0_45 = arith.constant 0 : index
    %c0_46 = arith.constant 0 : index
    %44 = vector.load %arg4[%c6, %c0_45, %c0_46] : memref<9x128x128xbf16, #tpu.memory_space<vmem>>, vector<1x128x128xbf16>
    %45 = vector.shape_cast %44 : vector<1x128x128xbf16> to vector<128x128xbf16>
    %cst_47 = arith.constant dense<0.000000e+00> : vector<32x128xf32>
    %46 = tpu.matmul %43, %45, %cst_47 {dimension_numbers = #tpu.dot_dimension_numbers<[1], [0], [0], [1], [0, 0, 1, 1], [], []>} : vector<32x128xbf16>, vector<128x128xbf16>, vector<32x128xf32> -> vector<32x128xf32>
    %47 = arith.addf %40, %46 : vector<32x128xf32>
    %c0_48 = arith.constant 0 : index
    %c2_49 = arith.constant 2 : index
    %c1_50 = arith.constant 1 : index
    %c0_51 = arith.constant 0 : index
    %48 = vector.load %arg3[%c0_48, %c2_49, %c1_50, %c0_51] : memref<1x6x10x128xbf16, #tpu.memory_space<vmem>>, vector<1x4x8x128xbf16>
    %49 = vector.shape_cast %48 : vector<1x4x8x128xbf16> to vector<4x8x128xbf16>
    %50 = vector.shape_cast %49 : vector<4x8x128xbf16> to vector<32x128xbf16>
    %c7 = arith.constant 7 : index
    %c0_52 = arith.constant 0 : index
    %c0_53 = arith.constant 0 : index
    %51 = vector.load %arg4[%c7, %c0_52, %c0_53] : memref<9x128x128xbf16, #tpu.memory_space<vmem>>, vector<1x128x128xbf16>
    %52 = vector.shape_cast %51 : vector<1x128x128xbf16> to vector<128x128xbf16>
    %cst_54 = arith.constant dense<0.000000e+00> : vector<32x128xf32>
    %53 = tpu.matmul %50, %52, %cst_54 {dimension_numbers = #tpu.dot_dimension_numbers<[1], [0], [0], [1], [0, 0, 1, 1], [], []>} : vector<32x128xbf16>, vector<128x128xbf16>, vector<32x128xf32> -> vector<32x128xf32>
    %54 = arith.addf %47, %53 : vector<32x128xf32>
    %c0_55 = arith.constant 0 : index
    %c2_56 = arith.constant 2 : index
    %c2_57 = arith.constant 2 : index
    %c0_58 = arith.constant 0 : index
    %55 = vector.load %arg3[%c0_55, %c2_56, %c2_57, %c0_58] : memref<1x6x10x128xbf16, #tpu.memory_space<vmem>>, vector<1x4x8x128xbf16>
    %56 = vector.shape_cast %55 : vector<1x4x8x128xbf16> to vector<4x8x128xbf16>
    %57 = vector.shape_cast %56 : vector<4x8x128xbf16> to vector<32x128xbf16>
    %c8 = arith.constant 8 : index
    %c0_59 = arith.constant 0 : index
    %c0_60 = arith.constant 0 : index
    %58 = vector.load %arg4[%c8, %c0_59, %c0_60] : memref<9x128x128xbf16, #tpu.memory_space<vmem>>, vector<1x128x128xbf16>
    %59 = vector.shape_cast %58 : vector<1x128x128xbf16> to vector<128x128xbf16>
    %cst_61 = arith.constant dense<0.000000e+00> : vector<32x128xf32>
    %60 = tpu.matmul %57, %59, %cst_61 {dimension_numbers = #tpu.dot_dimension_numbers<[1], [0], [0], [1], [0, 0, 1, 1], [], []>} : vector<32x128xbf16>, vector<128x128xbf16>, vector<32x128xf32> -> vector<32x128xf32>
    %61 = arith.addf %54, %60 : vector<32x128xf32>
    %c0_62 = arith.constant 0 : index
    %c0_63 = arith.constant 0 : index
    %62 = vector.load %arg5[%c0_62, %c0_63] : memref<1x128xf32, #tpu.memory_space<vmem>>, vector<1x128xf32>
    %63 = vector.broadcast %62 : vector<1x128xf32> to vector<32x128xf32>
    %64 = arith.mulf %61, %63 : vector<32x128xf32>
    %c0_64 = arith.constant 0 : index
    %c0_65 = arith.constant 0 : index
    %65 = vector.load %arg6[%c0_64, %c0_65] : memref<1x128xf32, #tpu.memory_space<vmem>>, vector<1x128xf32>
    %66 = vector.broadcast %65 : vector<1x128xf32> to vector<32x128xf32>
    %67 = arith.addf %64, %66 : vector<32x128xf32>
    %cst_66 = arith.constant 0.000000e+00 : f32
    %68 = vector.broadcast %cst_66 : f32 to vector<32x128xf32>
    %69 = arith.maximumf %67, %68 : vector<32x128xf32>
    %70 = arith.truncf %69 : vector<32x128xf32> to vector<32x128xbf16>
    %c0_67 = arith.constant 0 : index
    %c0_68 = arith.constant 0 : index
    %c0_69 = arith.constant 0 : index
    %71 = vector.load %arg7[%c0_67, %c0_68, %c0_69] : memref<1x32x128xbf16, #tpu.memory_space<vmem>>, vector<1x32x128xbf16>
    %72 = vector.shape_cast %71 : vector<1x32x128xbf16> to vector<32x128xbf16>
    %73 = vector.shape_cast %70 : vector<32x128xbf16> to vector<1x32x128xbf16>
    tpu.vector_store %arg7[%c0_67, %c0_68, %c0_69], %73 {strides = array<i32>} : memref<1x32x128xbf16, #tpu.memory_space<vmem>>, vector<1x32x128xbf16>,
    return
  }
  func.func @transform_0(%arg0: i32, %arg1: i32, %arg2: i32) -> (i32, i32, i32, i32) {
    %c0_i32 = arith.constant 0 : i32
    %c0_i32_0 = arith.constant 0 : i32
    %c0_i32_1 = arith.constant 0 : i32
    return %arg0, %c0_i32, %c0_i32_0, %arg2 : i32, i32, i32, i32
  }
  func.func @transform_1(%arg0: i32, %arg1: i32, %arg2: i32) -> (i32, i32, i32) {
    %c0_i32 = arith.constant 0 : i32
    %c0_i32_0 = arith.constant 0 : i32
    return %c0_i32, %arg2, %arg1 : i32, i32, i32
  }
  func.func @transform_2(%arg0: i32, %arg1: i32, %arg2: i32) -> (i32, i32) {
    %c0_i32 = arith.constant 0 : i32
    %c0_i32_0 = arith.constant 0 : i32
    return %c0_i32, %arg1 : i32, i32
  }
  func.func @transform_3(%arg0: i32, %arg1: i32, %arg2: i32) -> (i32, i32) {
    %c0_i32 = arith.constant 0 : i32
    %c0_i32_0 = arith.constant 0 : i32
    return %c0_i32, %arg1 : i32, i32
  }
  func.func @transform_4(%arg0: i32, %arg1: i32, %arg2: i32) -> (i32, i32, i32) {
    %c0_i32 = arith.constant 0 : i32
    %c0_i32_0 = arith.constant 0 : i32
    return %arg0, %c0_i32, %arg1 : i32, i32, i32
  }
}

module attributes {stable_mosaic.version = 11 : i64} {
  func.func @_conv_bn_relu_kernel(%arg0: i32, %arg1: i32, %arg2: i32, %arg3: memref<4x5x9x128xbf16, #tpu.memory_space<vmem>>, %arg4: memref<9x128x128xbf16, #tpu.memory_space<vmem>>, %arg5: memref<1x128xf32, #tpu.memory_space<vmem>>, %arg6: memref<1x128xf32, #tpu.memory_space<vmem>>, %arg7: memref<1x32x128xbf16, #tpu.memory_space<vmem>>, %arg8: memref<8x128xf32, #tpu.memory_space<vmem>>) attributes {dimension_semantics = [#tpu.dimension_semantics<parallel>, #tpu.dimension_semantics<parallel>, #tpu.dimension_semantics<arbitrary>], iteration_bounds = array<i64: 2, 1, 1>, scalar_prefetch = 0 : i64, scratch_operands = 1 : i64, tpu.core_type = #tpu.core_type<tc>, window_params = [{transform_indices = @transform_0, window_bounds = array<i64: 4, 5, 9, 128>}, {transform_indices = @transform_1, window_bounds = array<i64: 9, 128, 128>}, {transform_indices = @transform_2, window_bounds = array<i64: 1, 128>}, {transform_indices = @transform_3, window_bounds = array<i64: 1, 128>}, {transform_indices = @transform_4, window_bounds = array<i64: 1, 32, 128>}]} {
    %c0 = arith.constant 0 : index
    %c0_0 = arith.constant 0 : index
    %c0_1 = arith.constant 0 : index
    %c0_2 = arith.constant 0 : index
    %0 = vector.load %arg3[%c0, %c0_0, %c0_1, %c0_2] : memref<4x5x9x128xbf16, #tpu.memory_space<vmem>>, vector<1x4x8x128xbf16>
    %1 = vector.shape_cast %0 : vector<1x4x8x128xbf16> to vector<4x8x128xbf16>
    %2 = vector.shape_cast %1 : vector<4x8x128xbf16> to vector<32x128xbf16>
    %c0_3 = arith.constant 0 : index
    %c0_4 = arith.constant 0 : index
    %c0_5 = arith.constant 0 : index
    %3 = vector.load %arg4[%c0_3, %c0_4, %c0_5] : memref<9x128x128xbf16, #tpu.memory_space<vmem>>, vector<1x128x128xbf16>
    %4 = vector.shape_cast %3 : vector<1x128x128xbf16> to vector<128x128xbf16>
    %cst = arith.constant dense<0.000000e+00> : vector<32x128xf32>
    %5 = tpu.matmul %2, %4, %cst {dimension_numbers = #tpu.dot_dimension_numbers<[1], [0], [0], [1], [0, 0, 1, 1], [], []>} : vector<32x128xbf16>, vector<128x128xbf16>, vector<32x128xf32> -> vector<32x128xf32>
    %c1 = arith.constant 1 : index
    %c0_6 = arith.constant 0 : index
    %c0_7 = arith.constant 0 : index
    %c0_8 = arith.constant 0 : index
    %6 = vector.load %arg3[%c1, %c0_6, %c0_7, %c0_8] : memref<4x5x9x128xbf16, #tpu.memory_space<vmem>>, vector<1x4x8x128xbf16>
    %7 = vector.shape_cast %6 : vector<1x4x8x128xbf16> to vector<4x8x128xbf16>
    %8 = vector.shape_cast %7 : vector<4x8x128xbf16> to vector<32x128xbf16>
    %c1_9 = arith.constant 1 : index
    %c0_10 = arith.constant 0 : index
    %c0_11 = arith.constant 0 : index
    %9 = vector.load %arg4[%c1_9, %c0_10, %c0_11] : memref<9x128x128xbf16, #tpu.memory_space<vmem>>, vector<1x128x128xbf16>
    %10 = vector.shape_cast %9 : vector<1x128x128xbf16> to vector<128x128xbf16>
    %cst_12 = arith.constant dense<0.000000e+00> : vector<32x128xf32>
    %11 = tpu.matmul %8, %10, %cst_12 {dimension_numbers = #tpu.dot_dimension_numbers<[1], [0], [0], [1], [0, 0, 1, 1], [], []>} : vector<32x128xbf16>, vector<128x128xbf16>, vector<32x128xf32> -> vector<32x128xf32>
    %12 = arith.addf %5, %11 : vector<32x128xf32>
    %c0_13 = arith.constant 0 : index
    %c0_14 = arith.constant 0 : index
    %c1_15 = arith.constant 1 : index
    %c0_16 = arith.constant 0 : index
    %13 = vector.load %arg3[%c0_13, %c0_14, %c1_15, %c0_16] : memref<4x5x9x128xbf16, #tpu.memory_space<vmem>>, vector<1x4x8x128xbf16>
    %14 = vector.shape_cast %13 : vector<1x4x8x128xbf16> to vector<4x8x128xbf16>
    %15 = vector.shape_cast %14 : vector<4x8x128xbf16> to vector<32x128xbf16>
    %c2 = arith.constant 2 : index
    %c0_17 = arith.constant 0 : index
    %c0_18 = arith.constant 0 : index
    %16 = vector.load %arg4[%c2, %c0_17, %c0_18] : memref<9x128x128xbf16, #tpu.memory_space<vmem>>, vector<1x128x128xbf16>
    %17 = vector.shape_cast %16 : vector<1x128x128xbf16> to vector<128x128xbf16>
    %cst_19 = arith.constant dense<0.000000e+00> : vector<32x128xf32>
    %18 = tpu.matmul %15, %17, %cst_19 {dimension_numbers = #tpu.dot_dimension_numbers<[1], [0], [0], [1], [0, 0, 1, 1], [], []>} : vector<32x128xbf16>, vector<128x128xbf16>, vector<32x128xf32> -> vector<32x128xf32>
    %19 = arith.addf %12, %18 : vector<32x128xf32>
    %c2_20 = arith.constant 2 : index
    %c0_21 = arith.constant 0 : index
    %c0_22 = arith.constant 0 : index
    %c0_23 = arith.constant 0 : index
    %20 = vector.load %arg3[%c2_20, %c0_21, %c0_22, %c0_23] : memref<4x5x9x128xbf16, #tpu.memory_space<vmem>>, vector<1x4x8x128xbf16>
    %21 = vector.shape_cast %20 : vector<1x4x8x128xbf16> to vector<4x8x128xbf16>
    %22 = vector.shape_cast %21 : vector<4x8x128xbf16> to vector<32x128xbf16>
    %c3 = arith.constant 3 : index
    %c0_24 = arith.constant 0 : index
    %c0_25 = arith.constant 0 : index
    %23 = vector.load %arg4[%c3, %c0_24, %c0_25] : memref<9x128x128xbf16, #tpu.memory_space<vmem>>, vector<1x128x128xbf16>
    %24 = vector.shape_cast %23 : vector<1x128x128xbf16> to vector<128x128xbf16>
    %cst_26 = arith.constant dense<0.000000e+00> : vector<32x128xf32>
    %25 = tpu.matmul %22, %24, %cst_26 {dimension_numbers = #tpu.dot_dimension_numbers<[1], [0], [0], [1], [0, 0, 1, 1], [], []>} : vector<32x128xbf16>, vector<128x128xbf16>, vector<32x128xf32> -> vector<32x128xf32>
    %26 = arith.addf %19, %25 : vector<32x128xf32>
    %c3_27 = arith.constant 3 : index
    %c0_28 = arith.constant 0 : index
    %c0_29 = arith.constant 0 : index
    %c0_30 = arith.constant 0 : index
    %27 = vector.load %arg3[%c3_27, %c0_28, %c0_29, %c0_30] : memref<4x5x9x128xbf16, #tpu.memory_space<vmem>>, vector<1x4x8x128xbf16>
    %28 = vector.shape_cast %27 : vector<1x4x8x128xbf16> to vector<4x8x128xbf16>
    %29 = vector.shape_cast %28 : vector<4x8x128xbf16> to vector<32x128xbf16>
    %c4 = arith.constant 4 : index
    %c0_31 = arith.constant 0 : index
    %c0_32 = arith.constant 0 : index
    %30 = vector.load %arg4[%c4, %c0_31, %c0_32] : memref<9x128x128xbf16, #tpu.memory_space<vmem>>, vector<1x128x128xbf16>
    %31 = vector.shape_cast %30 : vector<1x128x128xbf16> to vector<128x128xbf16>
    %cst_33 = arith.constant dense<0.000000e+00> : vector<32x128xf32>
    %32 = tpu.matmul %29, %31, %cst_33 {dimension_numbers = #tpu.dot_dimension_numbers<[1], [0], [0], [1], [0, 0, 1, 1], [], []>} : vector<32x128xbf16>, vector<128x128xbf16>, vector<32x128xf32> -> vector<32x128xf32>
    %33 = arith.addf %26, %32 : vector<32x128xf32>
    %c2_34 = arith.constant 2 : index
    %c0_35 = arith.constant 0 : index
    %c1_36 = arith.constant 1 : index
    %c0_37 = arith.constant 0 : index
    %34 = vector.load %arg3[%c2_34, %c0_35, %c1_36, %c0_37] : memref<4x5x9x128xbf16, #tpu.memory_space<vmem>>, vector<1x4x8x128xbf16>
    %35 = vector.shape_cast %34 : vector<1x4x8x128xbf16> to vector<4x8x128xbf16>
    %36 = vector.shape_cast %35 : vector<4x8x128xbf16> to vector<32x128xbf16>
    %c5 = arith.constant 5 : index
    %c0_38 = arith.constant 0 : index
    %c0_39 = arith.constant 0 : index
    %37 = vector.load %arg4[%c5, %c0_38, %c0_39] : memref<9x128x128xbf16, #tpu.memory_space<vmem>>, vector<1x128x128xbf16>
    %38 = vector.shape_cast %37 : vector<1x128x128xbf16> to vector<128x128xbf16>
    %cst_40 = arith.constant dense<0.000000e+00> : vector<32x128xf32>
    %39 = tpu.matmul %36, %38, %cst_40 {dimension_numbers = #tpu.dot_dimension_numbers<[1], [0], [0], [1], [0, 0, 1, 1], [], []>} : vector<32x128xbf16>, vector<128x128xbf16>, vector<32x128xf32> -> vector<32x128xf32>
    %40 = arith.addf %33, %39 : vector<32x128xf32>
    %c0_41 = arith.constant 0 : index
    %c1_42 = arith.constant 1 : index
    %c0_43 = arith.constant 0 : index
    %c0_44 = arith.constant 0 : index
    %41 = vector.load %arg3[%c0_41, %c1_42, %c0_43, %c0_44] : memref<4x5x9x128xbf16, #tpu.memory_space<vmem>>, vector<1x4x8x128xbf16>
    %42 = vector.shape_cast %41 : vector<1x4x8x128xbf16> to vector<4x8x128xbf16>
    %43 = vector.shape_cast %42 : vector<4x8x128xbf16> to vector<32x128xbf16>
    %c6 = arith.constant 6 : index
    %c0_45 = arith.constant 0 : index
    %c0_46 = arith.constant 0 : index
    %44 = vector.load %arg4[%c6, %c0_45, %c0_46] : memref<9x128x128xbf16, #tpu.memory_space<vmem>>, vector<1x128x128xbf16>
    %45 = vector.shape_cast %44 : vector<1x128x128xbf16> to vector<128x128xbf16>
    %cst_47 = arith.constant dense<0.000000e+00> : vector<32x128xf32>
    %46 = tpu.matmul %43, %45, %cst_47 {dimension_numbers = #tpu.dot_dimension_numbers<[1], [0], [0], [1], [0, 0, 1, 1], [], []>} : vector<32x128xbf16>, vector<128x128xbf16>, vector<32x128xf32> -> vector<32x128xf32>
    %47 = arith.addf %40, %46 : vector<32x128xf32>
    %c1_48 = arith.constant 1 : index
    %c1_49 = arith.constant 1 : index
    %c0_50 = arith.constant 0 : index
    %c0_51 = arith.constant 0 : index
    %48 = vector.load %arg3[%c1_48, %c1_49, %c0_50, %c0_51] : memref<4x5x9x128xbf16, #tpu.memory_space<vmem>>, vector<1x4x8x128xbf16>
    %49 = vector.shape_cast %48 : vector<1x4x8x128xbf16> to vector<4x8x128xbf16>
    %50 = vector.shape_cast %49 : vector<4x8x128xbf16> to vector<32x128xbf16>
    %c7 = arith.constant 7 : index
    %c0_52 = arith.constant 0 : index
    %c0_53 = arith.constant 0 : index
    %51 = vector.load %arg4[%c7, %c0_52, %c0_53] : memref<9x128x128xbf16, #tpu.memory_space<vmem>>, vector<1x128x128xbf16>
    %52 = vector.shape_cast %51 : vector<1x128x128xbf16> to vector<128x128xbf16>
    %cst_54 = arith.constant dense<0.000000e+00> : vector<32x128xf32>
    %53 = tpu.matmul %50, %52, %cst_54 {dimension_numbers = #tpu.dot_dimension_numbers<[1], [0], [0], [1], [0, 0, 1, 1], [], []>} : vector<32x128xbf16>, vector<128x128xbf16>, vector<32x128xf32> -> vector<32x128xf32>
    %54 = arith.addf %47, %53 : vector<32x128xf32>
    %c0_55 = arith.constant 0 : index
    %c1_56 = arith.constant 1 : index
    %c1_57 = arith.constant 1 : index
    %c0_58 = arith.constant 0 : index
    %55 = vector.load %arg3[%c0_55, %c1_56, %c1_57, %c0_58] : memref<4x5x9x128xbf16, #tpu.memory_space<vmem>>, vector<1x4x8x128xbf16>
    %56 = vector.shape_cast %55 : vector<1x4x8x128xbf16> to vector<4x8x128xbf16>
    %57 = vector.shape_cast %56 : vector<4x8x128xbf16> to vector<32x128xbf16>
    %c8 = arith.constant 8 : index
    %c0_59 = arith.constant 0 : index
    %c0_60 = arith.constant 0 : index
    %58 = vector.load %arg4[%c8, %c0_59, %c0_60] : memref<9x128x128xbf16, #tpu.memory_space<vmem>>, vector<1x128x128xbf16>
    %59 = vector.shape_cast %58 : vector<1x128x128xbf16> to vector<128x128xbf16>
    %cst_61 = arith.constant dense<0.000000e+00> : vector<32x128xf32>
    %60 = tpu.matmul %57, %59, %cst_61 {dimension_numbers = #tpu.dot_dimension_numbers<[1], [0], [0], [1], [0, 0, 1, 1], [], []>} : vector<32x128xbf16>, vector<128x128xbf16>, vector<32x128xf32> -> vector<32x128xf32>
    %61 = arith.addf %54, %60 : vector<32x128xf32>
    %c0_62 = arith.constant 0 : index
    %c0_63 = arith.constant 0 : index
    %62 = vector.load %arg5[%c0_62, %c0_63] : memref<1x128xf32, #tpu.memory_space<vmem>>, vector<1x128xf32>
    %63 = vector.broadcast %62 : vector<1x128xf32> to vector<32x128xf32>
    %64 = arith.mulf %61, %63 : vector<32x128xf32>
    %c0_64 = arith.constant 0 : index
    %c0_65 = arith.constant 0 : index
    %65 = vector.load %arg6[%c0_64, %c0_65] : memref<1x128xf32, #tpu.memory_space<vmem>>, vector<1x128xf32>
    %66 = vector.broadcast %65 : vector<1x128xf32> to vector<32x128xf32>
    %67 = arith.addf %64, %66 : vector<32x128xf32>
    %cst_66 = arith.constant 0.000000e+00 : f32
    %68 = vector.broadcast %cst_66 : f32 to vector<32x128xf32>
    %69 = arith.maximumf %67, %68 : vector<32x128xf32>
    %70 = arith.truncf %69 : vector<32x128xf32> to vector<32x128xbf16>
    %c0_67 = arith.constant 0 : index
    %c0_68 = arith.constant 0 : index
    %c0_69 = arith.constant 0 : index
    %71 = vector.load %arg7[%c0_67, %c0_68, %c0_69] : memref<1x32x128xbf16, #tpu.memory_space<vmem>>, vector<1x32x128xbf16>
    %72 = vector.shape_cast %71 : vector<1x32x128xbf16> to vector<32x128xbf16>
    %73 = vector.shape_cast %70 : vector<32x128xbf16> to vector<1x32x128xbf16>
    tpu.vector_store %arg7[%c0_67, %c0_68, %c0_69], %73 {strides = array<i32>} : memref<1x32x128xbf16, #tpu.memory_space<vmem>>, vector<1x32x128xbf16>,
    return
  }
  func.func @transform_0(%arg0: i32, %arg1: i32, %arg2: i32) -> (i32, i32, i32, i32) {
    %c0_i32 = arith.constant 0 : i32
    %c0_i32_0 = arith.constant 0 : i32
    %c0_i32_1 = arith.constant 0 : i32
    return %arg0, %c0_i32, %c0_i32_0, %arg2 : i32, i32, i32, i32
  }
  func.func @transform_1(%arg0: i32, %arg1: i32, %arg2: i32) -> (i32, i32, i32) {
    %c0_i32 = arith.constant 0 : i32
    %c0_i32_0 = arith.constant 0 : i32
    return %c0_i32, %arg2, %arg1 : i32, i32, i32
  }
  func.func @transform_2(%arg0: i32, %arg1: i32, %arg2: i32) -> (i32, i32) {
    %c0_i32 = arith.constant 0 : i32
    %c0_i32_0 = arith.constant 0 : i32
    return %c0_i32, %arg1 : i32, i32
  }
  func.func @transform_3(%arg0: i32, %arg1: i32, %arg2: i32) -> (i32, i32) {
    %c0_i32 = arith.constant 0 : i32
    %c0_i32_0 = arith.constant 0 : i32
    return %c0_i32, %arg1 : i32, i32
  }
  func.func @transform_4(%arg0: i32, %arg1: i32, %arg2: i32) -> (i32, i32, i32) {
    %c0_i32 = arith.constant 0 : i32
    %c0_i32_0 = arith.constant 0 : i32
    return %arg0, %c0_i32, %arg1 : i32, i32, i32
  }
}

module attributes {stable_mosaic.version = 11 : i64} {
  func.func @_head_kernel(%arg0: i32, %arg1: i32, %arg2: memref<2x16x128xbf16, #tpu.memory_space<vmem>>, %arg3: memref<128x128xbf16, #tpu.memory_space<vmem>>, %arg4: memref<1x128xf32, #tpu.memory_space<vmem>>, %arg5: memref<2x128xf32, #tpu.memory_space<vmem>>, %arg6: memref<8x128xf32, #tpu.memory_space<vmem>>) attributes {dimension_semantics = [#tpu.dimension_semantics<parallel>, #tpu.dimension_semantics<arbitrary>], iteration_bounds = array<i64: 1, 1>, scalar_prefetch = 0 : i64, scratch_operands = 1 : i64, tpu.core_type = #tpu.core_type<tc>, window_params = [{transform_indices = @transform_0, window_bounds = array<i64: 2, 16, 128>}, {transform_indices = @transform_1, window_bounds = array<i64: 128, 128>}, {transform_indices = @transform_2, window_bounds = array<i64: 1, 128>}, {transform_indices = @transform_3, window_bounds = array<i64: 2, 128>}]} {
    %c0 = arith.constant 0 : index
    %c0_0 = arith.constant 0 : index
    %c0_1 = arith.constant 0 : index
    %0 = vector.load %arg2[%c0, %c0_0, %c0_1] : memref<2x16x128xbf16, #tpu.memory_space<vmem>>, vector<2x16x128xbf16>
    %1 = arith.extf %0 : vector<2x16x128xbf16> to vector<2x16x128xf32>
    %cst = arith.constant dense<0.000000e+00> : vector<2x128xf32>
    %2 = vector.multi_reduction <add>, %1, %cst [1] : vector<2x16x128xf32> to vector<2x128xf32>
    %cst_2 = arith.constant 6.250000e-02 : f32
    %3 = vector.broadcast %cst_2 : f32 to vector<2x128xf32>
    %4 = arith.mulf %2, %3 : vector<2x128xf32>
    %5 = arith.truncf %4 : vector<2x128xf32> to vector<2x128xbf16>
    %c0_3 = arith.constant 0 : index
    %c0_4 = arith.constant 0 : index
    %6 = vector.load %arg3[%c0_3, %c0_4] : memref<128x128xbf16, #tpu.memory_space<vmem>>, vector<128x128xbf16>
    %cst_5 = arith.constant dense<0.000000e+00> : vector<2x128xf32>
    %7 = tpu.matmul %5, %6, %cst_5 {dimension_numbers = #tpu.dot_dimension_numbers<[1], [0], [0], [1], [0, 0, 1, 1], [], []>} : vector<2x128xbf16>, vector<128x128xbf16>, vector<2x128xf32> -> vector<2x128xf32>
    %c0_6 = arith.constant 0 : index
    %c0_7 = arith.constant 0 : index
    %8 = vector.load %arg4[%c0_6, %c0_7] : memref<1x128xf32, #tpu.memory_space<vmem>>, vector<1x128xf32>
    %9 = vector.broadcast %8 : vector<1x128xf32> to vector<2x128xf32>
    %10 = arith.addf %7, %9 : vector<2x128xf32>
    %c0_8 = arith.constant 0 : index
    %c0_9 = arith.constant 0 : index
    %11 = vector.load %arg5[%c0_8, %c0_9] : memref<2x128xf32, #tpu.memory_space<vmem>>, vector<2x128xf32>
    tpu.vector_store %arg5[%c0_8, %c0_9], %10 {strides = array<i32>} : memref<2x128xf32, #tpu.memory_space<vmem>>, vector<2x128xf32>,
    return
  }
  func.func @transform_0(%arg0: i32, %arg1: i32) -> (i32, i32, i32) {
    %c0_i32 = arith.constant 0 : i32
    %c0_i32_0 = arith.constant 0 : i32
    %c0_i32_1 = arith.constant 0 : i32
    return %c0_i32, %c0_i32_0, %arg1 : i32, i32, i32
  }
  func.func @transform_1(%arg0: i32, %arg1: i32) -> (i32, i32) {
    %c0_i32 = arith.constant 0 : i32
    return %arg1, %arg0 : i32, i32
  }
  func.func @transform_2(%arg0: i32, %arg1: i32) -> (i32, i32) {
    %c0_i32 = arith.constant 0 : i32
    %c0_i32_0 = arith.constant 0 : i32
    return %c0_i32, %arg0 : i32, i32
  }
  func.func @transform_3(%arg0: i32, %arg1: i32) -> (i32, i32) {
    %c0_i32 = arith.constant 0 : i32
    %c0_i32_0 = arith.constant 0 : i32
    return %c0_i32, %arg0 : i32, i32
  }
}

</mosaic_0001>

<bundles_post_ra>
// kernel: anynet_forward.9
= control target key start
LH: loop header
LB: loop body
LE: loop exit
PB: predicated region body
PF: predicated region fallthrough
CT: control target
= control target key end

     0   :  { %s2256_s15 = smov 0   ;;  %s2258_s16 = smov 0   ;;  %s2595_s0 = inlined_call_operand.vmem [shape: bf16[8,5,9,128], index: 0, kind: input, shape index: {}]   ;;  %s2596_s1 = inlined_call_operand.vmem [shape: bf16[9,128,128], index: 1, kind: input, shape index: {}]   ;;  %s2597_s2 = inlined_call_operand.vmem [shape: f32[1,128], index: 2, kind: input, shape index: {}]   ;;  %s2598_s3 = inlined_call_operand.vmem [shape: f32[1,128], index: 3, kind: input, shape index: {}]   ;;  %s2599_s4 = inlined_call_operand.vmem [shape: bf16[2,32,128], index: 4, kind: output, shape index: {}]  }
   0x1   :  { %s2260_s17 = smov 0  }
   0x2 LB: > { %s33_s18 = sadd.s32 1, %s2225_s16  ;;  %p1569_p0 = scmp.ge.s32.totalorder %s2229_s17, 1  ;;  %s2229_s17 = sphi %s2260_s17, %s14_s17   ;;  %s2225_s16 = sphi %s2258_s16, %s2603_s16   ;;  %s2221_s15 = sphi %s2256_s15, %s2602_s15  }
   0x3   : > { %p35_p1 = scmp.ge.s32.totalorder %s33_s18, 2  ;;  %p222_p2 = scmp.lt.s32.totalorder %s2229_s17, 3 }
   0x5   : > { %s2605_s18 = smov (%p35_p1, %s33_s18), 0  ;;  %p223_p3 = pnand %p1569_p0, %p222_p2 }
   0x6   : > { %s1570_s25 = sshll.u32 (!%p223_p3), %s2221_s15, 2  ;;  %p294_p5 = scmp.lt.s32.totalorder (!%p223_p3), %s2221_s15, 1 }
   0x7   : > { %226 = sbr.rel (%p223_p3) target bundleno = 254 (0xfe), region = 36  ;;  %p270_p4 = scmp.lt.s32.totalorder (!%p223_p3), %s1570_s25, 7 }
   0xc   : > { %v2096_v0 = vld [vmem:[%s2596_s1 + $0x78] sm:$0xff]  ;;  %v2095_v4 = vld [vmem:[%s2596_s1 + $0x70] sm:$0xff]  ;;  %s2607_s25 = smov (!%p270_p4, %s1570_s25), 7  ;;  %v2094_v8 = vld [vmem:[%s2596_s1 + $0x68] sm:$0xff]  ;;  %vm510_vm0 = vsmask.f32 3328 }
   0xd   : > { %v2086_v1 = vld [vmem:[%s2596_s1 + $0x38] sm:$0xff]  ;;  %404 = vmatpush.bf16.msra.mxu0 %v2096_v0  ;;  %v2085_v5 = vld [vmem:[%s2596_s1 + $0x30] sm:$0xff]  ;;  %s2180_s10 = smul.u32 40, %s2607_s25  ;;  %v2084_v9 = vld [vmem:[%s2596_s1 + $0x28] sm:$0xff]  ;;  %vm511_vm1 = vsmask.f32 7440 }
   0xe   : > { %v2104_v2 = vld [vmem:[%s2596_s1 + $0xb8] sm:$0xff]  ;;  %483 = vmatpush.bf16.msra.mxu1 %v2086_v1  ;;  %v2103_v6 = vld [vmem:[%s2596_s1 + $0xb0] sm:$0xff]  ;;  %v2102_v10 = vld [vmem:[%s2596_s1 + $0xa8] sm:$0xff]  ;;  %s2609_s15 = smov (!%p294_p5, %s2221_s15), 1 }
   0xf   : > { %v2114_v3 = vld [vmem:[%s2596_s1 + $0xf8] sm:$0xff]  ;;  %642 = vmatpush.bf16.msra.mxu2 %v2104_v2  ;;  %v2113_v7 = vld [vmem:[%s2596_s1 + $0xf0] sm:$0xff]  ;;  %v2112_v11 = vld [vmem:[%s2596_s1 + $0xe8] sm:$0xff]  ;;  %s2316_s25 = scalar_lea.vmem %s2595_s0, %s2180_s10  ;;  %s2076_s22 = sshll.u32 %s2609_s15, 4 }
  0x10   : > { %747 = vmatpush.bf16.msra.mxu3 %v2114_v3  ;;  %v2093_v12 = vld [vmem:[%s2596_s1 + $0x60] sm:$0xff]  ;;  %v504_v18 = vld [vmem:[%s2316_s25 + $0x8] sm:$0xf]  ;;  %v505_v19 = vld [vmem:[%s2316_s25 + $0xc] sm:$0x1]  ;;  %s301_s26 = scalar_lea.vmem %s2599_s4, %s2076_s22 }
  0x11   : > { %405 = vmatpush.bf16.msra.mxu0 %v2095_v4  ;;  %v2083_v13 = vld [vmem:[%s2596_s1 + $0x20] sm:$0xff]  ;;  %v528_v22 = vshrl.u32 %v504_v18, 16  ;;  %v2092_v23 = vld [vmem:[%s2596_s1 + $0x58] sm:$0xff]  ;;  %v531_v26 = vshll.u32 %v504_v18, 16  ;;  %v537_v32 = vshll.u32 %v505_v19, 16  ;;  %v2091_v35 = vld [vmem:[%s2596_s1 + $0x50] sm:$0xff] }
  0x12   : > { %484 = vmatpush.bf16.msra.mxu1 %v2085_v5  ;;  %v2101_v14 = vld [vmem:[%s2596_s1 + $0xa0] sm:$0xff]  ;;  %v2082_v24 = vld [vmem:[%s2596_s1 + $0x18] sm:$0xff]  ;;  %v2081_v36 = vld [vmem:[%s2596_s1 + $0x10] sm:$0xff] }
  0x13   : > { %643 = vmatpush.bf16.msra.mxu2 %v2103_v6  ;;  %v2111_v15 = vld [vmem:[%s2596_s1 + $0xe0] sm:$0xff]  ;;  %v2100_v27 = vld [vmem:[%s2596_s1 + $0x98] sm:$0xff]  ;;  %v530_v31 = vrot.slane %v528_v22, 4  ;;  %v533_v33 = vrot.slane %v531_v26, 5  ;;  %v2099_v38 = vld [vmem:[%s2596_s1 + $0x90] sm:$0xff]  ;;  %v539_v42 = vrot.slane %v537_v32, 5 }
  0x14   : > { %748 = vmatpush.bf16.msra.mxu3 %v2113_v7  ;;  %v502_v16 = vld [vmem:[%s2316_s25] sm:$0xf]  ;;  %v503_v17 = vld [vmem:[%s2316_s25 + $0x4] sm:$0x1]  ;;  %v2110_v28 = vld [vmem:[%s2596_s1 + $0xd8] sm:$0xff] }
  0x15   : > { %406 = vmatpush.bf16.msra.mxu0 %v2094_v8  ;;  %v514_v20 = vshrl.u32 %v502_v16, 16  ;;  %v517_v21 = vshll.u32 %v502_v16, 16  ;;  %v523_v25 = vshll.u32 %v503_v17, 16  ;;  %v534_v37 = vor.u32 %v533_v33, %v530_v31  ;;  %v2109_v39 = vld [vmem:[%s2596_s1 + $0xd0] sm:$0xff]  ;;  %vm2359_vm2 = vmor %vm510_vm0, %vm511_vm1  ;;  %v2090_v45 = vld [vmem:[%s2596_s1 + $0x48] sm:$0xff] }
  0x16   : > { %485 = vmatpush.bf16.msra.mxu1 %v2084_v9  ;;  %v2080_v46 = vld [vmem:[%s2596_s1 + $0x8] sm:$0xff]  ;;  %v506_v47 = vld [vmem:[%s2316_s25 + $0x10] sm:$0xf]  ;;  %v508_v48 = vld [vmem:[%s2316_s25 + $0x18] sm:$0xf] }
  0x17   : > { %644 = vmatpush.bf16.msra.mxu2 %v2102_v10  ;;  %v516_v29 = vrot.slane %v514_v20, 4  ;;  %v519_v30 = vrot.slane %v517_v21, 5  ;;  %v525_v41 = vrot.slane %v523_v25, 5  ;;  %v535_v44 = vrot.slane %v534_v37, 4  ;;  %v2098_v49 = vld [vmem:[%s2596_s1 + $0x88] sm:$0xff]  ;;  %v2089_v55 = vld [vmem:[%s2596_s1 + $0x40] sm:$0xff] }
  0x18   : > { %749 = vmatpush.bf16.msra.mxu3 %v2112_v11  ;;  %v2108_v50 = vld [vmem:[%s2596_s1 + $0xc8] sm:$0xff]  ;;  %v542_v53 = vshrl.u32 %v506_v47, 16  ;;  %v545_v54 = vshll.u32 %v506_v47, 16  ;;  %v2079_v56 = vld [vmem:[%s2596_s1] sm:$0xff]  ;;  %v2087_v58 = vld [vmem:[%s2316_s25 + $0x2c] sm:$0xf0] }
  0x19   : > { %407 = vmatpush.bf16.msra.mxu0 %v2093_v12  ;;  %v520_v34 = vor.u32 %v519_v30, %v516_v29  ;;  %v540_v52 = vsel %vm2359_vm2, %v535_v44, %v539_v42  ;;  %v1596_v57 = vld [vmem:[%s2316_s25 + $0x28] sm:$0xf]  ;;  %v556_v59 = vshrl.u32 %v508_v48, 16  ;;  %v559_v60 = vshll.u32 %v508_v48, 16  ;;  %v2097_v61 = vld [vmem:[%s2596_s1 + $0x80] sm:$0xff]  ;;  %v2142_v21 = vld [vmem:[%s2596_s1 + $0x1b8] sm:$0xff] }
  0x1a   : > { %486 = vmatpush.bf16.msra.mxu1 %v2083_v13  ;;  %v1636_v62 = vld [vmem:[%s2316_s25] sm:$0xf]  ;;  %v2077_v63 = vld [vmem:[%s2316_s25 + $0x4] sm:$0xf0]  ;;  %v544_v0 = vrot.slane %v542_v53, 4  ;;  %v547_v1 = vrot.slane %v545_v54, 5  ;;  %v587_v3 = vunpack.c.l.b16 %v540_v52  ;;  %v1597_v11 = vor.u32 %v2087_v58, %v1596_v57 }
  0x1b   : > { %645 = vmatpush.bf16.msra.mxu2 %v2101_v14  ;;  %v521_v40 = vrot.slane %v520_v34, 4  ;;  %v507_v4 = vld [vmem:[%s2316_s25 + $0x14] sm:$0x1]  ;;  %v509_v5 = vld [vmem:[%s2316_s25 + $0x1c] sm:$0x1]  ;;  %v558_v6 = vrot.slane %v556_v59, 4  ;;  %v1637_v12 = vor.u32 %v2077_v63, %v1636_v62 }
  0x1c   : > { %750 = vmatpush.bf16.msra.mxu3 %v2111_v15  ;;  %v561_v7 = vrot.slane %v559_v60, 5  ;;  %v2107_v8 = vld [vmem:[%s2596_s1 + $0xc0] sm:$0xff]  ;;  %v1744_v9 = vld [vmem:[%s2316_s25 + $0x50] sm:$0xf]  ;;  %v2105_v10 = vld [vmem:[%s2316_s25 + $0x54] sm:$0xf0]  ;;  %v548_v15 = vor.u32 %v547_v1, %v544_v0 }
  0x1d   : > { %408 = vmatpush.bf16.msra.mxu0 %v2092_v23  ;;  %v526_v51 = vsel %vm2359_vm2, %v521_v40, %v525_v41  ;;  %v2124_v13 = vld [vmem:[%s2596_s1 + $0x138] sm:$0xff]  ;;  %v551_v16 = vshll.u32 %v507_v4, 16  ;;  %v565_v18 = vshll.u32 %v509_v5, 16  ;;  %v1745_v20 = vor.u32 %v2105_v10, %v1744_v9  ;;  %v2123_v23 = vld [vmem:[%s2596_s1 + $0x130] sm:$0xff]  ;;  %v2122_v33 = vld [vmem:[%s2596_s1 + $0x128] sm:$0xff] }
  0x1e   : > { %487 = vmatpush.bf16.msra.mxu1 %v2082_v24  ;;  %v586_v2 = vunpack.c.l.b16 %v526_v51  ;;  %v2132_v14 = vld [vmem:[%s2596_s1 + $0x178] sm:$0xff]  ;;  %v562_v17 = vor.u32 %v561_v7, %v558_v6  ;;  %v2131_v24 = vld [vmem:[%s2596_s1 + $0x170] sm:$0xff]  ;;  %v549_v25 = vrot.slane %v548_v15, 4  ;;  %v2130_v34 = vld [vmem:[%s2596_s1 + $0x168] sm:$0xff] }
  0x1f   : > { %646 = vmatpush.bf16.msra.mxu2 %v2100_v27  ;;  %v2152_v22 = vld [vmem:[%s2596_s1 + $0x1f8] sm:$0xff]  ;;  %v553_v26 = vrot.slane %v551_v16, 5  ;;  %v2141_v29 = vld [vmem:[%s2596_s1 + $0x1b0] sm:$0xff]  ;;  %v2150_v42 = vld [vmem:[%s2596_s1 + $0x1e8] sm:$0xff] }
  0x20   : > { %751 = vmatpush.bf16.msra.mxu3 %v2110_v28  ;;  %v590_v19 = vpack.c.b16 %v587_v3, %v586_v2  ;;  %v563_v27 = vrot.slane %v562_v17, 4  ;;  %v567_v28 = vrot.slane %v565_v18, 5  ;;  %v2151_v30 = vld [vmem:[%s2596_s1 + $0x1f0] sm:$0xff]  ;;  %v1844_v32 = vld [vmem:[%s2316_s25 + $0x58] sm:$0xf]  ;;  %v2121_v44 = vld [vmem:[%s2596_s1 + $0x120] sm:$0xff] }
  0x21   : > { %409 = vmatpush.bf16.msra.mxu0 %v2091_v35  ;;  %v1842_v31 = vld [vmem:[%s2316_s25 + $0x50] sm:$0xf]  ;;  %v2140_v35 = vld [vmem:[%s2596_s1 + $0x1a8] sm:$0xff]  ;;  %v898_v40 = vshrl.u32 %v1844_v32, 16  ;;  %v901_v41 = vshll.u32 %v1844_v32, 16  ;;  %v2139_v59 = vld [vmem:[%s2596_s1 + $0x1a0] sm:$0xff] }
  0x22   : > { %488 = vmatpush.bf16.msra.mxu1 %v2081_v36  ;;  %v554_v36 = vsel %vm2359_vm2, %v549_v25, %v553_v26  ;;  %v568_v37 = vsel %vm2359_vm2, %v563_v27, %v567_v28  ;;  %v2088_v47 = vld [vmem:[%s2316_s25 + $0x3c] sm:$0xf0]  ;;  %v1640_v48 = vld [vmem:[%s2316_s25 + $0x10] sm:$0xf]  ;;  %v2106_v53 = vld [vmem:[%s2316_s25 + $0x64] sm:$0xf0] }
  0x23   : > { %647 = vmatpush.bf16.msra.mxu2 %v2099_v38  ;;  %v884_v38 = vshrl.u32 %v1842_v31, 16  ;;  %v589_v51 = vunpack.c.l.b16 %v568_v37  ;;  %v1748_v52 = vld [vmem:[%s2316_s25 + $0x60] sm:$0xf]  ;;  %v1843_v54 = vld [vmem:[%s2316_s25 + $0x54] sm:$0x1]  ;;  %v900_v57 = vrot.slane %v898_v40, 4 }
  0x24   : > { %752 = vmatpush.bf16.msra.mxu3 %v2109_v39  ;;  %v887_v39 = vshll.u32 %v1842_v31, 16  ;;  %v903_v58 = vrot.slane %v901_v41, 5  ;;  %v2149_v60 = vld [vmem:[%s2596_s1 + $0x1e0] sm:$0xff]  ;;  %v2120_v62 = vld [vmem:[%s2596_s1 + $0x118] sm:$0xff]  ;;  %v1749_v2 = vor.u32 %v2106_v53, %v1748_v52  ;;  %v893_v3 = vshll.u32 %v1843_v54, 16  ;;  %v2119_v10 = vld [vmem:[%s2596_s1 + $0x110] sm:$0xff] }
  0x25   : > { %410 = vmatpush.bf16.msra.mxu0 %v2090_v45  ;;  %v2129_v45 = vld [vmem:[%s2596_s1 + $0x160] sm:$0xff]  ;;  %v2128_v63 = vld [vmem:[%s2596_s1 + $0x158] sm:$0xff]  ;;  %v2137_v18 = vld [vmem:[%s2596_s1 + $0x190] sm:$0xff] }
  0x26   : > { %489 = vmatpush.bf16.msra.mxu1 %v2080_v46  ;;  %v1600_v46 = vld [vmem:[%s2316_s25 + $0x38] sm:$0xf]  ;;  %v904_v6 = vor.u32 %v903_v58, %v900_v57  ;;  %v895_v15 = vrot.slane %v893_v3, 5  ;;  %v2136_v28 = vld [vmem:[%s2596_s1 + $0x188] sm:$0xff]  ;;  %v2125_v31 = vld [vmem:[%s2596_s1 + $0x140] sm:$0xff] }
  0x27   : > { %648 = vmatpush.bf16.msra.mxu2 %v2098_v49  ;;  %v2078_v49 = vld [vmem:[%s2316_s25 + $0x14] sm:$0xf0]  ;;  %v1601_v0 = vor.u32 %v2088_v47, %v1600_v46  ;;  %v2145_v37 = vld [vmem:[%s2596_s1 + $0x1c0] sm:$0xff]  ;;  %v1920_v46 = vld [vmem:[%s2316_s25 + $0x8] sm:$0xf] }
  0x28   : > { %753 = vmatpush.bf16.msra.mxu3 %v2108_v50  ;;  %v588_v50 = vunpack.c.l.b16 %v554_v36  ;;  %v1641_v1 = vor.u32 %v2078_v49, %v1640_v48  ;;  %v2148_v9 = vld [vmem:[%s2596_s1 + $0x1d8] sm:$0xff]  ;;  %v905_v16 = vrot.slane %v904_v6, 4  ;;  %v2135_v36 = vld [vmem:[%s2596_s1 + $0x180] sm:$0xff]  ;;  %v2133_v47 = vld [vmem:[%s2316_s25 + $0xc] sm:$0xf0] }
  0x29   : > { %411 = vmatpush.bf16.msra.mxu0 %v2089_v55  ;;  %v886_v55 = vrot.slane %v884_v38, 4  ;;  %v2160_v40 = vld [vmem:[%s2596_s1 + $0x238] sm:$0xff]  ;;  %v1847_v41 = vld [vmem:[%s2316_s25 + $0x64] sm:$0x1]  ;;  %v1980_v48 = vld [vmem:[%s2316_s25 + $0x30] sm:$0xf] }
  0x2a   : > { %490 = vmatpush.bf16.msra.mxu1 %v2079_v56  ;;  %v889_v56 = vrot.slane %v887_v39, 5  ;;  %v591_v4 = vpack.c.b16 %v589_v51, %v588_v50  ;;  %v2143_v49 = vld [vmem:[%s2316_s25 + $0x34] sm:$0xf0]  ;;  %v921_v51 = vshll.u32 %v1847_v41, 16  ;;  %v2159_v58 = vld [vmem:[%s2596_s1 + $0x230] sm:$0xff] }
  0x2b   : > { %649 = vmatpush.bf16.msra.mxu2 %v2097_v61  ;;  %v1845_v61 = vld [vmem:[%s2316_s25 + $0x5c] sm:$0x1]  ;;  %v1981_v57 = vor.u32 %v2143_v49, %v1980_v48  ;;  %v2024_v3 = vld [vmem:[%s2316_s25 + $0x20] sm:$0xf]  ;;  %v2155_v49 = vld [vmem:[%s2596_s1 + $0x210] sm:$0xff] }
  0x2c   : > { %754 = vmatpush.bf16.msra.mxu3 %v2107_v8  ;;  %412 = vmatmul.bf16.vlgmr.msra.gmra.mxu0 %v1597_v11  ;;  %v890_v5 = vor.u32 %v889_v56, %v886_v55  ;;  %v907_v7 = vshll.u32 %v1845_v61, 16  ;;  %v2138_v8 = vld [vmem:[%s2596_s1 + $0x198] sm:$0xff]  ;;  %v2127_v11 = vld [vmem:[%s2596_s1 + $0x150] sm:$0xff]  ;;  %v1921_v56 = vor.u32 %v2133_v47, %v1920_v46 }
  0x2d   : > { %852 = vmatpush.bf16.msrb.mxu0 %v2124_v13  ;;  %491 = vmatmul.bf16.vlgmr.msra.gmra.mxu1 %v1637_v12  ;;  %v1846_v12 = vld [vmem:[%s2316_s25 + $0x60] sm:$0xf]  ;;  %v1848_v13 = vld [vmem:[%s2316_s25 + $0x68] sm:$0xf] }
  0x2e   : > { %1012 = vmatpush.bf16.msrb.mxu1 %v2132_v14  ;;  %650 = vmatmul.bf16.vlgmr.msra.gmra.mxu2 %v590_v19  ;;  %v891_v14 = vrot.slane %v890_v5, 4  ;;  %v909_v17 = vrot.slane %v907_v7, 5  ;;  %v2147_v19 = vld [vmem:[%s2596_s1 + $0x1d0] sm:$0xff]  ;;  %v929_v25 = vshll.u32 %v1848_v13, 16 }
  0x2f   : > { %755 = vmatmul.bf16.vlgmr.msra.gmra.mxu3 %v1745_v20  ;;  %1117 = vmatpush.bf16.msrb.mxu2 %v2142_v21  ;;  %v2118_v20 = vld [vmem:[%s2596_s1 + $0x108] sm:$0xff] }
  0x30   : > { %1222 = vmatpush.bf16.msrb.mxu3 %v2152_v22  ;;  %v2126_v21 = vld [vmem:[%s2596_s1 + $0x148] sm:$0xff]  ;;  %v912_v22 = vshrl.u32 %v1846_v12, 16  ;;  %v896_v26 = vsel %vm2359_vm2, %v891_v14, %v895_v15  ;;  %v910_v27 = vsel %vm2359_vm2, %v905_v16, %v909_v17  ;;  %v1299_v14 = vshll.u32 %v2024_v3, 16  ;;  %v2116_v16 = vld [vmem:[%s2316_s25 + $0x8c] sm:$0xf0] }
  0x31   : > { %853 = vmatpush.bf16.msrb.mxu0 %v2123_v23  ;;  %v915_v23 = vshll.u32 %v1846_v12, 16  ;;  %v956_v38 = vunpack.c.l.b16 %v896_v26  ;;  %v957_v39 = vunpack.c.l.b16 %v910_v27  ;;  %v1808_v15 = vld [vmem:[%s2316_s25 + $0x88] sm:$0xf]  ;;  %v1924_v17 = vld [vmem:[%s2316_s25 + $0x18] sm:$0xf] }
  0x32   : > { %1013 = vmatpush.bf16.msrb.mxu1 %v2131_v24  ;;  %v926_v24 = vshrl.u32 %v1848_v13, 16  ;;  %v914_v32 = vrot.slane %v912_v22, 4  ;;  %v1296_v13 = vshrl.u32 %v2024_v3, 16  ;;  %v2144_v22 = vld [vmem:[%s2316_s25 + $0x44] sm:$0xf0] }
  0x33   : > { %1118 = vmatpush.bf16.msrb.mxu2 %v2141_v29  ;;  %v2146_v29 = vld [vmem:[%s2596_s1 + $0x1c8] sm:$0xff]  ;;  %v960_v55 = vpack.c.b16 %v957_v39, %v956_v38 }
  0x34   : > { %1223 = vmatpush.bf16.msrb.mxu3 %v2151_v30  ;;  %v2117_v30 = vld [vmem:[%s2596_s1 + $0x100] sm:$0xff] }
  0x35   : > { %854 = vmatpush.bf16.msrb.mxu0 %v2122_v33  ;;  %v917_v33 = vrot.slane %v915_v23, 5  ;;  %v2019_v23 = vld [vmem:[%s2316_s25 + $0xc] sm:$0x1] }
  0x36   : > { %1014 = vmatpush.bf16.msrb.mxu1 %v2130_v34  ;;  %v928_v34 = vrot.slane %v926_v24, 4  ;;  %v1263_v41 = vshll.u32 %v2019_v23, 16 }
  0x37   : > { %1119 = vmatpush.bf16.msrb.mxu2 %v2140_v35  ;;  %v931_v35 = vrot.slane %v929_v25, 5  ;;  %v918_v50 = vor.u32 %v917_v33, %v914_v32  ;;  %v1301_v32 = vrot.slane %v1299_v14, 5  ;;  %v2156_v33 = vld [vmem:[%s2596_s1 + $0x218] sm:$0xff] }
  0x38   : > { %1224 = vmatpush.bf16.msrb.mxu3 %v2150_v42  ;;  %v1849_v42 = vld [vmem:[%s2316_s25 + $0x6c] sm:$0x1] }
  0x39   : > { %855 = vmatpush.bf16.msrb.mxu0 %v2121_v44  ;;  %v1804_v44 = vld [vmem:[%s2316_s25 + $0x78] sm:$0xf]  ;;  %v932_v52 = vor.u32 %v931_v35, %v928_v34  ;;  %v935_v53 = vshll.u32 %v1849_v42, 16  ;;  %v2023_v34 = vld [vmem:[%s2316_s25 + $0x1c] sm:$0x1] }
  0x3a   : > { %1015 = vmatpush.bf16.msrb.mxu1 %v2129_v45  ;;  %v2115_v45 = vld [vmem:[%s2316_s25 + $0x7c] sm:$0xf0]  ;;  %v2025_v35 = vld [vmem:[%s2316_s25 + $0x24] sm:$0x1]  ;;  %v1291_v46 = vshll.u32 %v2023_v34, 16 }
  0x3b   : > { %1120 = vmatpush.bf16.msrb.mxu2 %v2139_v59  ;;  %v1805_v54 = vor.u32 %v2115_v45, %v1804_v44  ;;  %v919_v59 = vrot.slane %v918_v50, 4  ;;  %v933_v61 = vrot.slane %v932_v52, 4  ;;  %v1305_v48 = vshll.u32 %v2025_v35, 16 }
  0x3c   : > { %1225 = vmatpush.bf16.msrb.mxu3 %v2149_v60  ;;  %417 = vmatmul.bf16.gmra.mxu0 %v1601_v0  ;;  %v923_v60 = vrot.slane %v921_v51, 5  ;;  %v2020_v0 = vld [vmem:[%s2316_s25 + $0x10] sm:$0xf]  ;;  %v1265_v51 = vrot.slane %v1263_v41, 5 }
  0x3d   : > { %856 = vmatpush.bf16.msrb.mxu0 %v2120_v62  ;;  %496 = vmatmul.bf16.gmra.mxu1 %v1641_v1  ;;  %v937_v62 = vrot.slane %v935_v53, 5  ;;  %v2158_v1 = vld [vmem:[%s2596_s1 + $0x228] sm:$0xff] }
  0x3e   : > { %1016 = vmatpush.bf16.msrb.mxu1 %v2128_v63  ;;  %655 = vmatmul.bf16.gmra.mxu2 %v591_v4  ;;  %v2018_v63 = vld [vmem:[%s2316_s25 + $0x8] sm:$0xf]  ;;  %v924_v4 = vsel %vm2359_vm2, %v919_v59, %v923_v60 }
  0x3f   : > { %760 = vmatmul.bf16.gmra.mxu3 %v1749_v2  ;;  %1121 = vmatpush.bf16.msrb.mxu2 %v2138_v8  ;;  %v2022_v2 = vld [vmem:[%s2316_s25 + $0x18] sm:$0xf]  ;;  %v938_v5 = vsel %vm2359_vm2, %v933_v61, %v937_v62  ;;  %v1254_v6 = vshrl.u32 %v2018_v63, 16  ;;  %v1257_v7 = vshll.u32 %v2018_v63, 16  ;;  %v1268_v8 = vshrl.u32 %v2020_v0, 16  ;;  %v2153_v63 = vld [vmem:[%s2596_s1 + $0x200] sm:$0xff] }
  0x40   : > { %1226 = vmatpush.bf16.msrb.mxu3 %v2148_v9  ;;  %v1271_v9 = vshll.u32 %v2020_v0, 16  ;;  %v1285_v12 = vshll.u32 %v2022_v2, 16 }
  0x41   : > { %857 = vmatpush.bf16.msrb.mxu0 %v2119_v10  ;;  %v2157_v10 = vld [vmem:[%s2596_s1 + $0x220] sm:$0xff]  ;;  %v1256_v24 = vrot.slane %v1254_v6, 4  ;;  %v1259_v25 = vrot.slane %v1257_v7, 5  ;;  %v1270_v26 = vrot.slane %v1268_v8, 4 }
  0x42   : > { %1017 = vmatpush.bf16.msrb.mxu1 %v2127_v11  ;;  %v1282_v11 = vshrl.u32 %v2022_v2, 16  ;;  %v1273_v27 = vrot.slane %v1271_v9, 5 }
  0x43   : > { %1122 = vmatpush.bf16.msrb.mxu2 %v2137_v18  ;;  %v958_v18 = vunpack.c.l.b16 %v924_v4 }
  0x44   : > { %1227 = vmatpush.bf16.msrb.mxu3 %v2147_v19  ;;  %v959_v19 = vunpack.c.l.b16 %v938_v5  ;;  %v1274_v42 = vor.u32 %v1273_v27, %v1270_v26 }
  0x45   : > { %858 = vmatpush.bf16.msrb.mxu0 %v2118_v20  ;;  %v2134_v20 = vld [vmem:[%s2316_s25 + $0x1c] sm:$0xf0] }
  0x46   : > { %1018 = vmatpush.bf16.msrb.mxu1 %v2126_v21  ;;  %v1984_v21 = vld [vmem:[%s2316_s25 + $0x40] sm:$0xf]  ;;  %v1925_v38 = vor.u32 %v2134_v20, %v1924_v17  ;;  %v1275_v52 = vrot.slane %v1274_v42, 4 }
  0x47   : > { %1123 = vmatpush.bf16.msrb.mxu2 %v2136_v28  ;;  %v2021_v28 = vld [vmem:[%s2316_s25 + $0x14] sm:$0x1]  ;;  %v1985_v39 = vor.u32 %v2144_v22, %v1984_v21 }
  0x48   : > { %1228 = vmatpush.bf16.msrb.mxu3 %v2146_v29  ;;  %v1284_v29 = vrot.slane %v1282_v11, 4  ;;  %v1277_v44 = vshll.u32 %v2021_v28, 16 }
  0x49   : > { %859 = vmatpush.bf16.msrb.mxu0 %v2117_v30  ;;  %v1287_v30 = vrot.slane %v1285_v12, 5 }
  0x4a   : > { %1019 = vmatpush.bf16.msrb.mxu1 %v2125_v31  ;;  %v1298_v31 = vrot.slane %v1296_v13, 4  ;;  %v1279_v53 = vrot.slane %v1277_v44, 5 }
  0x4b   : > { %1124 = vmatpush.bf16.msrb.mxu2 %v2135_v36  ;;  %v1809_v36 = vor.u32 %v2116_v16, %v1808_v15  ;;  %v1288_v45 = vor.u32 %v1287_v30, %v1284_v29 }
  0x4c   : > { %1229 = vmatpush.bf16.msrb.mxu3 %v2145_v37  ;;  %860 = vmatmul.bf16.vlgmr.msrb.gmra.mxu0 %v1805_v54  ;;  %v961_v37 = vpack.c.b16 %v959_v19, %v958_v18  ;;  %v1302_v47 = vor.u32 %v1301_v32, %v1298_v31  ;;  %v1280_v60 = vsel %vm2359_vm2, %v1275_v52, %v1279_v53 }
  0x4d   : > { %1382 = vmatpush.bf16.msra.mxu0 %v2160_v40  ;;  %1020 = vmatmul.bf16.vlgmr.msrb.gmra.mxu1 %v960_v55  ;;  %v1289_v54 = vrot.slane %v1288_v45, 4  ;;  %v1293_v55 = vrot.slane %v1291_v46, 5 }
  0x4e   : > { %2172 = vmatpush.bf16.msra.mxu1 %v2160_v40  ;;  %1125 = vmatmul.bf16.vlgmr.msrb.gmra.mxu2 %v1921_v56  ;;  %v1260_v40 = vor.u32 %v1259_v25, %v1256_v24  ;;  %v1303_v56 = vrot.slane %v1302_v47, 4 }
  0x4f   : > { %1230 = vmatmul.bf16.vlgmr.msrb.gmra.mxu3 %v1981_v57  ;;  %v1307_v57 = vrot.slane %v1305_v48, 5  ;;  %v1294_v61 = vsel %vm2359_vm2, %v1289_v54, %v1293_v55 }
  0x50   : > { %v1261_v50 = vrot.slane %v1260_v40, 4  ;;  %v1328_v2 = vunpack.c.l.b16 %v1294_v61 }
  0x51   : > { %1383 = vmatpush.bf16.msra.mxu0 %v2159_v58  ;;  %v1308_v62 = vsel %vm2359_vm2, %v1303_v56, %v1307_v57 }
  0x52   : > { %2173 = vmatpush.bf16.msra.mxu1 %v2159_v58  ;;  %v2154_v58 = vld [vmem:[%s2596_s1 + $0x208] sm:$0xff]  ;;  %v1266_v59 = vsel %vm2359_vm2, %v1261_v50, %v1265_v51  ;;  %v1329_v3 = vunpack.c.l.b16 %v1308_v62 }
  0x53   : > { %v1326_v0 = vunpack.c.l.b16 %v1266_v59 }
  0x54   : > { %v1331_v5 = vpack.c.b16 %v1329_v3, %v1328_v2  ;;  %v2205_v2 = vld [vmem:[%s2597_s2] ss:$0 sm:$0xff] }
  0x55   : > { %1384 = vmatpush.bf16.msra.mxu0 %v2158_v1 }
  0x56   : > { %2174 = vmatpush.bf16.msra.mxu1 %v2158_v1  ;;  %v1327_v1 = vunpack.c.l.b16 %v1280_v60 }
  0x58   : > { %v1330_v4 = vpack.c.b16 %v1327_v1, %v1326_v0 }
  0x59   : > { %1385 = vmatpush.bf16.msra.mxu0 %v2157_v10 }
  0x5a   : > { %2175 = vmatpush.bf16.msra.mxu1 %v2157_v10 }
  0x5c   : > { %865 = vmatmul.bf16.gmra.mxu0 %v1809_v36 }
  0x5d   : > { %1386 = vmatpush.bf16.msra.mxu0 %v2156_v33  ;;  %1025 = vmatmul.bf16.gmra.mxu1 %v961_v37 }
  0x5e   : > { %2176 = vmatpush.bf16.msra.mxu1 %v2156_v33  ;;  %1130 = vmatmul.bf16.gmra.mxu2 %v1925_v38 }
  0x5f   : > { %1235 = vmatmul.bf16.gmra.mxu3 %v1985_v39 }
  0x61   : > { %1387 = vmatpush.bf16.msra.mxu0 %v2155_v49 }
  0x62   : > { %2177 = vmatpush.bf16.msra.mxu1 %v2155_v49 }
  0x65   : > { %1388 = vmatpush.bf16.msra.mxu0 %v2154_v58 }
  0x66   : > { %2178 = vmatpush.bf16.msra.mxu1 %v2154_v58 }
  0x69   : > { %1389 = vmatpush.bf16.msra.mxu0 %v2153_v63 }
  0x6a   : > { %2179 = vmatpush.bf16.msra.mxu1 %v2153_v63 }
  0x6c   : > { %1390 = vmatmul.bf16.vlgmr.msra.gmra.mxu0 %v1330_v4 }
  0x6d   : > { %1395 = vmatmul.bf16.vlgmr.msra.gmra.mxu1 %v1331_v5 }
  0xa9   : > { %v413_v6 = vpop.f32.mrf.mxu0 }
  0xaa   : > { %v492_v7 = vpop.f32.mrf.mxu1 }
  0xab   : > { %v493_v27 = vadd.f32 %v492_v7, %v413_v6 }
  0xb1   : > { %v651_v43 = vpop.f32.mrf.mxu2  ;;  %v415_v9 = vpop.f32.mrf.mxu0 }
  0xb2   : > { %v756_v8 = vpop.f32.mrf.mxu3  ;;  %v494_v10 = vpop.f32.mrf.mxu1  ;;  %v661_v32 = vadd.f32 %v651_v43, %v493_v27  ;;  %v2206_v43 = vld [vmem:[%s2598_s3] ss:$0 sm:$0xff] }
  0xb3   : > { %v495_v36 = vadd.f32 %v494_v10, %v415_v9 }
  0xb4   : > { %v766_v35 = vadd.f32 %v756_v8, %v661_v32 }
  0xb9   : > { %v653_v11 = vpop.f32.mrf.mxu2  ;;  %v418_v13 = vpop.f32.mrf.mxu0 }
  0xba   : > { %v758_v12 = vpop.f32.mrf.mxu3  ;;  %v497_v14 = vpop.f32.mrf.mxu1  ;;  %v662_v39 = vadd.f32 %v653_v11, %v495_v36 }
  0xbb   : > { %v498_v28 = vadd.f32 %v497_v14, %v418_v13 }
  0xbc   : > { %v767_v47 = vadd.f32 %v758_v12, %v662_v39 }
  0xc1   : > { %v656_v15 = vpop.f32.mrf.mxu2  ;;  %v420_v17 = vpop.f32.mrf.mxu0 }
  0xc2   : > { %v761_v16 = vpop.f32.mrf.mxu3  ;;  %v499_v18 = vpop.f32.mrf.mxu1  ;;  %v663_v33 = vadd.f32 %v656_v15, %v498_v28 }
  0xc3   : > { %v500_v38 = vadd.f32 %v499_v18, %v420_v17 }
  0xc4   : > { %v768_v37 = vadd.f32 %v761_v16, %v663_v33 }
  0xc9   : > { %v658_v19 = vpop.f32.mrf.mxu2  ;;  %v861_v21 = vpop.f32.mrf.mxu0 }
  0xca   : > { %v763_v20 = vpop.f32.mrf.mxu3  ;;  %v1021_v22 = vpop.f32.mrf.mxu1  ;;  %v664_v40 = vadd.f32 %v658_v19, %v500_v38  ;;  %v871_v41 = vadd.f32 %v861_v21, %v766_v35 }
  0xcc   : > { %v769_v48 = vadd.f32 %v763_v20, %v664_v40  ;;  %v1031_v49 = vadd.f32 %v1021_v22, %v871_v41 }
  0xd1   : > { %v1126_v23 = vpop.f32.mrf.mxu2  ;;  %v863_v25 = vpop.f32.mrf.mxu0 }
  0xd2   : > { %v1231_v24 = vpop.f32.mrf.mxu3  ;;  %v1023_v26 = vpop.f32.mrf.mxu1  ;;  %v1136_v52 = vadd.f32 %v1126_v23, %v1031_v49  ;;  %v872_v53 = vadd.f32 %v863_v25, %v767_v47 }
  0xd4   : > { %v1241_v59 = vadd.f32 %v1231_v24, %v1136_v52  ;;  %v1032_v60 = vadd.f32 %v1023_v26, %v872_v53 }
  0xd9   : > { %v1128_v29 = vpop.f32.mrf.mxu2  ;;  %v866_v30 = vpop.f32.mrf.mxu0 }
  0xda   : > { %v1026_v31 = vpop.f32.mrf.mxu1  ;;  %v1233_v34 = vpop.f32.mrf.mxu3  ;;  %v873_v42 = vadd.f32 %v866_v30, %v768_v37  ;;  %v1137_v63 = vadd.f32 %v1128_v29, %v1032_v60 }
  0xdc   : > { %v1033_v50 = vadd.f32 %v1026_v31, %v873_v42  ;;  %v1242_v5 = vadd.f32 %v1233_v34, %v1137_v63 }
  0xe1   : > { %v1131_v44 = vpop.f32.mrf.mxu2  ;;  %v868_v45 = vpop.f32.mrf.mxu0 }
  0xe2   : > { %v1028_v46 = vpop.f32.mrf.mxu1  ;;  %v1236_v51 = vpop.f32.mrf.mxu3  ;;  %v1138_v54 = vadd.f32 %v1131_v44, %v1033_v50  ;;  %v874_v55 = vadd.f32 %v868_v45, %v769_v48 }
  0xe4   : > { %v1243_v61 = vadd.f32 %v1236_v51, %v1138_v54  ;;  %v1034_v62 = vadd.f32 %v1028_v46, %v874_v55 }
  0xe9   : > { %v1133_v56 = vpop.f32.mrf.mxu2  ;;  %v1391_v57 = vpop.f32.mrf.mxu0 }
  0xea   : > { %v1396_v58 = vpop.f32.mrf.mxu1  ;;  %v1139_v0 = vadd.f32 %v1133_v56, %v1034_v62  ;;  %v1401_v1 = vadd.f32 %v1391_v57, %v1241_v59  ;;  %v1238_v4 = vpop.f32.mrf.mxu3 }
  0xeb   : > { %v1403_v3 = vadd.f32 %v1396_v58, %v1243_v61 }
  0xec   : > { %v1244_v6 = vadd.f32 %v1238_v4, %v1139_v0  ;;  %v1409_v7 = vmul.f32 %v2205_v2, %v1401_v1 }
  0xed   : > { %v1411_v8 = vmul.f32 %v2205_v2, %v1403_v3 }
  0xee   : > { %v1417_v13 = vadd.f32 %v2206_v43, %v1409_v7 }
  0xef   : > { %v1419_v14 = vadd.f32 %v2206_v43, %v1411_v8 }
  0xf0   : > { %v1421_v19 = vmax.f32 %v1417_v13, 0.0 }
  0xf1   : > { %v1393_v9 = vpop.f32.mrf.mxu0  ;;  %v1423_v20 = vmax.f32 %v1419_v14, 0.0 }
  0xf2   : > { %v1398_v10 = vpop.f32.mrf.mxu1  ;;  %v1402_v11 = vadd.f32 %v1393_v9, %v1242_v5 }
  0xf3   : > { %v1404_v12 = vadd.f32 %v1398_v10, %v1244_v6 }
  0xf4   : > { %v1410_v15 = vmul.f32 %v2205_v2, %v1402_v11 }
  0xf5   : > { %v1412_v16 = vmul.f32 %v2205_v2, %v1404_v12 }
  0xf6   : > { %v1418_v17 = vadd.f32 %v2206_v43, %v1410_v15 }
  0xf7   : > { %v1420_v18 = vadd.f32 %v2206_v43, %v1412_v16 }
  0xf8   : > { %v1422_v21 = vmax.f32 %v1418_v17, 0.0 }
  0xf9   : > { %v1424_v22 = vmax.f32 %v1420_v18, 0.0 }
  0xfa   : > { %v2164_v23 = vpack.c.bf16 %v1422_v21, %v1421_v19 }
  0xfb   : > { %v2169_v24 = vpack.c.bf16 %v1424_v22, %v1423_v20 }
  0xfc   : > { %2165 = vst [vmem:[%s301_s26] sm:$0xff] %v2164_v23  }
  0xfd   : > { %2171 = vst [vmem:[%s301_s26 + $0x8] sm:$0xff] %v2169_v24  }
  0xfe PF: > { %s14_s17 = sadd.s32 1, %s2229_s17   ;;  %s2602_s15 = smov %s2225_s16 }
  0xff   : > { %p11_p6 = scmp.ge.s32.totalorder %s14_s17, 4   ;;  %s2603_s16 = smov %s2605_s18 }
 0x101   :  { %13 = sbr.rel (!%p11_p6) target bundleno = 2 (0x2), region = 88 }

// kernel: anynet_forward.6
= control target key start
LH: loop header
LB: loop body
LE: loop exit
PB: predicated region body
PF: predicated region fallthrough
CT: control target
= control target key end

     0   :  { %s2822_s15 = smov 0   ;;  %s2824_s16 = smov 0   ;;  %s3291_s0 = inlined_call_operand.vmem [shape: bf16[8,9,9,128], index: 0, kind: input, shape index: {}]   ;;  %s3292_s1 = inlined_call_operand.vmem [shape: bf16[9,128,128], index: 1, kind: input, shape index: {}]   ;;  %s3293_s2 = inlined_call_operand.vmem [shape: f32[1,128], index: 2, kind: input, shape index: {}]   ;;  %s3294_s3 = inlined_call_operand.vmem [shape: f32[1,128], index: 3, kind: input, shape index: {}]   ;;  %s3295_s4 = inlined_call_operand.vmem [shape: bf16[2,64,128], index: 4, kind: output, shape index: {}]  }
   0x1   :  { %s2826_s17 = smov 0  }
   0x2 LB: > { %s33_s18 = sadd.s32 1, %s2791_s16  ;;  %p2019_p0 = scmp.ge.s32.totalorder %s2795_s17, 1  ;;  %s2795_s17 = sphi %s2826_s17, %s14_s17   ;;  %s2791_s16 = sphi %s2824_s16, %s3299_s16   ;;  %s2787_s15 = sphi %s2822_s15, %s3298_s15  }
   0x3   : > { %p35_p1 = scmp.ge.s32.totalorder %s33_s18, 2  ;;  %p222_p2 = scmp.lt.s32.totalorder %s2795_s17, 3 }
   0x5   : > { %s3301_s18 = smov (%p35_p1, %s33_s18), 0  ;;  %p223_p3 = pnand %p2019_p0, %p222_p2 }
   0x6   : > { %s2020_s21 = sshll.u32 (!%p223_p3), %s2787_s15, 2  ;;  %p294_p5 = scmp.lt.s32.totalorder (!%p223_p3), %s2787_s15, 1 }
   0x7   : > { %226 = sbr.rel (%p223_p3) target bundleno = 339 (0x153), region = 36  ;;  %p270_p4 = scmp.lt.s32.totalorder (!%p223_p3), %s2020_s21, 7 }
   0xc   : > { %v2634_v0 = vld [vmem:[%s3292_s1 + $0x78] sm:$0xff]  ;;  %v2633_v2 = vld [vmem:[%s3292_s1 + $0x70] sm:$0xff]  ;;  %s3303_s21 = smov (!%p270_p4, %s2020_s21), 7  ;;  %v2632_v6 = vld [vmem:[%s3292_s1 + $0x68] sm:$0xff]  ;;  %vm570_vm0 = vsmask.f32 3328 }
   0xd   : > { %v2642_v1 = vld [vmem:[%s3292_s1 + $0xb8] sm:$0xff]  ;;  %2730 = vmatpush.bf16.msra.mxu1 %v2634_v0  ;;  %424 = vmatpush.bf16.msra.mxu0 %v2634_v0  ;;  %v2641_v3 = vld [vmem:[%s3292_s1 + $0xb0] sm:$0xff]  ;;  %s2746_s6 = smul.u32 72, %s3303_s21  ;;  %v2640_v7 = vld [vmem:[%s3292_s1 + $0xa8] sm:$0xff]  ;;  %vm571_vm1 = vsmask.f32 7440 }
   0xe   : > { %766 = vmatpush.bf16.msra.mxu2 %v2642_v1  ;;  %v2654_v4 = vld [vmem:[%s3292_s1 + $0xf8] sm:$0xff]  ;;  %v2653_v5 = vld [vmem:[%s3292_s1 + $0xf0] sm:$0xff]  ;;  %v2652_v8 = vld [vmem:[%s3292_s1 + $0xe8] sm:$0xff]  ;;  %s3305_s15 = smov (!%p294_p5, %s2787_s15), 1 }
   0xf   : > { %901 = vmatpush.bf16.msra.mxu3 %v2654_v4  ;;  %s2870_s13 = scalar_lea.vmem %s3291_s0, %s2746_s6  ;;  %v2631_v10 = vld [vmem:[%s3292_s1 + $0x60] sm:$0xff]  ;;  %v2630_v23 = vld [vmem:[%s3292_s1 + $0x58] sm:$0xff]  ;;  %v2629_v31 = vld [vmem:[%s3292_s1 + $0x50] sm:$0xff]  ;;  %s2610_s23 = sshll.u32 %s3305_s15, 5 }
  0x10   : > { %v554_v9 = vld [vmem:[%s2870_s13] sm:$0xf]  ;;  %v556_v11 = vld [vmem:[%s2870_s13 + $0x8] sm:$0xf]  ;;  %v555_v16 = vld [vmem:[%s2870_s13 + $0x4] sm:$0x1]  ;;  %s3255_s26 = scalar_lea.vmem %s3295_s4, %s2610_s23 }
  0x11   : > { %2731 = vmatpush.bf16.msra.mxu1 %v2633_v2  ;;  %425 = vmatpush.bf16.msra.mxu0 %v2633_v2  ;;  %v2639_v12 = vld [vmem:[%s3292_s1 + $0xa0] sm:$0xff]  ;;  %v574_v13 = vshrl.u32 %v554_v9, 16  ;;  %v577_v14 = vshll.u32 %v554_v9, 16  ;;  %v588_v15 = vshrl.u32 %v556_v11, 16  ;;  %v557_v17 = vld [vmem:[%s2870_s13 + $0xc] sm:$0x1]  ;;  %vm2904_vm2 = vmor %vm570_vm0, %vm571_vm1 }
  0x12   : > { %767 = vmatpush.bf16.msra.mxu2 %v2641_v3  ;;  %v591_v18 = vshll.u32 %v556_v11, 16  ;;  %v2651_v19 = vld [vmem:[%s3292_s1 + $0xe0] sm:$0xff]  ;;  %v2638_v25 = vld [vmem:[%s3292_s1 + $0x98] sm:$0xff]  ;;  %v583_v27 = vshll.u32 %v555_v16, 16  ;;  %v597_v28 = vshll.u32 %v557_v17, 16  ;;  %v2637_v32 = vld [vmem:[%s3292_s1 + $0x90] sm:$0xff] }
  0x13   : > { %902 = vmatpush.bf16.msra.mxu3 %v2653_v5  ;;  %v576_v20 = vrot.slane %v574_v13, 4  ;;  %v579_v21 = vrot.slane %v577_v14, 5  ;;  %v590_v22 = vrot.slane %v588_v15, 4  ;;  %v2650_v30 = vld [vmem:[%s3292_s1 + $0xd8] sm:$0xff]  ;;  %v558_v37 = vld [vmem:[%s2870_s13 + $0x10] sm:$0xf] }
  0x14   : > { %v593_v24 = vrot.slane %v591_v18, 5  ;;  %v585_v34 = vrot.slane %v583_v27, 5  ;;  %v599_v36 = vrot.slane %v597_v28, 5  ;;  %v560_v39 = vld [vmem:[%s2870_s13 + $0x18] sm:$0xf]  ;;  %v2649_v40 = vld [vmem:[%s3292_s1 + $0xd0] sm:$0xff] }
  0x15   : > { %2732 = vmatpush.bf16.msra.mxu1 %v2632_v6  ;;  %426 = vmatpush.bf16.msra.mxu0 %v2632_v6  ;;  %v580_v26 = vor.u32 %v579_v21, %v576_v20  ;;  %v2628_v41 = vld [vmem:[%s3292_s1 + $0x48] sm:$0xff]  ;;  %v602_v42 = vshrl.u32 %v558_v37, 16  ;;  %v605_v43 = vshll.u32 %v558_v37, 16  ;;  %v616_v47 = vshrl.u32 %v560_v39, 16  ;;  %v2627_v49 = vld [vmem:[%s3292_s1 + $0x40] sm:$0xff]  ;;  %v2622_v51 = vld [vmem:[%s3292_s1 + $0x38] sm:$0xff] }
  0x16   : > { %768 = vmatpush.bf16.msra.mxu2 %v2640_v7  ;;  %v594_v29 = vor.u32 %v593_v24, %v590_v22  ;;  %v2636_v44 = vld [vmem:[%s3292_s1 + $0x88] sm:$0xff]  ;;  %v619_v48 = vshll.u32 %v560_v39, 16  ;;  %v2635_v52 = vld [vmem:[%s3292_s1 + $0x80] sm:$0xff]  ;;  %v2625_v54 = vld [vmem:[%s2870_s13 + $0x6c] sm:$0xf0] }
  0x17   : > { %903 = vmatpush.bf16.msra.mxu3 %v2652_v8  ;;  %v581_v33 = vrot.slane %v580_v26, 4  ;;  %v2058_v50 = vld [vmem:[%s2870_s13 + $0x68] sm:$0xf]  ;;  %v2623_v56 = vld [vmem:[%s2870_s13 + $0x4c] sm:$0xf0]  ;;  %v604_v60 = vrot.slane %v602_v42, 4 }
  0x18   : > { %v595_v35 = vrot.slane %v594_v29, 4  ;;  %v2648_v53 = vld [vmem:[%s3292_s1 + $0xc8] sm:$0xff]  ;;  %v559_v59 = vld [vmem:[%s2870_s13 + $0x14] sm:$0x1]  ;;  %v607_v61 = vrot.slane %v605_v43, 5  ;;  %v618_v62 = vrot.slane %v616_v47, 4  ;;  %v2059_v3 = vor.u32 %v2625_v54, %v2058_v50 }
  0x19   : > { %2733 = vmatpush.bf16.msra.mxu1 %v2631_v10  ;;  %427 = vmatpush.bf16.msra.mxu0 %v2631_v10  ;;  %v586_v45 = vsel %vm2904_vm2, %v581_v33, %v585_v34  ;;  %v2050_v55 = vld [vmem:[%s2870_s13 + $0x48] sm:$0xf]  ;;  %v621_v63 = vrot.slane %v619_v48, 5  ;;  %v2666_v0 = vld [vmem:[%s3292_s1 + $0x138] sm:$0xff]  ;;  %v2647_v6 = vld [vmem:[%s3292_s1 + $0xc0] sm:$0xff]  ;;  %v611_v9 = vshll.u32 %v559_v59, 16 }
  0x1a   : > { %769 = vmatpush.bf16.msra.mxu2 %v2639_v12  ;;  %v600_v46 = vsel %vm2904_vm2, %v595_v35, %v599_v36  ;;  %v702_v57 = vunpack.c.l.b16 %v586_v45  ;;  %v2686_v1 = vld [vmem:[%s3292_s1 + $0x1b8] sm:$0xff]  ;;  %v2051_v4 = vor.u32 %v2623_v56, %v2050_v55  ;;  %v2218_v7 = vld [vmem:[%s2870_s13 + $0x90] sm:$0xf]  ;;  %v608_v11 = vor.u32 %v607_v61, %v604_v60  ;;  %v2620_v18 = vld [vmem:[%s3292_s1 + $0x28] sm:$0xff] }
  0x1b   : > { %904 = vmatpush.bf16.msra.mxu3 %v2651_v19  ;;  %v703_v58 = vunpack.c.l.b16 %v600_v46  ;;  %v561_v2 = vld [vmem:[%s2870_s13 + $0x1c] sm:$0x1]  ;;  %v2643_v8 = vld [vmem:[%s2870_s13 + $0x94] sm:$0xf0]  ;;  %v2621_v10 = vld [vmem:[%s3292_s1 + $0x30] sm:$0xff]  ;;  %v622_v12 = vor.u32 %v621_v63, %v618_v62  ;;  %v613_v19 = vrot.slane %v611_v9, 5 }
  0x1c   : > { %v625_v13 = vshll.u32 %v561_v2, 16  ;;  %v2698_v14 = vld [vmem:[%s3292_s1 + $0x1f8] sm:$0xff]  ;;  %v2665_v15 = vld [vmem:[%s3292_s1 + $0x130] sm:$0xff]  ;;  %v2219_v17 = vor.u32 %v2643_v8, %v2218_v7  ;;  %v609_v20 = vrot.slane %v608_v11, 4  ;;  %v562_v24 = vld [vmem:[%s2870_s13 + $0x20] sm:$0xf] }
  0x1d   : > { %2734 = vmatpush.bf16.msra.mxu1 %v2630_v23  ;;  %428 = vmatpush.bf16.msra.mxu0 %v2630_v23  ;;  %v710_v5 = vpack.c.b16 %v703_v58, %v702_v57  ;;  %v2685_v16 = vld [vmem:[%s3292_s1 + $0x1b0] sm:$0xff]  ;;  %v623_v21 = vrot.slane %v622_v12, 4  ;;  %v2684_v26 = vld [vmem:[%s3292_s1 + $0x1a8] sm:$0xff]  ;;  %v630_v28 = vshrl.u32 %v562_v24, 16  ;;  %v633_v29 = vshll.u32 %v562_v24, 16  ;;  %v2663_v36 = vld [vmem:[%s3292_s1 + $0x120] sm:$0xff] }
  0x1e   : > { %770 = vmatpush.bf16.msra.mxu2 %v2638_v25  ;;  %v627_v22 = vrot.slane %v625_v13, 5  ;;  %v2697_v23 = vld [vmem:[%s3292_s1 + $0x1f0] sm:$0xff]  ;;  %v2664_v25 = vld [vmem:[%s3292_s1 + $0x128] sm:$0xff]  ;;  %v2683_v37 = vld [vmem:[%s3292_s1 + $0x1a0] sm:$0xff] }
  0x1f   : > { %905 = vmatpush.bf16.msra.mxu3 %v2650_v30  ;;  %v564_v27 = vld [vmem:[%s2870_s13 + $0x28] sm:$0xf]  ;;  %v2619_v30 = vld [vmem:[%s3292_s1 + $0x20] sm:$0xff]  ;;  %v2062_v39 = vld [vmem:[%s2870_s13 + $0x78] sm:$0xf]  ;;  %v632_v45 = vrot.slane %v630_v28, 4 }
  0x20   : > { %v644_v33 = vshrl.u32 %v564_v27, 16  ;;  %v647_v34 = vshll.u32 %v564_v27, 16  ;;  %v2696_v35 = vld [vmem:[%s3292_s1 + $0x1e8] sm:$0xff]  ;;  %v2624_v42 = vld [vmem:[%s2870_s13 + $0x5c] sm:$0xf0]  ;;  %v635_v46 = vrot.slane %v633_v29, 5 }
  0x21   : > { %2735 = vmatpush.bf16.msra.mxu1 %v2629_v31  ;;  %429 = vmatpush.bf16.msra.mxu0 %v2629_v31  ;;  %v614_v31 = vsel %vm2904_vm2, %v609_v20, %v613_v19  ;;  %v2618_v47 = vld [vmem:[%s3292_s1 + $0x18] sm:$0xff]  ;;  %v2222_v56 = vld [vmem:[%s2870_s13 + $0xa0] sm:$0xf]  ;;  %v2644_v57 = vld [vmem:[%s2870_s13 + $0xa4] sm:$0xf0] }
  0x22   : > { %771 = vmatpush.bf16.msra.mxu2 %v2637_v32  ;;  %v628_v32 = vsel %vm2904_vm2, %v623_v21, %v627_v22  ;;  %v704_v43 = vunpack.c.l.b16 %v614_v31  ;;  %v646_v48 = vrot.slane %v644_v33, 4  ;;  %v2662_v50 = vld [vmem:[%s3292_s1 + $0x118] sm:$0xff]  ;;  %v636_v58 = vor.u32 %v635_v46, %v632_v45  ;;  %v2617_v59 = vld [vmem:[%s3292_s1 + $0x10] sm:$0xff]  ;;  %v2616_v2 = vld [vmem:[%s3292_s1 + $0x8] sm:$0xff] }
  0x23   : > { %906 = vmatpush.bf16.msra.mxu3 %v2649_v40  ;;  %v2626_v40 = vld [vmem:[%s2870_s13 + $0x7c] sm:$0xf0]  ;;  %v2661_v63 = vld [vmem:[%s3292_s1 + $0x110] sm:$0xff]  ;;  %v2660_v9 = vld [vmem:[%s3292_s1 + $0x108] sm:$0xff] }
  0x24   : > { %v2695_v7 = vld [vmem:[%s3292_s1 + $0x1e0] sm:$0xff]  ;;  %v566_v8 = vld [vmem:[%s2870_s13 + $0x30] sm:$0xf]  ;;  %v2674_v20 = vld [vmem:[%s3292_s1 + $0x178] sm:$0xff] }
  0x25   : > { %2736 = vmatpush.bf16.msra.mxu1 %v2628_v41  ;;  %430 = vmatpush.bf16.msra.mxu0 %v2628_v41  ;;  %v2054_v41 = vld [vmem:[%s2870_s13 + $0x58] sm:$0xf]  ;;  %v2681_v11 = vld [vmem:[%s3292_s1 + $0x190] sm:$0xff]  ;;  %v658_v12 = vshrl.u32 %v566_v8, 16  ;;  %v661_v13 = vshll.u32 %v566_v8, 16  ;;  %v2659_v21 = vld [vmem:[%s3292_s1 + $0x100] sm:$0xff] }
  0x26   : > { %772 = vmatpush.bf16.msra.mxu2 %v2636_v44  ;;  %v705_v44 = vunpack.c.l.b16 %v628_v32  ;;  %v2055_v54 = vor.u32 %v2624_v42, %v2054_v41  ;;  %v2098_v22 = vld [vmem:[%s2870_s13] sm:$0xf]  ;;  %v2706_v24 = vld [vmem:[%s3292_s1 + $0x238] sm:$0xff]  ;;  %v2673_v33 = vld [vmem:[%s3292_s1 + $0x170] sm:$0xff] }
  0x27   : > { %907 = vmatpush.bf16.msra.mxu3 %v2648_v53  ;;  %v2063_v53 = vor.u32 %v2626_v40, %v2062_v39  ;;  %v660_v29 = vrot.slane %v658_v12, 4  ;;  %v2226_v40 = vld [vmem:[%s2870_s13 + $0xb0] sm:$0xf]  ;;  %v2645_v41 = vld [vmem:[%s2870_s13 + $0xb4] sm:$0xf0]  ;;  %v2668_v12 = vld [vmem:[%s3292_s1 + $0x148] sm:$0xff] }
  0x28   : > { %v711_v55 = vpack.c.b16 %v705_v44, %v704_v43  ;;  %v2705_v43 = vld [vmem:[%s3292_s1 + $0x230] sm:$0xff] }
  0x29   : > { %2737 = vmatpush.bf16.msra.mxu1 %v2627_v49  ;;  %431 = vmatpush.bf16.msra.mxu0 %v2627_v49  ;;  %v649_v49 = vrot.slane %v647_v34, 5  ;;  %v567_v34 = vld [vmem:[%s2870_s13 + $0x34] sm:$0x1] }
  0x2a   : > { %773 = vmatpush.bf16.msra.mxu2 %v2635_v52  ;;  %v565_v52 = vld [vmem:[%s2870_s13 + $0x2c] sm:$0x1]  ;;  %v667_v44 = vshll.u32 %v567_v34, 16  ;;  %v2546_v34 = vld [vmem:[%s2870_s13 + $0x10] sm:$0xf] }
  0x2b   : > { %908 = vmatpush.bf16.msra.mxu3 %v2647_v6  ;;  %v650_v61 = vor.u32 %v649_v49, %v646_v48  ;;  %v653_v62 = vshll.u32 %v565_v52, 16  ;;  %v2680_v48 = vld [vmem:[%s3292_s1 + $0x188] sm:$0xff]  ;;  %v2227_v49 = vor.u32 %v2645_v41, %v2226_v40 }
  0x2c   : > { %442 = vmatmul.bf16.vlgmr.msra.gmra.mxu1 %v2059_v3  ;;  %432 = vmatmul.bf16.vlgmr.msra.gmra.mxu0 %v2051_v4  ;;  %v637_v3 = vrot.slane %v636_v58, 4  ;;  %v2692_v58 = vld [vmem:[%s3292_s1 + $0x1c8] sm:$0xff] }
  0x2d   : > { %525 = vmatpush.bf16.msrb.mxu1 %v2622_v51  ;;  %1036 = vmatpush.bf16.msrb.mxu0 %v2666_v0  ;;  %v563_v51 = vld [vmem:[%s2870_s13 + $0x24] sm:$0x1]  ;;  %v2223_v0 = vor.u32 %v2644_v57, %v2222_v56  ;;  %v655_v6 = vrot.slane %v653_v62, 5  ;;  %v2704_v56 = vld [vmem:[%s3292_s1 + $0x228] sm:$0xff]  ;;  %v2670_v62 = vld [vmem:[%s3292_s1 + $0x158] sm:$0xff] }
  0x2e   : > { %1417 = vmatpush.bf16.msrb.mxu2 %v2686_v1  ;;  %909 = vmatmul.bf16.vlgmr.msra.gmra.mxu3 %v2219_v17  ;;  %v639_v60 = vshll.u32 %v563_v51, 16  ;;  %v2682_v1 = vld [vmem:[%s3292_s1 + $0x198] sm:$0xff]  ;;  %v669_v51 = vrot.slane %v667_v44, 5  ;;  %v2671_v57 = vld [vmem:[%s3292_s1 + $0x160] sm:$0xff]  ;;  %v2110_v44 = vld [vmem:[%s2870_s13 + $0x30] sm:$0xf] }
  0x2f   : > { %774 = vmatmul.bf16.vlgmr.msra.gmra.mxu2 %v710_v5  ;;  %1552 = vmatpush.bf16.msrb.mxu3 %v2698_v14  ;;  %v651_v5 = vrot.slane %v650_v61, 4  ;;  %v2694_v14 = vld [vmem:[%s3292_s1 + $0x1d8] sm:$0xff] }
  0x30   : > { %v641_v4 = vrot.slane %v639_v60, 5 }
  0x31   : > { %526 = vmatpush.bf16.msrb.mxu1 %v2621_v10  ;;  %1037 = vmatpush.bf16.msrb.mxu0 %v2665_v15  ;;  %v568_v10 = vld [vmem:[%s2870_s13 + $0x38] sm:$0xf]  ;;  %v2615_v15 = vld [vmem:[%s3292_s1] sm:$0xff]  ;;  %v656_v17 = vsel %vm2904_vm2, %v651_v5, %v655_v6  ;;  %v2669_v5 = vld [vmem:[%s3292_s1 + $0x150] sm:$0xff] }
  0x32   : > { %1418 = vmatpush.bf16.msrb.mxu2 %v2685_v16  ;;  %v642_v16 = vsel %vm2904_vm2, %v637_v3, %v641_v4  ;;  %v675_v19 = vshll.u32 %v568_v10, 16  ;;  %v707_v28 = vunpack.c.l.b16 %v656_v17  ;;  %v2106_v17 = vld [vmem:[%s2870_s13 + $0x20] sm:$0xf] }
  0x33   : > { %1553 = vmatpush.bf16.msrb.mxu3 %v2697_v23  ;;  %v2611_v23 = vld [vmem:[%s2870_s13 + $0x4] sm:$0xf0]  ;;  %v706_v27 = vunpack.c.l.b16 %v642_v16  ;;  %v2701_v16 = vld [vmem:[%s3292_s1 + $0x210] sm:$0xff] }
  0x34   : > { %v677_v32 = vrot.slane %v675_v19, 5  ;;  %v2613_v19 = vld [vmem:[%s2870_s13 + $0x24] sm:$0xf0] }
  0x35   : > { %527 = vmatpush.bf16.msrb.mxu1 %v2620_v18  ;;  %1038 = vmatpush.bf16.msrb.mxu0 %v2664_v25  ;;  %v672_v18 = vshrl.u32 %v568_v10, 16  ;;  %v2290_v25 = vld [vmem:[%s2870_s13 + $0xd8] sm:$0xf]  ;;  %v712_v39 = vpack.c.b16 %v707_v28, %v706_v27  ;;  %v2646_v10 = vld [vmem:[%s2870_s13 + $0xc4] sm:$0xf0] }
  0x36   : > { %1419 = vmatpush.bf16.msrb.mxu2 %v2684_v26  ;;  %v2655_v26 = vld [vmem:[%s2870_s13 + $0xdc] sm:$0xf0]  ;;  %v2498_v27 = vld [vmem:[%s2870_s13 + $0x50] sm:$0xf]  ;;  %v2687_v28 = vld [vmem:[%s2870_s13 + $0x54] sm:$0xf0] }
  0x37   : > { %1554 = vmatpush.bf16.msrb.mxu3 %v2696_v35  ;;  %v674_v31 = vrot.slane %v672_v18, 4  ;;  %v569_v35 = vld [vmem:[%s2870_s13 + $0x3c] sm:$0x1]  ;;  %v2700_v18 = vld [vmem:[%s3292_s1 + $0x208] sm:$0xff] }
  0x38   : > { %v681_v46 = vshll.u32 %v569_v35, 16 }
  0x39   : > { %528 = vmatpush.bf16.msrb.mxu1 %v2619_v30  ;;  %1039 = vmatpush.bf16.msrb.mxu0 %v2663_v36  ;;  %v663_v30 = vrot.slane %v661_v13, 5  ;;  %v2099_v36 = vor.u32 %v2611_v23, %v2098_v22  ;;  %v678_v45 = vor.u32 %v677_v32, %v674_v31  ;;  %v2691_v13 = vld [vmem:[%s3292_s1 + $0x1c0] sm:$0xff]  ;;  %v2426_v22 = vld [vmem:[%s2870_s13 + $0x8] sm:$0xf]  ;;  %v2675_v23 = vld [vmem:[%s2870_s13 + $0xc] sm:$0xf0] }
  0x3a   : > { %1420 = vmatpush.bf16.msrb.mxu2 %v2683_v37  ;;  %v2291_v37 = vor.u32 %v2655_v26, %v2290_v25  ;;  %v2427_v26 = vor.u32 %v2675_v23, %v2426_v22  ;;  %v2336_v31 = vld [vmem:[%s2870_s13 + $0x90] sm:$0xf]  ;;  %v2338_v32 = vld [vmem:[%s2870_s13 + $0x98] sm:$0xf] }
  0x3b   : > { %1555 = vmatpush.bf16.msrb.mxu3 %v2695_v7  ;;  %v664_v42 = vor.u32 %v663_v30, %v660_v29  ;;  %v679_v52 = vrot.slane %v678_v45, 4  ;;  %v2499_v29 = vor.u32 %v2687_v28, %v2498_v27  ;;  %v2699_v30 = vld [vmem:[%s3292_s1 + $0x200] sm:$0xff]  ;;  %v1090_v35 = vshrl.u32 %v2336_v31, 16  ;;  %v2614_v45 = vld [vmem:[%s2870_s13 + $0x34] sm:$0xf0] }
  0x3c   : > { %447 = vmatmul.bf16.gmra.mxu1 %v2063_v53  ;;  %437 = vmatmul.bf16.gmra.mxu0 %v2055_v54  ;;  %v683_v53 = vrot.slane %v681_v46, 5  ;;  %v2679_v54 = vld [vmem:[%s3292_s1 + $0x180] sm:$0xff]  ;;  %v2302_v46 = vld [vmem:[%s2870_s13 + $0x108] sm:$0xf] }
  0x3d   : > { %529 = vmatpush.bf16.msrb.mxu1 %v2618_v47  ;;  %1040 = vmatpush.bf16.msrb.mxu0 %v2662_v50  ;;  %v2672_v47 = vld [vmem:[%s3292_s1 + $0x168] sm:$0xff]  ;;  %v665_v50 = vrot.slane %v664_v42, 4  ;;  %v1620_v42 = vshrl.u32 %v2546_v34, 16 }
  0x3e   : > { %1421 = vmatpush.bf16.msrb.mxu2 %v2682_v1  ;;  %914 = vmatmul.bf16.gmra.mxu3 %v2223_v0  ;;  %v684_v61 = vsel %vm2904_vm2, %v679_v52, %v683_v53  ;;  %v2612_v0 = vld [vmem:[%s2870_s13 + $0x14] sm:$0xf0]  ;;  %v2294_v1 = vld [vmem:[%s2870_s13 + $0xe8] sm:$0xf] }
  0x3f   : > { %779 = vmatmul.bf16.gmra.mxu2 %v711_v55  ;;  %1556 = vmatpush.bf16.msrb.mxu3 %v2694_v14  ;;  %v2693_v55 = vld [vmem:[%s3292_s1 + $0x1d0] sm:$0xff]  ;;  %v670_v60 = vsel %vm2904_vm2, %v665_v50, %v669_v51  ;;  %v709_v4 = vunpack.c.l.b16 %v684_v61  ;;  %v2702_v14 = vld [vmem:[%s3292_s1 + $0x218] sm:$0xff]  ;;  %v1092_v51 = vrot.slane %v1090_v35, 4 }
  0x40   : > { %v708_v3 = vunpack.c.l.b16 %v670_v60  ;;  %v2339_v50 = vld [vmem:[%s2870_s13 + $0x9c] sm:$0x1]  ;;  %v2545_v60 = vld [vmem:[%s2870_s13 + $0xc] sm:$0x1]  ;;  %v2547_v61 = vld [vmem:[%s2870_s13 + $0x14] sm:$0x1] }
  0x41   : > { %530 = vmatpush.bf16.msrb.mxu1 %v2617_v59  ;;  %1041 = vmatpush.bf16.msrb.mxu0 %v2661_v63  ;;  %v2703_v59 = vld [vmem:[%s3292_s1 + $0x220] sm:$0xff]  ;;  %v2102_v63 = vld [vmem:[%s2870_s13 + $0x10] sm:$0xf] }
  0x42   : > { %1422 = vmatpush.bf16.msrb.mxu2 %v2681_v11  ;;  %v2103_v6 = vor.u32 %v2612_v0, %v2102_v63  ;;  %v713_v8 = vpack.c.b16 %v709_v4, %v708_v3  ;;  %v1113_v0 = vshll.u32 %v2339_v50, 16 }
  0x43   : > { %1557 = vmatpush.bf16.msrb.mxu3 %v2693_v55  ;;  %v2676_v55 = vld [vmem:[%s2870_s13 + $0x1c] sm:$0xf0] }
  0x45   : > { %531 = vmatpush.bf16.msrb.mxu1 %v2616_v2  ;;  %1042 = vmatpush.bf16.msrb.mxu0 %v2660_v9  ;;  %v2656_v2 = vld [vmem:[%s2870_s13 + $0xec] sm:$0xf0]  ;;  %v2230_v9 = vld [vmem:[%s2870_s13 + $0xc0] sm:$0xf] }
  0x46   : > { %1423 = vmatpush.bf16.msrb.mxu2 %v2680_v48  ;;  %v2295_v7 = vor.u32 %v2656_v2, %v2294_v1  ;;  %v2231_v11 = vor.u32 %v2646_v10, %v2230_v9  ;;  %v2430_v48 = vld [vmem:[%s2870_s13 + $0x18] sm:$0xf]  ;;  %v1629_v10 = vshll.u32 %v2547_v61, 16 }
  0x47   : > { %1558 = vmatpush.bf16.msrb.mxu3 %v2692_v58  ;;  %v1622_v58 = vrot.slane %v1620_v42, 4  ;;  %v2431_v2 = vor.u32 %v2676_v55, %v2430_v48  ;;  %v2343_v42 = vld [vmem:[%s2870_s13 + $0xac] sm:$0x1] }
  0x48   : > { %v1631_v23 = vrot.slane %v1629_v10, 5 }
  0x49   : > { %532 = vmatpush.bf16.msrb.mxu1 %v2615_v15  ;;  %1043 = vmatpush.bf16.msrb.mxu0 %v2659_v21  ;;  %v2667_v15 = vld [vmem:[%s3292_s1 + $0x140] sm:$0xff] }
  0x4a   : > { %1424 = vmatpush.bf16.msrb.mxu2 %v2679_v54  ;;  %v2657_v21 = vld [vmem:[%s2870_s13 + $0xfc] sm:$0xf0] }
  0x4b   : > { %1559 = vmatpush.bf16.msrb.mxu3 %v2691_v13  ;;  %v2340_v13 = vld [vmem:[%s2870_s13 + $0xa0] sm:$0xf] }
  0x4c   : > { %533 = vmatmul.bf16.vlgmr.msrb.gmra.mxu1 %v2099_v36  ;;  %1044 = vmatmul.bf16.vlgmr.msrb.gmra.mxu0 %v2291_v37  ;;  %v1093_v36 = vshll.u32 %v2336_v31, 16  ;;  %v1104_v37 = vshrl.u32 %v2338_v32, 16 }
  0x4d   : > { %1282 = vmatpush.bf16.msra.mxu1 %v2674_v20  ;;  %1798 = vmatpush.bf16.msra.mxu0 %v2706_v24  ;;  %v2298_v20 = vld [vmem:[%s2870_s13 + $0xf8] sm:$0xf] }
  0x4e   : > { %919 = vmatmul.bf16.gmra.mxu3 %v2227_v49  ;;  %2738 = vmatpush.bf16.msra.mxu2 %v2706_v24  ;;  %v2107_v24 = vor.u32 %v2613_v19, %v2106_v17  ;;  %v2299_v25 = vor.u32 %v2657_v21, %v2298_v20  ;;  %v2337_v49 = vld [vmem:[%s2870_s13 + $0x94] sm:$0x1]  ;;  %v1095_v52 = vrot.slane %v1093_v36, 5  ;;  %v1106_v53 = vrot.slane %v1104_v37, 4  ;;  %v2550_v19 = vld [vmem:[%s2870_s13 + $0x20] sm:$0xf] }
  0x4f   : > { %784 = vmatmul.bf16.gmra.mxu2 %v712_v39  ;;  %v1107_v39 = vshll.u32 %v2338_v32, 16  ;;  %v1099_v63 = vshll.u32 %v2337_v49, 16  ;;  %v1651_v31 = vshll.u32 %v2550_v19, 16  ;;  %v2341_v36 = vld [vmem:[%s2870_s13 + $0xa4] sm:$0x1] }
  0x50   : > { %v1096_v3 = vor.u32 %v1095_v52, %v1092_v51  ;;  %v2549_v51 = vld [vmem:[%s2870_s13 + $0x1c] sm:$0x1]  ;;  %v2551_v52 = vld [vmem:[%s2870_s13 + $0x24] sm:$0x1] }
  0x51   : > { %1283 = vmatpush.bf16.msra.mxu1 %v2673_v33  ;;  %1799 = vmatpush.bf16.msra.mxu0 %v2705_v43  ;;  %v2544_v33 = vld [vmem:[%s2870_s13 + $0x8] sm:$0xf]  ;;  %v1109_v54 = vrot.slane %v1107_v39, 5 }
  0x52   : > { %2739 = vmatpush.bf16.msra.mxu2 %v2705_v43  ;;  %v1606_v40 = vshrl.u32 %v2544_v33, 16  ;;  %v1609_v41 = vshll.u32 %v2544_v33, 16  ;;  %v1623_v43 = vshll.u32 %v2546_v34, 16 }
  0x53   : > { %v1110_v4 = vor.u32 %v1109_v54, %v1106_v53  ;;  %v2434_v53 = vld [vmem:[%s2870_s13 + $0x28] sm:$0xf]  ;;  %v2677_v54 = vld [vmem:[%s2870_s13 + $0x2c] sm:$0xf0] }
  0x55   : > { %1284 = vmatpush.bf16.msra.mxu1 %v2672_v47  ;;  %1800 = vmatpush.bf16.msra.mxu0 %v2704_v56  ;;  %v2658_v47 = vld [vmem:[%s2870_s13 + $0x10c] sm:$0xf0] }
  0x56   : > { %2740 = vmatpush.bf16.msra.mxu2 %v2704_v56  ;;  %v1608_v56 = vrot.slane %v1606_v40, 4  ;;  %v2303_v1 = vor.u32 %v2658_v47, %v2302_v46  ;;  %v1653_v46 = vrot.slane %v1651_v31, 5 }
  0x59   : > { %1285 = vmatpush.bf16.msra.mxu1 %v2671_v57  ;;  %1801 = vmatpush.bf16.msra.mxu0 %v2703_v59  ;;  %v1611_v57 = vrot.slane %v1609_v41, 5 }
  0x5a   : > { %2741 = vmatpush.bf16.msra.mxu2 %v2703_v59  ;;  %v1625_v59 = vrot.slane %v1623_v43, 5 }
  0x5c   : > { %538 = vmatmul.bf16.gmra.mxu1 %v2103_v6  ;;  %1049 = vmatmul.bf16.gmra.mxu0 %v2295_v7  ;;  %v2688_v6 = vld [vmem:[%s2870_s13 + $0x64] sm:$0xf0]  ;;  %v1612_v7 = vor.u32 %v1611_v57, %v1608_v56  ;;  %v1626_v9 = vor.u32 %v1625_v59, %v1622_v58  ;;  %v1127_v56 = vshll.u32 %v2341_v36, 16  ;;  %v1141_v58 = vshll.u32 %v2343_v42, 16  ;;  %v2345_v42 = vld [vmem:[%s2870_s13 + $0xb4] sm:$0x1] }
  0x5d   : > { %1286 = vmatpush.bf16.msra.mxu1 %v2670_v62  ;;  %1802 = vmatpush.bf16.msra.mxu0 %v2702_v14  ;;  %v2111_v62 = vor.u32 %v2614_v45, %v2110_v44 }
  0x5e   : > { %924 = vmatmul.bf16.gmra.mxu3 %v2231_v11  ;;  %2742 = vmatpush.bf16.msra.mxu2 %v2702_v14  ;;  %v1101_v11 = vrot.slane %v1099_v63, 5  ;;  %v2342_v14 = vld [vmem:[%s2870_s13 + $0xa8] sm:$0xf]  ;;  %v1613_v20 = vrot.slane %v1612_v7, 4  ;;  %v1627_v22 = vrot.slane %v1626_v9, 4  ;;  %v1143_v7 = vrot.slane %v1141_v58, 5 }
  0x5f   : > { %789 = vmatmul.bf16.gmra.mxu2 %v713_v8  ;;  %v1615_v8 = vshll.u32 %v2545_v60, 16  ;;  %v1135_v27 = vshll.u32 %v2342_v14, 16  ;;  %v1643_v60 = vshll.u32 %v2549_v51, 16  ;;  %v2438_v51 = vld [vmem:[%s2870_s13 + $0x38] sm:$0xf] }
  0x60   : > { %v1632_v35 = vsel %vm2904_vm2, %v1627_v22, %v1631_v23  ;;  %v2557_v58 = vld [vmem:[%s2870_s13 + $0x3c] sm:$0x1] }
  0x61   : > { %1287 = vmatpush.bf16.msra.mxu1 %v2669_v5  ;;  %1803 = vmatpush.bf16.msra.mxu0 %v2701_v16  ;;  %v2502_v5 = vld [vmem:[%s2870_s13 + $0x60] sm:$0xf]  ;;  %v1617_v21 = vrot.slane %v1615_v8, 5  ;;  %v1137_v41 = vrot.slane %v1135_v27, 5  ;;  %v1735_v50 = vunpack.c.l.b16 %v1632_v35  ;;  %v1645_v9 = vrot.slane %v1643_v60, 5 }
  0x62   : > { %2743 = vmatpush.bf16.msra.mxu2 %v2701_v16  ;;  %v1111_v16 = vrot.slane %v1110_v4, 4  ;;  %v2503_v17 = vor.u32 %v2688_v6, %v2502_v5  ;;  %v1129_v5 = vrot.slane %v1127_v56, 5  ;;  %v2678_v56 = vld [vmem:[%s2870_s13 + $0x3c] sm:$0xf0] }
  0x63   : > { %v1618_v34 = vsel %vm2904_vm2, %v1613_v20, %v1617_v21  ;;  %v2556_v21 = vld [vmem:[%s2870_s13 + $0x38] sm:$0xf] }
  0x64   : > { %v1734_v49 = vunpack.c.l.b16 %v1618_v34  ;;  %v1693_v34 = vshll.u32 %v2556_v21, 16 }
  0x65   : > { %1288 = vmatpush.bf16.msra.mxu1 %v2668_v12  ;;  %1804 = vmatpush.bf16.msra.mxu0 %v2700_v18  ;;  %v1115_v12 = vrot.slane %v1113_v0, 5 }
  0x66   : > { %2744 = vmatpush.bf16.msra.mxu2 %v2700_v18  ;;  %v2548_v18 = vld [vmem:[%s2870_s13 + $0x18] sm:$0xf]  ;;  %v1742_v0 = vpack.c.b16 %v1735_v50, %v1734_v49 }
  0x67   : > { %v1634_v28 = vshrl.u32 %v2548_v18, 16  ;;  %v1116_v33 = vsel %vm2904_vm2, %v1111_v16, %v1115_v12  ;;  %v2344_v12 = vld [vmem:[%s2870_s13 + $0xb0] sm:$0xf] }
  0x68   : > { %v1219_v48 = vunpack.c.l.b16 %v1116_v33  ;;  %v2554_v16 = vld [vmem:[%s2870_s13 + $0x30] sm:$0xf]  ;;  %v1149_v20 = vshll.u32 %v2344_v12, 16  ;;  %v1690_v33 = vshrl.u32 %v2556_v21, 16 }
  0x69   : > { %1289 = vmatpush.bf16.msra.mxu1 %v2667_v15  ;;  %1805 = vmatpush.bf16.msra.mxu0 %v2699_v30  ;;  %v1097_v15 = vrot.slane %v1096_v3, 4  ;;  %v1636_v43 = vrot.slane %v1634_v28, 4  ;;  %v2689_v3 = vld [vmem:[%s2870_s13 + $0x74] sm:$0xf0] }
  0x6a   : > { %2745 = vmatpush.bf16.msra.mxu2 %v2699_v30  ;;  %v1648_v30 = vshrl.u32 %v2550_v19, 16  ;;  %v1146_v19 = vshrl.u32 %v2344_v12, 16  ;;  %v1151_v36 = vrot.slane %v1149_v20, 5 }
  0x6b   : > { %v1102_v32 = vsel %vm2904_vm2, %v1097_v15, %v1101_v11  ;;  %v2552_v15 = vld [vmem:[%s2870_s13 + $0x28] sm:$0xf] }
  0x6c   : > { %543 = vmatmul.bf16.gmra.mxu1 %v2107_v24  ;;  %1054 = vmatmul.bf16.gmra.mxu0 %v2299_v25  ;;  %v1118_v24 = vshrl.u32 %v2340_v13, 16  ;;  %v1121_v25 = vshll.u32 %v2340_v13, 16  ;;  %v1650_v45 = vrot.slane %v1648_v30, 4  ;;  %v1218_v47 = vunpack.c.l.b16 %v1102_v32 }
  0x6d   : > { %v1662_v27 = vshrl.u32 %v2552_v15, 16  ;;  %v1665_v28 = vshll.u32 %v2552_v15, 16  ;;  %v1679_v30 = vshll.u32 %v2554_v16, 16  ;;  %v1148_v35 = vrot.slane %v1146_v19, 4 }
  0x6e   : > { %1560 = vmatmul.bf16.vlgmr.msrb.gmra.mxu3 %v2499_v29  ;;  %v1637_v29 = vshll.u32 %v2548_v18, 16  ;;  %v1120_v37 = vrot.slane %v1118_v24, 4  ;;  %v1123_v39 = vrot.slane %v1121_v25, 5  ;;  %v1654_v61 = vor.u32 %v1653_v46, %v1650_v45  ;;  %v2553_v46 = vld [vmem:[%s2870_s13 + $0x2c] sm:$0x1] }
  0x6f   : > { %1425 = vmatmul.bf16.vlgmr.msrb.gmra.mxu2 %v2427_v26  ;;  %v1132_v26 = vshrl.u32 %v2342_v14, 16  ;;  %v1226_v63 = vpack.c.b16 %v1219_v48, %v1218_v47  ;;  %v2346_v14 = vld [vmem:[%s2870_s13 + $0xb8] sm:$0xf]  ;;  %v1664_v47 = vrot.slane %v1662_v27, 4  ;;  %v1667_v48 = vrot.slane %v1665_v28, 5 }
  0x70   : > { %v1639_v44 = vrot.slane %v1637_v29, 5  ;;  %v1124_v55 = vor.u32 %v1123_v39, %v1120_v37  ;;  %v1655_v10 = vrot.slane %v1654_v61, 4  ;;  %v1160_v24 = vshrl.u32 %v2346_v14, 16  ;;  %v2350_v27 = vld [vmem:[%s2870_s13 + $0xc8] sm:$0xf] }
  0x71   : > { %v1134_v40 = vrot.slane %v1132_v26, 4  ;;  %v1163_v25 = vshll.u32 %v2346_v14, 16  ;;  %v2558_v26 = vld [vmem:[%s2870_s13 + $0x40] sm:$0xf]  ;;  %v1676_v29 = vshrl.u32 %v2554_v16, 16  ;;  %v1681_v50 = vrot.slane %v1679_v30, 5 }
  0x72   : > { %v1640_v59 = vor.u32 %v1639_v44, %v1636_v43  ;;  %v1125_v4 = vrot.slane %v1124_v55, 4  ;;  %v1704_v37 = vshrl.u32 %v2558_v26, 16  ;;  %v1707_v39 = vshll.u32 %v2558_v26, 16  ;;  %v2347_v43 = vld [vmem:[%s2870_s13 + $0xbc] sm:$0x1] }
  0x73   : > { %v1138_v57 = vor.u32 %v1137_v41, %v1134_v40  ;;  %v1162_v44 = vrot.slane %v1160_v24, 4  ;;  %v1165_v45 = vrot.slane %v1163_v25, 5  ;;  %v1678_v49 = vrot.slane %v1676_v29, 4  ;;  %v2348_v24 = vld [vmem:[%s2870_s13 + $0xc0] sm:$0xf] }
  0x74   : > { %v1641_v8 = vrot.slane %v1640_v59, 4  ;;  %v1706_v59 = vrot.slane %v1704_v37, 4  ;;  %v1709_v60 = vrot.slane %v1707_v39, 5  ;;  %v1155_v61 = vshll.u32 %v2345_v42, 16 }
  0x75   : > { %v1139_v6 = vrot.slane %v1138_v57, 4  ;;  %v1152_v57 = vor.u32 %v1151_v36, %v1148_v35  ;;  %v1188_v35 = vshrl.u32 %v2350_v27, 16  ;;  %v1191_v36 = vshll.u32 %v2350_v27, 16 }
  0x76   : > { %v1646_v22 = vsel %vm2904_vm2, %v1641_v8, %v1645_v9  ;;  %v2690_v8 = vld [vmem:[%s2870_s13 + $0x84] sm:$0xf0]  ;;  %v1710_v12 = vor.u32 %v1709_v60, %v1706_v59  ;;  %v1157_v14 = vrot.slane %v1155_v61, 5 }
  0x77   : > { %v1144_v18 = vsel %vm2904_vm2, %v1139_v6, %v1143_v7  ;;  %v1736_v40 = vunpack.c.l.b16 %v1646_v22  ;;  %v2439_v6 = vor.u32 %v2678_v56, %v2438_v51  ;;  %v2510_v7 = vld [vmem:[%s2870_s13 + $0x80] sm:$0xf] }
  0x78   : > { %v1221_v32 = vunpack.c.l.b16 %v1144_v18  ;;  %v2511_v18 = vor.u32 %v2690_v8, %v2510_v7  ;;  %v1711_v25 = vrot.slane %v1710_v12, 4 }
  0x7c   : > { %548 = vmatmul.bf16.gmra.mxu1 %v2111_v62  ;;  %1059 = vmatmul.bf16.gmra.mxu0 %v2303_v1  ;;  %v1657_v62 = vshll.u32 %v2551_v52, 16  ;;  %v2435_v1 = vor.u32 %v2677_v54, %v2434_v53  ;;  %v2555_v52 = vld [vmem:[%s2870_s13 + $0x34] sm:$0x1]  ;;  %v1692_v53 = vrot.slane %v1690_v33, 4  ;;  %v1695_v54 = vrot.slane %v1693_v34, 5 }
  0x7d   : > { %v1177_v34 = vshll.u32 %v2348_v24, 16 }
  0x7e   : > { %1565 = vmatmul.bf16.gmra.mxu3 %v2503_v17  ;;  %v1659_v11 = vrot.slane %v1657_v62, 5  ;;  %v1130_v17 = vsel %vm2904_vm2, %v1125_v4, %v1129_v5  ;;  %v1166_v62 = vor.u32 %v1165_v45, %v1162_v44  ;;  %v1682_v4 = vor.u32 %v1681_v50, %v1678_v49  ;;  %v2351_v50 = vld [vmem:[%s2870_s13 + $0xcc] sm:$0x1] }
  0x7f   : > { %1430 = vmatmul.bf16.gmra.mxu2 %v2431_v2  ;;  %v2506_v2 = vld [vmem:[%s2870_s13 + $0x70] sm:$0xf]  ;;  %v1220_v31 = vunpack.c.l.b16 %v1130_v17  ;;  %v1685_v5 = vshll.u32 %v2555_v52, 16  ;;  %v1696_v9 = vor.u32 %v1695_v54, %v1692_v53  ;;  %v1193_v49 = vrot.slane %v1191_v36, 5 }
  0x80   : > { %v2507_v13 = vor.u32 %v2689_v3, %v2506_v2  ;;  %v1660_v23 = vsel %vm2904_vm2, %v1655_v10, %v1659_v11  ;;  %v1668_v3 = vor.u32 %v1667_v48, %v1664_v47  ;;  %v1699_v10 = vshll.u32 %v2557_v58, 16 }
  0x81   : > { %v1737_v41 = vunpack.c.l.b16 %v1660_v23  ;;  %v1227_v55 = vpack.c.b16 %v1221_v32, %v1220_v31  ;;  %v1153_v11 = vrot.slane %v1152_v57, 4  ;;  %v1167_v15 = vrot.slane %v1166_v62, 4 }
  0x82   : > { %v1669_v19 = vrot.slane %v1668_v3, 4  ;;  %v1683_v20 = vrot.slane %v1682_v4, 4  ;;  %v1687_v21 = vrot.slane %v1685_v5, 5  ;;  %v1697_v22 = vrot.slane %v1696_v9, 4 }
  0x83   : > { %v1743_v2 = vpack.c.b16 %v1737_v41, %v1736_v40  ;;  %v1701_v23 = vrot.slane %v1699_v10, 5  ;;  %v1158_v28 = vsel %vm2904_vm2, %v1153_v11, %v1157_v14  ;;  %v1174_v32 = vshrl.u32 %v2348_v24, 16 }
  0x84   : > { %v1688_v31 = vsel %vm2904_vm2, %v1683_v20, %v1687_v21  ;;  %v1222_v39 = vunpack.c.l.b16 %v1158_v28  ;;  %v1179_v47 = vrot.slane %v1177_v34, 5  ;;  %v1190_v48 = vrot.slane %v1188_v35, 4 }
  0x85   : > { %v1702_v33 = vsel %vm2904_vm2, %v1697_v22, %v1701_v23  ;;  %v1739_v42 = vunpack.c.l.b16 %v1688_v31  ;;  %v1176_v44 = vrot.slane %v1174_v32, 4  ;;  %v1197_v59 = vshll.u32 %v2351_v50, 16 }
  0x86   : > { %v1194_v58 = vor.u32 %v1193_v49, %v1190_v48 }
  0x87   : > { %v1180_v57 = vor.u32 %v1179_v47, %v1176_v44 }
  0x88   : > { %v1195_v62 = vrot.slane %v1194_v58, 4 }
  0x89   : > { %v1181_v60 = vrot.slane %v1180_v57, 4 }
  0x8c   : > { %1290 = vmatmul.bf16.vlgmr.msra.gmra.mxu1 %v1226_v63  ;;  %1806 = vmatmul.bf16.vlgmr.msra.gmra.mxu0 %v1742_v0  ;;  %v1169_v63 = vshll.u32 %v2347_v43, 16  ;;  %v1671_v0 = vshll.u32 %v2553_v46, 16  ;;  %v1740_v43 = vunpack.c.l.b16 %v1702_v33  ;;  %v2349_v46 = vld [vmem:[%s2870_s13 + $0xc4] sm:$0x1] }
  0x8d   : > { %v1183_v53 = vshll.u32 %v2349_v46, 16 }
  0x8e   : > { %1570 = vmatmul.bf16.gmra.mxu3 %v2507_v13  ;;  %v1171_v16 = vrot.slane %v1169_v63, 5  ;;  %v1673_v17 = vrot.slane %v1671_v0, 5  ;;  %v1199_v63 = vrot.slane %v1197_v59, 5 }
  0x8f   : > { %1435 = vmatmul.bf16.gmra.mxu2 %v2435_v1  ;;  %v2559_v1 = vld [vmem:[%s2870_s13 + $0x44] sm:$0x1]  ;;  %v1185_v61 = vrot.slane %v1183_v53, 5 }
  0x90   : > { %v1713_v13 = vshll.u32 %v2559_v1, 16  ;;  %v1172_v29 = vsel %vm2904_vm2, %v1167_v15, %v1171_v16  ;;  %v1674_v30 = vsel %vm2904_vm2, %v1669_v19, %v1673_v17  ;;  %v1200_v4 = vsel %vm2904_vm2, %v1195_v62, %v1199_v63 }
  0x91   : > { %v1223_v40 = vunpack.c.l.b16 %v1172_v29  ;;  %v1738_v41 = vunpack.c.l.b16 %v1674_v30  ;;  %v1186_v3 = vsel %vm2904_vm2, %v1181_v60, %v1185_v61  ;;  %v1225_v7 = vunpack.c.l.b16 %v1200_v4 }
  0x92   : > { %v1715_v26 = vrot.slane %v1713_v13, 5 }
  0x93   : > { %v1228_v51 = vpack.c.b16 %v1223_v40, %v1222_v39  ;;  %v1744_v52 = vpack.c.b16 %v1739_v42, %v1738_v41 }
  0x94   : > { %v1716_v37 = vsel %vm2904_vm2, %v1711_v25, %v1715_v26 }
  0x95   : > { %v1741_v45 = vunpack.c.l.b16 %v1716_v37 }
  0x97   : > { %v1745_v56 = vpack.c.b16 %v1741_v45, %v1740_v43 }
  0x9c   : > { %1295 = vmatmul.bf16.gmra.mxu1 %v1227_v55  ;;  %1811 = vmatmul.bf16.gmra.mxu0 %v1743_v2 }
  0x9e   : > { %1575 = vmatmul.bf16.gmra.mxu3 %v2511_v18 }
  0x9f   : > { %1440 = vmatmul.bf16.gmra.mxu2 %v2439_v6  ;;  %v1224_v6 = vunpack.c.l.b16 %v1186_v3 }
  0xa1   : > { %v1229_v8 = vpack.c.b16 %v1225_v7, %v1224_v6 }
  0xa9   : > { %v443_v54 = vpop.f32.mrf.mxu1  ;;  %v433_v55 = vpop.f32.mrf.mxu0 }
  0xac   : > { %1300 = vmatmul.bf16.gmra.mxu1 %v1228_v51  ;;  %1816 = vmatmul.bf16.gmra.mxu0 %v1744_v52 }
  0xaf   : > { %1821 = vmatmul.bf16.vlgmr.msra.gmra.mxu2 %v1745_v56 }
  0xb1   : > { %v445_v1 = vpop.f32.mrf.mxu1  ;;  %v435_v2 = vpop.f32.mrf.mxu0 }
  0xb2   : > { %v775_v0 = vpop.f32.mrf.mxu2  ;;  %v910_v5 = vpop.f32.mrf.mxu3 }
  0xb9   : > { %v448_v10 = vpop.f32.mrf.mxu1  ;;  %v438_v11 = vpop.f32.mrf.mxu0 }
  0xba   : > { %v777_v9 = vpop.f32.mrf.mxu2  ;;  %v3212_v12 = vpop.f32.mrf.mxu3 }
  0xbc   : > { %1305 = vmatmul.bf16.gmra.mxu1 %v1229_v8 }
  0xc1   : > { %v450_v14 = vpop.f32.mrf.mxu1  ;;  %v440_v15 = vpop.f32.mrf.mxu0 }
  0xc2   : > { %v780_v13 = vpop.f32.mrf.mxu2  ;;  %v915_v16 = vpop.f32.mrf.mxu3 }
  0xc9   : > { %v534_v18 = vpop.f32.mrf.mxu1  ;;  %v1045_v19 = vpop.f32.mrf.mxu0 }
  0xca   : > { %v782_v17 = vpop.f32.mrf.mxu2  ;;  %v535_v20 = vadd.f32 %v534_v18, %v433_v55  ;;  %v3214_v21 = vpop.f32.mrf.mxu3 }
  0xcc   : > { %v795_v38 = vadd.f32 %v775_v0, %v535_v20 }
  0xce   : > { %v930_v22 = vadd.f32 %v910_v5, %v795_v38 }
  0xd0   : > { %v1065_v23 = vadd.f32 %v1045_v19, %v930_v22 }
  0xd1   : > { %v536_v25 = vpop.f32.mrf.mxu1  ;;  %v1047_v26 = vpop.f32.mrf.mxu0 }
  0xd2   : > { %v785_v24 = vpop.f32.mrf.mxu2  ;;  %v537_v27 = vadd.f32 %v536_v25, %v435_v2  ;;  %v920_v29 = vpop.f32.mrf.mxu3 }
  0xd4   : > { %v796_v28 = vadd.f32 %v777_v9, %v537_v27 }
  0xd9   : > { %v539_v31 = vpop.f32.mrf.mxu1  ;;  %v1050_v32 = vpop.f32.mrf.mxu0 }
  0xda   : > { %v787_v30 = vpop.f32.mrf.mxu2  ;;  %v540_v33 = vadd.f32 %v539_v31, %v438_v11  ;;  %v3216_v39 = vpop.f32.mrf.mxu3 }
  0xdc   : > { %v797_v34 = vadd.f32 %v780_v13, %v540_v33 }
  0xde   : > { %v932_v35 = vadd.f32 %v915_v16, %v797_v34 }
  0xe0   : > { %v1067_v36 = vadd.f32 %v1050_v32, %v932_v35 }
  0xe1   : > { %v541_v40 = vpop.f32.mrf.mxu1  ;;  %v3218_v41 = vpop.f32.mrf.mxu0 }
  0xe2   : > { %v790_v37 = vpop.f32.mrf.mxu2  ;;  %v542_v42 = vadd.f32 %v541_v40, %v440_v15  ;;  %v925_v48 = vpop.f32.mrf.mxu3 }
  0xe4   : > { %v798_v43 = vadd.f32 %v782_v17, %v542_v42 }
  0xe6   : > { %v933_v33 = vadd.f32 %v3214_v21, %v798_v43 }
  0xe9   : > { %v544_v45 = vpop.f32.mrf.mxu1  ;;  %v1055_v46 = vpop.f32.mrf.mxu0 }
  0xea   : > { %v792_v44 = vpop.f32.mrf.mxu2  ;;  %v545_v47 = vadd.f32 %v544_v45, %v443_v54  ;;  %v3226_v58 = vpop.f32.mrf.mxu3 }
  0xec   : > { %v799_v49 = vadd.f32 %v785_v24, %v545_v47 }
  0xee   : > { %v934_v50 = vadd.f32 %v920_v29, %v799_v49 }
  0xf0   : > { %v3220_v51 = vadd.f32 %v1055_v46, %v934_v50  ;;  %v1068_v46 = vadd.f32 %v3218_v41, %v933_v33 }
  0xf1   : > { %v546_v53 = vpop.f32.mrf.mxu1  ;;  %v3222_v55 = vpop.f32.mrf.mxu0 }
  0xf2   : > { %v1426_v52 = vpop.f32.mrf.mxu2  ;;  %v547_v56 = vadd.f32 %v546_v53, %v445_v1  ;;  %v1561_v0 = vpop.f32.mrf.mxu3 }
  0xf4   : > { %v3224_v57 = vadd.f32 %v787_v30, %v547_v56 }
  0xf9   : > { %v549_v60 = vpop.f32.mrf.mxu1  ;;  %v1060_v61 = vpop.f32.mrf.mxu0 }
  0xfa   : > { %v1428_v59 = vpop.f32.mrf.mxu2  ;;  %v550_v62 = vadd.f32 %v549_v60, %v448_v10  ;;  %v1563_v1 = vpop.f32.mrf.mxu3  ;;  %v931_v10 = vadd.f32 %v3212_v12, %v796_v28  ;;  %v3245_v12 = vld [vmem:[%s3294_s3] ss:$0 sm:$0xff] }
  0xfc   : > { %v801_v63 = vadd.f32 %v790_v37, %v550_v62  ;;  %v1066_v17 = vadd.f32 %v1047_v26, %v931_v10 }
  0xfe   : > { %v936_v54 = vadd.f32 %v925_v48, %v801_v63 }
 0x100   : > { %v3228_v2 = vadd.f32 %v1060_v61, %v936_v54  ;;  %v935_v54 = vadd.f32 %v3216_v39, %v3224_v57 }
 0x101   : > { %v551_v4 = vpop.f32.mrf.mxu1  ;;  %v3230_v5 = vpop.f32.mrf.mxu0 }
 0x102   : > { %v1431_v3 = vpop.f32.mrf.mxu2  ;;  %v552_v6 = vadd.f32 %v551_v4, %v450_v14  ;;  %v3238_v14 = vld [vmem:[%s3293_s2] ss:$0 sm:$0xff]  ;;  %v1566_v22 = vpop.f32.mrf.mxu3 }
 0x104   : > { %v3232_v7 = vadd.f32 %v792_v44, %v552_v6 }
 0x109   : > { %v1291_v8 = vpop.f32.mrf.mxu1  ;;  %v1807_v9 = vpop.f32.mrf.mxu0 }
 0x10a   : > { %v1311_v11 = vadd.f32 %v1291_v8, %v1065_v23  ;;  %v1433_v13 = vpop.f32.mrf.mxu2  ;;  %v1568_v37 = vpop.f32.mrf.mxu3  ;;  %v1070_v8 = vadd.f32 %v3222_v55, %v935_v54 }
 0x10c   : > { %v1446_v15 = vadd.f32 %v1426_v52, %v1311_v11 }
 0x10e   : > { %v1581_v16 = vadd.f32 %v1561_v0, %v1446_v15 }
 0x110   : > { %v1827_v20 = vadd.f32 %v1807_v9, %v1581_v16 }
 0x111   : > { %v1293_v18 = vpop.f32.mrf.mxu1  ;;  %v1809_v19 = vpop.f32.mrf.mxu0 }
 0x112   : > { %v1312_v38 = vadd.f32 %v1293_v18, %v1066_v17  ;;  %v1436_v23 = vpop.f32.mrf.mxu2  ;;  %v1839_v25 = vmul.f32 %v3238_v14, %v1827_v20  ;;  %v1571_v53 = vpop.f32.mrf.mxu3 }
 0x114   : > { %v1447_v24 = vadd.f32 %v1428_v59, %v1312_v38  ;;  %v1851_v30 = vadd.f32 %v3245_v12, %v1839_v25 }
 0x116   : > { %v1582_v26 = vadd.f32 %v1563_v1, %v1447_v24  ;;  %v1859_v40 = vmax.f32 %v1851_v30, 0.0  ;;  %v937_v24 = vadd.f32 %v3226_v58, %v3232_v7 }
 0x118   : > { %v1828_v27 = vadd.f32 %v1809_v19, %v1582_v26  ;;  %v1072_v30 = vadd.f32 %v3230_v5, %v937_v24 }
 0x119   : > { %v1296_v28 = vpop.f32.mrf.mxu1  ;;  %v1812_v29 = vpop.f32.mrf.mxu0 }
 0x11a   : > { %v1840_v31 = vmul.f32 %v3238_v14, %v1828_v27  ;;  %v1313_v32 = vadd.f32 %v1296_v28, %v1067_v36  ;;  %v1438_v45 = vpop.f32.mrf.mxu2  ;;  %v1573_v11 = vpop.f32.mrf.mxu3 }
 0x11c   : > { %v1852_v34 = vadd.f32 %v3245_v12, %v1840_v31  ;;  %v1448_v35 = vadd.f32 %v1431_v3, %v1313_v32 }
 0x11e   : > { %v1860_v42 = vmax.f32 %v1852_v34, 0.0  ;;  %v1583_v44 = vadd.f32 %v1566_v22, %v1448_v35 }
 0x120   : > { %v2710_v36 = vpack.c.bf16 %v1860_v42, %v1859_v40  ;;  %v1829_v43 = vadd.f32 %v1812_v29, %v1583_v44 }
 0x121   : > { %v1298_v47 = vpop.f32.mrf.mxu1  ;;  %v1814_v21 = vpop.f32.mrf.mxu0 }
 0x122   : > { %2711 = vst [vmem:[%s3255_s26] sm:$0xff] %v2710_v36   ;;  %v1314_v48 = vadd.f32 %v1298_v47, %v1068_v46  ;;  %v1841_v50 = vmul.f32 %v3238_v14, %v1829_v43  ;;  %v1441_v59 = vpop.f32.mrf.mxu2  ;;  %v1576_v22 = vpop.f32.mrf.mxu3 }
 0x124   : > { %v1449_v49 = vadd.f32 %v1433_v13, %v1314_v48  ;;  %v1853_v61 = vadd.f32 %v3245_v12, %v1841_v50 }
 0x126   : > { %v1584_v52 = vadd.f32 %v1568_v37, %v1449_v49  ;;  %v1861_v4 = vmax.f32 %v1853_v61, 0.0 }
 0x128   : > { %v1830_v56 = vadd.f32 %v1814_v21, %v1584_v52 }
 0x129   : > { %v1301_v60 = vpop.f32.mrf.mxu1  ;;  %v1817_v63 = vpop.f32.mrf.mxu0 }
 0x12a   : > { %v1842_v62 = vmul.f32 %v3238_v14, %v1830_v56  ;;  %v1315_v41 = vadd.f32 %v1301_v60, %v3220_v51  ;;  %v1443_v16 = vpop.f32.mrf.mxu2  ;;  %v1578_v35 = vpop.f32.mrf.mxu3 }
 0x12c   : > { %v1854_v0 = vadd.f32 %v3245_v12, %v1842_v62  ;;  %v1450_v3 = vadd.f32 %v1436_v23, %v1315_v41 }
 0x12e   : > { %v1862_v6 = vmax.f32 %v1854_v0, 0.0  ;;  %v1585_v1 = vadd.f32 %v1571_v53, %v1450_v3 }
 0x130   : > { %v2715_v9 = vpack.c.bf16 %v1862_v6, %v1861_v4  ;;  %v1831_v10 = vadd.f32 %v1817_v63, %v1585_v1 }
 0x131   : > { %v1303_v13 = vpop.f32.mrf.mxu1  ;;  %v1819_v17 = vpop.f32.mrf.mxu0 }
 0x132   : > { %2727 = vst [vmem:[%s3255_s26 + $0x8] sm:$0xff] %v2715_v9   ;;  %v1316_v15 = vadd.f32 %v1303_v13, %v1070_v8  ;;  %v1843_v18 = vmul.f32 %v3238_v14, %v1831_v10  ;;  %v1822_v26 = vpop.f32.mrf.mxu2 }
 0x134   : > { %v1451_v51 = vadd.f32 %v1438_v45, %v1316_v15  ;;  %v1855_v20 = vadd.f32 %v3245_v12, %v1843_v18 }
 0x136   : > { %v1586_v39 = vadd.f32 %v1573_v11, %v1451_v51  ;;  %v1863_v27 = vmax.f32 %v1855_v20, 0.0 }
 0x138   : > { %v1832_v57 = vadd.f32 %v1819_v17, %v1586_v39 }
 0x139   : > { %v1306_v19 = vpop.f32.mrf.mxu1 }
 0x13a   : > { %v1844_v38 = vmul.f32 %v3238_v14, %v1832_v57  ;;  %v1317_v55 = vadd.f32 %v1306_v19, %v3228_v2  ;;  %v1824_v7 = vpop.f32.mrf.mxu2 }
 0x13c   : > { %v1856_v23 = vadd.f32 %v3245_v12, %v1844_v38  ;;  %v1452_v25 = vadd.f32 %v1441_v59, %v1317_v55 }
 0x13e   : > { %v1864_v28 = vmax.f32 %v1856_v23, 0.0  ;;  %v1587_v29 = vadd.f32 %v1576_v22, %v1452_v25 }
 0x140   : > { %v2720_v31 = vpack.c.bf16 %v1864_v28, %v1863_v27  ;;  %v1833_v33 = vadd.f32 %v1822_v26, %v1587_v29 }
 0x141   : > { %v1308_v32 = vpop.f32.mrf.mxu1 }
 0x142   : > { %2728 = vst [vmem:[%s3255_s26 + $0x10] sm:$0xff] %v2720_v31   ;;  %v1318_v34 = vadd.f32 %v1308_v32, %v1072_v30  ;;  %v1845_v37 = vmul.f32 %v3238_v14, %v1833_v33 }
 0x144   : > { %v1453_v2 = vadd.f32 %v1443_v16, %v1318_v34  ;;  %v1857_v42 = vadd.f32 %v3245_v12, %v1845_v37 }
 0x146   : > { %v1588_v58 = vadd.f32 %v1578_v35, %v1453_v2  ;;  %v1865_v5 = vmax.f32 %v1857_v42, 0.0 }
 0x148   : > { %v1834_v40 = vadd.f32 %v1824_v7, %v1588_v58 }
 0x14a   : > { %v1846_v44 = vmul.f32 %v3238_v14, %v1834_v40 }
 0x14c   : > { %v1858_v45 = vadd.f32 %v3245_v12, %v1846_v44 }
 0x14e   : > { %v1866_v46 = vmax.f32 %v1858_v45, 0.0 }
 0x150   : > { %v2725_v36 = vpack.c.bf16 %v1866_v46, %v1865_v5 }
 0x152   : > { %2729 = vst [vmem:[%s3255_s26 + $0x18] sm:$0xff] %v2725_v36  }
 0x153 PF: > { %s14_s17 = sadd.s32 1, %s2795_s17   ;;  %s3298_s15 = smov %s2791_s16 }
 0x154   : > { %p11_p6 = scmp.ge.s32.totalorder %s14_s17, 4   ;;  %s3299_s16 = smov %s3301_s18 }
 0x156   :  { %13 = sbr.rel (!%p11_p6) target bundleno = 2 (0x2), region = 88 }

// kernel: anynet_forward.10
= control target key start
LH: loop header
LB: loop body
LE: loop exit
PB: predicated region body
PF: predicated region fallthrough
CT: control target
= control target key end

     0   :  { %s2284_s15 = smov 0   ;;  %s2286_s16 = smov 0   ;;  %s2685_s0 = inlined_call_operand.vmem [shape: bf16[2,6,10,128], index: 0, kind: input, shape index: {}]   ;;  %s2686_s1 = inlined_call_operand.vmem [shape: bf16[9,128,128], index: 1, kind: input, shape index: {}]   ;;  %s2687_s2 = inlined_call_operand.vmem [shape: f32[1,128], index: 2, kind: input, shape index: {}]   ;;  %s2688_s3 = inlined_call_operand.vmem [shape: f32[1,128], index: 3, kind: input, shape index: {}]   ;;  %s2689_s4 = inlined_call_operand.vmem [shape: bf16[2,32,128], index: 4, kind: output, shape index: {}]  }
   0x1   :  { %s2288_s17 = smov 0  }
   0x2 LB: > { %s33_s18 = sadd.s32 1, %s2253_s16  ;;  %p1620_p0 = scmp.ge.s32.totalorder %s2257_s17, 1  ;;  %s2257_s17 = sphi %s2288_s17, %s14_s17   ;;  %s2253_s16 = sphi %s2286_s16, %s2695_s16   ;;  %s2249_s15 = sphi %s2284_s15, %s2694_s15  }
   0x3   : > { %p35_p1 = scmp.ge.s32.totalorder %s33_s18, 2  ;;  %p220_p2 = scmp.lt.s32.totalorder %s2257_s17, 3 }
   0x5   : > { %s2697_s18 = smov (%p35_p1, %s33_s18), 0  ;;  %p221_p3 = pnand %p1620_p0, %p220_p2 }
   0x6   : > { %p266_p4 = scmp.lt.s32.totalorder (!%p221_p3), %s2249_s15, 1 }
   0x7   : > { %224 = sbr.rel (%p221_p3) target bundleno = 254 (0xfe), region = 36 }
   0xc   : > { %v2128_v0 = vld [vmem:[%s2686_s1 + $0x78] sm:$0xff]  ;;  %v2127_v4 = vld [vmem:[%s2686_s1 + $0x70] sm:$0xff]  ;;  %s2699_s15 = smov (!%p266_p4, %s2249_s15), 1  ;;  %v2126_v8 = vld [vmem:[%s2686_s1 + $0x68] sm:$0xff]  ;;  %vm321_vm0 = vsmask.f32 3328 }
   0xd   : > { %v2120_v1 = vld [vmem:[%s2686_s1 + $0x38] sm:$0xff]  ;;  %453 = vmatpush.bf16.msra.mxu0 %v2128_v0  ;;  %v2119_v5 = vld [vmem:[%s2686_s1 + $0x30] sm:$0xff]  ;;  %s2208_s9 = smul.u32 48, %s2699_s15  ;;  %v2118_v9 = vld [vmem:[%s2686_s1 + $0x28] sm:$0xff]  ;;  %vm322_vm1 = vsmask.f32 7440 }
   0xe   : > { %v2136_v2 = vld [vmem:[%s2686_s1 + $0xb8] sm:$0xff]  ;;  %532 = vmatpush.bf16.msra.mxu1 %v2120_v1  ;;  %v2135_v6 = vld [vmem:[%s2686_s1 + $0xb0] sm:$0xff]  ;;  %v2134_v10 = vld [vmem:[%s2686_s1 + $0xa8] sm:$0xff]  ;;  %vm563_vm2 = vcmask 1042432   ;;  %vm564_vm3 = vcmask 1046532   ;;  %s2110_s21 = sshll.u32 %s2699_s15, 4 }
   0xf   : > { %v2146_v3 = vld [vmem:[%s2686_s1 + $0xf8] sm:$0xff]  ;;  %655 = vmatpush.bf16.msra.mxu2 %v2136_v2  ;;  %v2145_v7 = vld [vmem:[%s2686_s1 + $0xf0] sm:$0xff]  ;;  %v2144_v11 = vld [vmem:[%s2686_s1 + $0xe8] sm:$0xff]  ;;  %s2344_s24 = scalar_lea.vmem %s2685_s0, %s2208_s9  ;;  %s296_s25 = scalar_lea.vmem %s2689_s4, %s2110_s21 }
  0x10   : > { %760 = vmatpush.bf16.msra.mxu3 %v2146_v3  ;;  %v2125_v12 = vld [vmem:[%s2686_s1 + $0x60] sm:$0xff]  ;;  %v298_v17 = vld [vmem:[%s2344_s24 + $0x8] sm:$0xf]  ;;  %v318_v19 = vld [vmem:[%s2344_s24 + $0xc] sm:$0x1] }
  0x11   : > { %454 = vmatpush.bf16.msra.mxu0 %v2127_v4  ;;  %v2117_v13 = vld [vmem:[%s2686_s1 + $0x20] sm:$0xff]  ;;  %v339_v22 = vshrl.u32 %v298_v17, 16  ;;  %v342_v24 = vshll.u32 %v298_v17, 16  ;;  %v2124_v25 = vld [vmem:[%s2686_s1 + $0x58] sm:$0xff]  ;;  %v348_v30 = vshll.u32 %v318_v19, 16  ;;  %v2123_v39 = vld [vmem:[%s2686_s1 + $0x50] sm:$0xff] }
  0x12   : > { %533 = vmatpush.bf16.msra.mxu1 %v2119_v5  ;;  %v2133_v14 = vld [vmem:[%s2686_s1 + $0xa0] sm:$0xff]  ;;  %v2116_v26 = vld [vmem:[%s2686_s1 + $0x18] sm:$0xff]  ;;  %v552_v36 = vld [vmem:[%s2344_s24 + $0x8] sm:$0xe]  ;;  %v572_v51 = vrot.slane %v318_v19, 5 }
  0x13   : > { %656 = vmatpush.bf16.msra.mxu2 %v2135_v6  ;;  %v2143_v15 = vld [vmem:[%s2686_s1 + $0xe0] sm:$0xff]  ;;  %v341_v29 = vrot.slane %v339_v22, 4  ;;  %v2132_v31 = vld [vmem:[%s2686_s1 + $0x98] sm:$0xff]  ;;  %v344_v33 = vrot.slane %v342_v24, 5  ;;  %v2115_v40 = vld [vmem:[%s2686_s1 + $0x10] sm:$0xff]  ;;  %v350_v43 = vrot.slane %v348_v30, 5 }
  0x14   : > { %761 = vmatpush.bf16.msra.mxu3 %v2145_v7  ;;  %v297_v16 = vld [vmem:[%s2344_s24] sm:$0xf]  ;;  %v317_v18 = vld [vmem:[%s2344_s24 + $0x4] sm:$0x1]  ;;  %v2142_v32 = vld [vmem:[%s2686_s1 + $0xd8] sm:$0xff]  ;;  %v1713_v50 = vrot.slane %v552_v36, 9 }
  0x15   : > { %455 = vmatpush.bf16.msra.mxu0 %v2126_v8  ;;  %v325_v20 = vshrl.u32 %v297_v16, 16  ;;  %v328_v21 = vshll.u32 %v297_v16, 16  ;;  %v334_v23 = vshll.u32 %v317_v18, 16  ;;  %v551_v34 = vld [vmem:[%s2344_s24] sm:$0xe]  ;;  %v345_v38 = vor.u32 %v344_v33, %v341_v29  ;;  %vm2384_vm4 = vmor %vm321_vm0, %vm322_vm1  ;;  %v2131_v46 = vld [vmem:[%s2686_s1 + $0x90] sm:$0xff] }
  0x16   : > { %534 = vmatpush.bf16.msra.mxu1 %v2118_v9  ;;  %v1712_v44 = vrot.slane %v551_v34, 9  ;;  %v568_v45 = vrot.slane %v317_v18, 5  ;;  %v2141_v47 = vld [vmem:[%s2686_s1 + $0xd0] sm:$0xff]  ;;  %vm2396_vm5 = vmor %vm563_vm2, %vm564_vm3  ;;  %v2122_v54 = vld [vmem:[%s2686_s1 + $0x48] sm:$0xff] }
  0x17   : > { %657 = vmatpush.bf16.msra.mxu2 %v2134_v10  ;;  %v327_v27 = vrot.slane %v325_v20, 4  ;;  %v330_v28 = vrot.slane %v328_v21, 5  ;;  %v336_v37 = vrot.slane %v334_v23, 5  ;;  %v346_v48 = vrot.slane %v345_v38, 4  ;;  %v299_v53 = vld [vmem:[%s2344_s24 + $0x10] sm:$0xf] }
  0x18   : > { %762 = vmatpush.bf16.msra.mxu3 %v2144_v11  ;;  %v2114_v55 = vld [vmem:[%s2686_s1 + $0x8] sm:$0xff]  ;;  %v569_v57 = vsel %vm2396_vm5, %v1712_v44, %v568_v45  ;;  %v300_v58 = vld [vmem:[%s2344_s24 + $0x18] sm:$0xf]  ;;  %v573_v61 = vsel %vm2396_vm5, %v1713_v50, %v572_v51  ;;  %v353_v62 = vshrl.u32 %v299_v53, 16  ;;  %v356_v63 = vshll.u32 %v299_v53, 16  ;;  %v2121_v5 = vld [vmem:[%s2686_s1 + $0x40] sm:$0xff] }
  0x19   : > { %456 = vmatpush.bf16.msra.mxu0 %v2125_v12  ;;  %v331_v35 = vor.u32 %v330_v28, %v327_v27  ;;  %v351_v56 = vsel %vm2384_vm4, %v346_v48, %v350_v43  ;;  %v2130_v59 = vld [vmem:[%s2686_s1 + $0x88] sm:$0xff]  ;;  %v367_v0 = vshrl.u32 %v300_v58, 16  ;;  %v2423_v2 = vld [vmem:[%s2344_s24 + $0x14] sm:$0x1]  ;;  %v2426_v3 = vld [vmem:[%s2344_s24 + $0x1c] sm:$0x1]  ;;  %v600_v16 = vunpack.c.l.b16 %v573_v61 }
  0x1a   : > { %535 = vmatpush.bf16.msra.mxu1 %v2117_v13  ;;  %v2140_v60 = vld [vmem:[%s2686_s1 + $0xc8] sm:$0xff]  ;;  %v370_v4 = vshll.u32 %v300_v58, 16  ;;  %v2113_v6 = vld [vmem:[%s2686_s1] sm:$0xff]  ;;  %v398_v8 = vunpack.c.l.b16 %v351_v56  ;;  %v355_v9 = vrot.slane %v353_v62, 4  ;;  %v358_v10 = vrot.slane %v356_v63, 5  ;;  %v2154_v22 = vld [vmem:[%s2686_s1 + $0x138] sm:$0xff] }
  0x1b   : > { %658 = vmatpush.bf16.msra.mxu2 %v2133_v14  ;;  %v332_v42 = vrot.slane %v331_v35, 4  ;;  %v2129_v7 = vld [vmem:[%s2686_s1 + $0x80] sm:$0xff]  ;;  %v369_v11 = vrot.slane %v367_v0, 4  ;;  %v2111_v14 = vld [vmem:[%s2344_s24 + $0x4] sm:$0xf0]  ;;  %v362_v20 = vshll.u32 %v2423_v2, 16 }
  0x1c   : > { %763 = vmatpush.bf16.msra.mxu3 %v2143_v15  ;;  %v2139_v12 = vld [vmem:[%s2686_s1 + $0xc0] sm:$0xff]  ;;  %v599_v15 = vunpack.c.l.b16 %v569_v57  ;;  %v372_v17 = vrot.slane %v370_v4, 5  ;;  %v1786_v18 = vld [vmem:[%s2344_s24 + $0x8] sm:$0xf]  ;;  %v2137_v19 = vld [vmem:[%s2344_s24 + $0xc] sm:$0xf0]  ;;  %v359_v24 = vor.u32 %v358_v10, %v355_v9 }
  0x1d   : > { %457 = vmatpush.bf16.msra.mxu0 %v2124_v25  ;;  %v337_v52 = vsel %vm2384_vm4, %v332_v42, %v336_v37  ;;  %v1674_v13 = vld [vmem:[%s2344_s24] sm:$0xf]  ;;  %v376_v21 = vshll.u32 %v2426_v3, 16  ;;  %v2162_v23 = vld [vmem:[%s2686_s1 + $0x178] sm:$0xff]  ;;  %v364_v34 = vrot.slane %v362_v20, 5  ;;  %v576_v37 = vrot.slane %v2423_v2, 5 }
  0x1e   : > { %536 = vmatpush.bf16.msra.mxu1 %v2116_v26  ;;  %v397_v1 = vunpack.c.l.b16 %v337_v52  ;;  %v373_v25 = vor.u32 %v372_v17, %v369_v11  ;;  %v553_v26 = vld [vmem:[%s2344_s24 + $0x10] sm:$0xe]  ;;  %v1675_v28 = vor.u32 %v2111_v14, %v1674_v13  ;;  %v554_v29 = vld [vmem:[%s2344_s24 + $0x18] sm:$0xe]  ;;  %v603_v30 = vpack.c.b16 %v600_v16, %v599_v15  ;;  %v1824_v45 = vld [vmem:[%s2344_s24 + $0x8] sm:$0xf] }
  0x1f   : > { %659 = vmatpush.bf16.msra.mxu2 %v2132_v31  ;;  %v1787_v31 = vor.u32 %v2137_v19, %v1786_v18  ;;  %v2180_v33 = vld [vmem:[%s2686_s1 + $0x1f8] sm:$0xff]  ;;  %v378_v35 = vrot.slane %v376_v21, 5  ;;  %v1714_v36 = vrot.slane %v553_v26, 9  ;;  %v2153_v38 = vld [vmem:[%s2686_s1 + $0x130] sm:$0xff]  ;;  %v1715_v43 = vrot.slane %v554_v29, 9  ;;  %v2152_v51 = vld [vmem:[%s2686_s1 + $0x128] sm:$0xff] }
  0x20   : > { %764 = vmatpush.bf16.msra.mxu3 %v2142_v32  ;;  %v401_v27 = vpack.c.b16 %v398_v8, %v397_v1  ;;  %v2172_v32 = vld [vmem:[%s2686_s1 + $0x1b8] sm:$0xff]  ;;  %v374_v42 = vrot.slane %v373_v25, 4  ;;  %v580_v44 = vrot.slane %v2426_v3, 5  ;;  %v2179_v48 = vld [vmem:[%s2686_s1 + $0x1f0] sm:$0xff]  ;;  %v2160_v52 = vld [vmem:[%s2686_s1 + $0x168] sm:$0xff]  ;;  %v792_v56 = vshrl.u32 %v1824_v45, 16 }
  0x21   : > { %458 = vmatpush.bf16.msra.mxu0 %v2123_v39  ;;  %v2161_v39 = vld [vmem:[%s2686_s1 + $0x170] sm:$0xff]  ;;  %v577_v50 = vsel %vm2396_vm5, %v1714_v36, %v576_v37  ;;  %v795_v57 = vshll.u32 %v1824_v45, 16  ;;  %v2178_v61 = vld [vmem:[%s2686_s1 + $0x1e8] sm:$0xff]  ;;  %v2151_v63 = vld [vmem:[%s2686_s1 + $0x120] sm:$0xff] }
  0x22   : > { %537 = vmatpush.bf16.msra.mxu1 %v2115_v40  ;;  %v360_v40 = vrot.slane %v359_v24, 4  ;;  %v1996_v62 = vld [vmem:[%s2344_s24 + $0x10] sm:$0xf]  ;;  %v2159_v0 = vld [vmem:[%s2686_s1 + $0x160] sm:$0xff]  ;;  %v1998_v1 = vld [vmem:[%s2344_s24 + $0x18] sm:$0xf]  ;;  %v601_v8 = vunpack.c.l.b16 %v577_v50 }
  0x23   : > { %660 = vmatpush.bf16.msra.mxu2 %v2131_v46  ;;  %v1826_v46 = vld [vmem:[%s2344_s24 + $0x10] sm:$0xf]  ;;  %v1181_v2 = vshrl.u32 %v1996_v62, 16  ;;  %v1184_v3 = vshll.u32 %v1996_v62, 16  ;;  %v2507_v10 = vld [vmem:[%s2344_s24 + $0xc] sm:$0x1] }
  0x24   : > { %765 = vmatpush.bf16.msra.mxu3 %v2141_v47  ;;  %v2171_v47 = vld [vmem:[%s2686_s1 + $0x1b0] sm:$0xff]  ;;  %v365_v53 = vsel %vm2384_vm4, %v360_v40, %v364_v34  ;;  %v806_v58 = vshrl.u32 %v1826_v46, 16  ;;  %v2169_v11 = vld [vmem:[%s2686_s1 + $0x1a0] sm:$0xff]  ;;  %v794_v14 = vrot.slane %v792_v56, 4  ;;  %v797_v15 = vrot.slane %v795_v57, 5  ;;  %v2150_v19 = vld [vmem:[%s2686_s1 + $0x118] sm:$0xff] }
  0x25   : > { %459 = vmatpush.bf16.msra.mxu0 %v2122_v54  ;;  %v379_v54 = vsel %vm2384_vm4, %v374_v42, %v378_v35  ;;  %v399_v4 = vunpack.c.l.b16 %v365_v53  ;;  %v2514_v13 = vld [vmem:[%s2344_s24 + $0x14] sm:$0x1]  ;;  %v2177_v18 = vld [vmem:[%s2686_s1 + $0x1e0] sm:$0xff]  ;;  %v1183_v20 = vrot.slane %v1181_v2, 4  ;;  %v1186_v21 = vrot.slane %v1184_v3, 5  ;;  %v2158_v25 = vld [vmem:[%s2686_s1 + $0x158] sm:$0xff] }
  0x26   : > { %538 = vmatpush.bf16.msra.mxu1 %v2114_v55  ;;  %v581_v55 = vsel %vm2396_vm5, %v1715_v43, %v580_v44  ;;  %v808_v16 = vrot.slane %v806_v58, 4  ;;  %v2138_v24 = vld [vmem:[%s2344_s24 + $0x1c] sm:$0xf0]  ;;  %v2527_v26 = vld [vmem:[%s2344_s24 + $0x14] sm:$0x1]  ;;  %v798_v34 = vor.u32 %v797_v15, %v794_v14  ;;  %v2168_v43 = vld [vmem:[%s2686_s1 + $0x198] sm:$0xff] }
  0x27   : > { %661 = vmatpush.bf16.msra.mxu2 %v2130_v59  ;;  %v809_v59 = vshll.u32 %v1826_v46, 16  ;;  %v602_v9 = vunpack.c.l.b16 %v581_v55  ;;  %v2532_v29 = vld [vmem:[%s2344_s24 + $0x1c] sm:$0x1]  ;;  %v1880_v36 = vld [vmem:[%s2344_s24 + $0x8] sm:$0xe]  ;;  %v1187_v40 = vor.u32 %v1186_v21, %v1183_v20  ;;  %v1190_v42 = vshll.u32 %v2527_v26, 16 }
  0x28   : > { %766 = vmatpush.bf16.msra.mxu3 %v2140_v60  ;;  %v2170_v60 = vld [vmem:[%s2686_s1 + $0x1a8] sm:$0xff]  ;;  %v2176_v44 = vld [vmem:[%s2686_s1 + $0x1d8] sm:$0xff]  ;;  %v1204_v46 = vshll.u32 %v2532_v29, 16  ;;  %v957_v53 = vrot.slane %v2507_v10, 5  ;;  %v2175_v55 = vld [vmem:[%s2686_s1 + $0x1d0] sm:$0xff]  ;;  %v799_v56 = vrot.slane %v798_v34, 4 }
  0x29   : > { %460 = vmatpush.bf16.msra.mxu0 %v2121_v5  ;;  %v400_v5 = vunpack.c.l.b16 %v379_v54  ;;  %v811_v17 = vrot.slane %v809_v59, 5  ;;  %v604_v37 = vpack.c.b16 %v602_v9, %v601_v8  ;;  %v2167_v54 = vld [vmem:[%s2686_s1 + $0x190] sm:$0xff]  ;;  %v961_v59 = vrot.slane %v2514_v13, 5  ;;  %v1830_v2 = vld [vmem:[%s2344_s24 + $0x20] sm:$0xf]  ;;  %v2156_v3 = vld [vmem:[%s2686_s1 + $0x148] sm:$0xff] }
  0x2a   : > { %539 = vmatpush.bf16.msra.mxu1 %v2113_v6  ;;  %v1678_v6 = vld [vmem:[%s2344_s24 + $0x10] sm:$0xf]  ;;  %v1192_v62 = vrot.slane %v1190_v42, 5  ;;  %v837_v14 = vshll.u32 %v1830_v2, 16  ;;  %v2166_v15 = vld [vmem:[%s2686_s1 + $0x188] sm:$0xff]  ;;  %v2147_v21 = vld [vmem:[%s2686_s1 + $0x100] sm:$0xff] }
  0x2b   : > { %662 = vmatpush.bf16.msra.mxu2 %v2129_v7  ;;  %v2112_v7 = vld [vmem:[%s2344_s24 + $0x14] sm:$0xf0]  ;;  %v812_v35 = vor.u32 %v811_v17, %v808_v16  ;;  %v2174_v16 = vld [vmem:[%s2686_s1 + $0x1c8] sm:$0xff]  ;;  %v1829_v34 = vld [vmem:[%s2344_s24 + $0x1c] sm:$0x1] }
  0x2c   : > { %767 = vmatpush.bf16.msra.mxu3 %v2139_v12  ;;  %461 = vmatmul.bf16.vlgmr.msra.gmra.mxu0 %v401_v27  ;;  %v1790_v12 = vld [vmem:[%s2344_s24 + $0x18] sm:$0xf]  ;;  %v801_v27 = vshll.u32 %v2507_v10, 16  ;;  %v839_v42 = vrot.slane %v837_v14, 5 }
  0x2d   : > { %920 = vmatpush.bf16.msrb.mxu0 %v2154_v22  ;;  %540 = vmatmul.bf16.vlgmr.msra.gmra.mxu1 %v1675_v28  ;;  %v1195_v22 = vshrl.u32 %v1998_v1, 16  ;;  %v815_v28 = vshll.u32 %v2514_v13, 16  ;;  %v813_v57 = vrot.slane %v812_v35, 4  ;;  %v834_v13 = vshrl.u32 %v1830_v2, 16 }
  0x2e   : > { %1044 = vmatpush.bf16.msrb.mxu1 %v2162_v23  ;;  %663 = vmatmul.bf16.vlgmr.msra.gmra.mxu2 %v603_v30  ;;  %v1198_v23 = vshll.u32 %v1998_v1, 16  ;;  %v803_v50 = vrot.slane %v801_v27, 5  ;;  %v1206_v1 = vrot.slane %v1204_v46, 5  ;;  %v2165_v27 = vld [vmem:[%s2686_s1 + $0x180] sm:$0xff] }
  0x2f   : > { %768 = vmatmul.bf16.vlgmr.msra.gmra.mxu3 %v1787_v31  ;;  %1149 = vmatpush.bf16.msrb.mxu2 %v2172_v32  ;;  %v1197_v30 = vrot.slane %v1195_v22, 4  ;;  %v402_v32 = vpack.c.b16 %v400_v5, %v399_v4  ;;  %v2000_v5 = vld [vmem:[%s2344_s24 + $0x20] sm:$0xf] }
  0x30   : > { %1309 = vmatpush.bf16.msrb.mxu3 %v2180_v33  ;;  %v1200_v31 = vrot.slane %v1198_v23, 5  ;;  %v1679_v33 = vor.u32 %v2112_v7, %v1678_v6  ;;  %v2002_v6 = vld [vmem:[%s2344_s24 + $0x28] sm:$0xf]  ;;  %v804_v7 = vsel %vm2384_vm4, %v799_v56, %v803_v50  ;;  %v2155_v22 = vld [vmem:[%s2686_s1 + $0x140] sm:$0xff]  ;;  %v2609_v50 = vld [vmem:[%s2344_s24 + $0x2c] sm:$0x1] }
  0x31   : > { %921 = vmatpush.bf16.msrb.mxu0 %v2153_v38  ;;  %v1791_v38 = vor.u32 %v2138_v24, %v1790_v12  ;;  %v1223_v20 = vshrl.u32 %v2002_v6, 16 }
  0x32   : > { %1045 = vmatpush.bf16.msrb.mxu1 %v2161_v39  ;;  %v1881_v39 = vld [vmem:[%s2344_s24 + $0x10] sm:$0xe]  ;;  %v1201_v45 = vor.u32 %v1200_v31, %v1197_v30 }
  0x33   : > { %1150 = vmatpush.bf16.msrb.mxu2 %v2171_v47  ;;  %v2149_v47 = vld [vmem:[%s2686_s1 + $0x110] sm:$0xff]  ;;  %v1885_v58 = vrot.slane %v1881_v39, 9  ;;  %v1225_v46 = vrot.slane %v1223_v20, 4 }
  0x34   : > { %1310 = vmatpush.bf16.msrb.mxu3 %v2179_v48  ;;  %v2157_v48 = vld [vmem:[%s2686_s1 + $0x150] sm:$0xff] }
  0x35   : > { %922 = vmatpush.bf16.msrb.mxu0 %v2152_v51  ;;  %v817_v51 = vrot.slane %v815_v28, 5  ;;  %v962_v9 = vsel %vm2396_vm5, %v1885_v58, %v961_v59  ;;  %v864_v28 = vunpack.c.l.b16 %v804_v7  ;;  %v1958_v31 = vld [vmem:[%s2344_s24 + $0x10] sm:$0xf]  ;;  %v1882_v59 = vld [vmem:[%s2344_s24 + $0x18] sm:$0xe] }
  0x36   : > { %1046 = vmatpush.bf16.msrb.mxu1 %v2160_v52  ;;  %v1884_v52 = vrot.slane %v1880_v36, 9  ;;  %v989_v24 = vunpack.c.l.b16 %v962_v9  ;;  %v2173_v36 = vld [vmem:[%s2686_s1 + $0x1c0] sm:$0xff] }
  0x37   : > { %1151 = vmatpush.bf16.msrb.mxu2 %v2170_v60  ;;  %v2148_v60 = vld [vmem:[%s2686_s1 + $0x108] sm:$0xff]  ;;  %v818_v8 = vsel %vm2384_vm4, %v813_v57, %v817_v51 }
  0x38   : > { %1311 = vmatpush.bf16.msrb.mxu3 %v2178_v61  ;;  %v1188_v61 = vrot.slane %v1187_v40, 4  ;;  %v958_v4 = vsel %vm2396_vm5, %v1884_v52, %v957_v53  ;;  %v865_v30 = vunpack.c.l.b16 %v818_v8  ;;  %v836_v40 = vrot.slane %v834_v13, 4 }
  0x39   : > { %923 = vmatpush.bf16.msrb.mxu0 %v2151_v63  ;;  %v1828_v63 = vld [vmem:[%s2344_s24 + $0x18] sm:$0xf]  ;;  %v988_v23 = vunpack.c.l.b16 %v958_v4  ;;  %v829_v53 = vshll.u32 %v1829_v34, 16  ;;  %v1886_v4 = vrot.slane %v1882_v59, 9 }
  0x3a   : > { %1047 = vmatpush.bf16.msrb.mxu1 %v2159_v0  ;;  %v1202_v0 = vrot.slane %v1201_v45, 4  ;;  %v820_v10 = vshrl.u32 %v1828_v63, 16  ;;  %v823_v12 = vshll.u32 %v1828_v63, 16  ;;  %v868_v51 = vpack.c.b16 %v865_v30, %v864_v28  ;;  %v1962_v30 = vld [vmem:[%s2344_s24 + $0x20] sm:$0xf] }
  0x3b   : > { %1152 = vmatpush.bf16.msrb.mxu2 %v2169_v11  ;;  %v1193_v11 = vsel %vm2384_vm4, %v1188_v61, %v1192_v62  ;;  %v992_v52 = vpack.c.b16 %v989_v24, %v988_v23  ;;  %v840_v58 = vor.u32 %v839_v42, %v836_v40  ;;  %v1883_v61 = vld [vmem:[%s2344_s24 + $0x20] sm:$0xe]  ;;  %v831_v2 = vrot.slane %v829_v53, 5  ;;  %v2055_v40 = vld [vmem:[%s2344_s24 + $0x28] sm:$0xe] }
  0x3c   : > { %1312 = vmatpush.bf16.msrb.mxu3 %v2177_v18  ;;  %466 = vmatmul.bf16.gmra.mxu0 %v402_v32  ;;  %v1207_v17 = vsel %vm2384_vm4, %v1202_v0, %v1206_v1  ;;  %v1209_v18 = vshrl.u32 %v2000_v5, 16  ;;  %v1253_v32 = vunpack.c.l.b16 %v1193_v11  ;;  %v822_v35 = vrot.slane %v820_v10, 4  ;;  %v2186_v10 = vld [vmem:[%s2686_s1 + $0x228] sm:$0xff] }
  0x3d   : > { %924 = vmatpush.bf16.msrb.mxu0 %v2150_v19  ;;  %545 = vmatmul.bf16.gmra.mxu1 %v1679_v33  ;;  %v1212_v19 = vshll.u32 %v2000_v5, 16  ;;  %v2188_v33 = vld [vmem:[%s2686_s1 + $0x238] sm:$0xff]  ;;  %v825_v39 = vrot.slane %v823_v12, 5  ;;  %v1232_v1 = vshll.u32 %v2609_v50, 16  ;;  %v965_v5 = vrot.slane %v1829_v34, 5 }
  0x3e   : > { %1048 = vmatpush.bf16.msrb.mxu1 %v2158_v25  ;;  %668 = vmatmul.bf16.gmra.mxu2 %v604_v37  ;;  %v1226_v25 = vshll.u32 %v2002_v6, 16  ;;  %v1254_v37 = vunpack.c.l.b16 %v1207_v17  ;;  %v841_v7 = vrot.slane %v840_v58, 4  ;;  %v1887_v8 = vrot.slane %v1883_v61, 9 }
  0x3f   : > { %773 = vmatmul.bf16.gmra.mxu3 %v1791_v38  ;;  %1153 = vmatpush.bf16.msrb.mxu2 %v2168_v43  ;;  %v1831_v38 = vld [vmem:[%s2344_s24 + $0x24] sm:$0x1]  ;;  %v2163_v43 = vld [vmem:[%s2344_s24 + $0x14] sm:$0xf0]  ;;  %v1214_v45 = vrot.slane %v1212_v19, 5  ;;  %v826_v57 = vor.u32 %v825_v39, %v822_v35  ;;  %v1234_v14 = vrot.slane %v1232_v1, 5  ;;  %v966_v17 = vsel %vm2396_vm5, %v1886_v4, %v965_v5 }
  0x40   : > { %1313 = vmatpush.bf16.msrb.mxu3 %v2176_v44  ;;  %v1211_v44 = vrot.slane %v1209_v18, 4  ;;  %v1257_v56 = vpack.c.b16 %v1254_v37, %v1253_v32  ;;  %v969_v9 = vrot.slane %v1831_v38, 5  ;;  %v2185_v19 = vld [vmem:[%s2686_s1 + $0x220] sm:$0xff]  ;;  %v990_v24 = vunpack.c.l.b16 %v966_v17  ;;  %v2184_v32 = vld [vmem:[%s2686_s1 + $0x218] sm:$0xff]  ;;  %v2052_v37 = vld [vmem:[%s2344_s24 + $0x10] sm:$0xe] }
  0x41   : > { %925 = vmatpush.bf16.msrb.mxu0 %v2149_v47  ;;  %v1228_v47 = vrot.slane %v1226_v25, 5  ;;  %v827_v6 = vrot.slane %v826_v57, 4  ;;  %v2054_v39 = vld [vmem:[%s2344_s24 + $0x20] sm:$0xe]  ;;  %v1346_v42 = vrot.slane %v2527_v26, 5  ;;  %v2182_v26 = vld [vmem:[%s2686_s1 + $0x208] sm:$0xff] }
  0x42   : > { %1049 = vmatpush.bf16.msrb.mxu1 %v2157_v48  ;;  %v2606_v48 = vld [vmem:[%s2344_s24 + $0x24] sm:$0x1]  ;;  %v1215_v62 = vor.u32 %v1214_v45, %v1211_v44  ;;  %v970_v18 = vsel %vm2396_vm5, %v1887_v8, %v969_v9  ;;  %v1358_v45 = vrot.slane %v2609_v50, 5 }
  0x43   : > { %1154 = vmatpush.bf16.msrb.mxu2 %v2167_v54  ;;  %v843_v54 = vshll.u32 %v1831_v38, 16  ;;  %v1218_v63 = vshll.u32 %v2606_v48, 16  ;;  %v1229_v0 = vor.u32 %v1228_v47, %v1225_v46  ;;  %v991_v25 = vunpack.c.l.b16 %v970_v18  ;;  %v2053_v38 = vld [vmem:[%s2344_s24 + $0x18] sm:$0xe] }
  0x44   : > { %1314 = vmatpush.bf16.msrb.mxu3 %v2175_v55  ;;  %v1959_v55 = vor.u32 %v2163_v43, %v1958_v31  ;;  %v1216_v11 = vrot.slane %v1215_v62, 4  ;;  %v2164_v31 = vld [vmem:[%s2344_s24 + $0x24] sm:$0xf0]  ;;  %v1350_v43 = vrot.slane %v2532_v29, 5  ;;  %v1354_v44 = vrot.slane %v2606_v48, 5 }
  0x45   : > { %926 = vmatpush.bf16.msrb.mxu0 %v2148_v60  ;;  %v2187_v60 = vld [vmem:[%s2686_s1 + $0x230] sm:$0xff]  ;;  %v1220_v12 = vrot.slane %v1218_v63, 5  ;;  %v1230_v13 = vrot.slane %v1229_v0, 4  ;;  %v1963_v34 = vor.u32 %v2164_v31, %v1962_v30  ;;  %v2056_v46 = vrot.slane %v2052_v37, 9 }
  0x46   : > { %1050 = vmatpush.bf16.msrb.mxu1 %v2156_v3  ;;  %v845_v3 = vrot.slane %v843_v54, 5  ;;  %v2057_v47 = vrot.slane %v2053_v38, 9  ;;  %v2181_v54 = vld [vmem:[%s2686_s1 + $0x200] sm:$0xff] }
  0x47   : > { %1155 = vmatpush.bf16.msrb.mxu2 %v2166_v15  ;;  %v832_v15 = vsel %vm2384_vm4, %v827_v6, %v831_v2  ;;  %v1221_v20 = vsel %vm2384_vm4, %v1216_v11, %v1220_v12  ;;  %v1347_v29 = vsel %vm2396_vm5, %v2056_v46, %v1346_v42 }
  0x48   : > { %1315 = vmatpush.bf16.msrb.mxu3 %v2174_v16  ;;  %v846_v16 = vsel %vm2384_vm4, %v841_v7, %v845_v3  ;;  %v1351_v48 = vsel %vm2396_vm5, %v2057_v47, %v1350_v43 }
  0x49   : > { %927 = vmatpush.bf16.msrb.mxu0 %v2147_v21  ;;  %v1235_v21 = vsel %vm2384_vm4, %v1230_v13, %v1234_v14  ;;  %v867_v23 = vunpack.c.l.b16 %v846_v16 }
  0x4a   : > { %1051 = vmatpush.bf16.msrb.mxu1 %v2155_v22  ;;  %v866_v22 = vunpack.c.l.b16 %v832_v15  ;;  %v1256_v28 = vunpack.c.l.b16 %v1235_v21 }
  0x4b   : > { %1156 = vmatpush.bf16.msrb.mxu2 %v2165_v27  ;;  %v1255_v27 = vunpack.c.l.b16 %v1221_v20 }
  0x4c   : > { %1316 = vmatpush.bf16.msrb.mxu3 %v2173_v36  ;;  %928 = vmatmul.bf16.vlgmr.msrb.gmra.mxu0 %v868_v51  ;;  %v869_v41 = vpack.c.b16 %v867_v23, %v866_v22  ;;  %v2183_v36 = vld [vmem:[%s2686_s1 + $0x210] sm:$0xff]  ;;  %v2058_v51 = vrot.slane %v2054_v39, 9 }
  0x4d   : > { %1433 = vmatpush.bf16.msra.mxu0 %v2188_v33  ;;  %1052 = vmatmul.bf16.vlgmr.msrb.gmra.mxu1 %v992_v52  ;;  %v1258_v35 = vpack.c.b16 %v1256_v28, %v1255_v27  ;;  %v2059_v52 = vrot.slane %v2055_v40, 9 }
  0x4e   : > { %2200 = vmatpush.bf16.msra.mxu1 %v2188_v33  ;;  %1157 = vmatmul.bf16.vlgmr.msrb.gmra.mxu2 %v1959_v55  ;;  %v993_v33 = vpack.c.b16 %v991_v25, %v990_v24  ;;  %v1355_v50 = vsel %vm2396_vm5, %v2058_v51, %v1354_v44  ;;  %v1377_v55 = vunpack.c.l.b16 %v1347_v29 }
  0x4f   : > { %1317 = vmatmul.bf16.vlgmr.msrb.gmra.mxu3 %v1257_v56  ;;  %v1359_v53 = vsel %vm2396_vm5, %v2059_v52, %v1358_v45  ;;  %v1378_v56 = vunpack.c.l.b16 %v1351_v48  ;;  %v1379_v57 = vunpack.c.l.b16 %v1355_v50 }
  0x50   : > { %v1380_v58 = vunpack.c.l.b16 %v1359_v53 }
  0x51   : > { %1434 = vmatpush.bf16.msra.mxu0 %v2187_v60  ;;  %v1381_v59 = vpack.c.b16 %v1378_v56, %v1377_v55 }
  0x52   : > { %2201 = vmatpush.bf16.msra.mxu1 %v2187_v60  ;;  %v1382_v60 = vpack.c.b16 %v1380_v58, %v1379_v57  ;;  %v2233_v57 = vld [vmem:[%s2687_s2] ss:$0 sm:$0xff] }
  0x55   : > { %1435 = vmatpush.bf16.msra.mxu0 %v2186_v10 }
  0x56   : > { %2202 = vmatpush.bf16.msra.mxu1 %v2186_v10 }
  0x59   : > { %1436 = vmatpush.bf16.msra.mxu0 %v2185_v19 }
  0x5a   : > { %2203 = vmatpush.bf16.msra.mxu1 %v2185_v19 }
  0x5c   : > { %933 = vmatmul.bf16.gmra.mxu0 %v869_v41 }
  0x5d   : > { %1437 = vmatpush.bf16.msra.mxu0 %v2184_v32  ;;  %1057 = vmatmul.bf16.gmra.mxu1 %v993_v33 }
  0x5e   : > { %2204 = vmatpush.bf16.msra.mxu1 %v2184_v32  ;;  %1162 = vmatmul.bf16.gmra.mxu2 %v1963_v34 }
  0x5f   : > { %1322 = vmatmul.bf16.gmra.mxu3 %v1258_v35 }
  0x61   : > { %1438 = vmatpush.bf16.msra.mxu0 %v2183_v36 }
  0x62   : > { %2205 = vmatpush.bf16.msra.mxu1 %v2183_v36 }
  0x65   : > { %1439 = vmatpush.bf16.msra.mxu0 %v2182_v26 }
  0x66   : > { %2206 = vmatpush.bf16.msra.mxu1 %v2182_v26 }
  0x69   : > { %1440 = vmatpush.bf16.msra.mxu0 %v2181_v54 }
  0x6a   : > { %2207 = vmatpush.bf16.msra.mxu1 %v2181_v54 }
  0x6c   : > { %1441 = vmatmul.bf16.vlgmr.msra.gmra.mxu0 %v1381_v59 }
  0x6d   : > { %1446 = vmatmul.bf16.vlgmr.msra.gmra.mxu1 %v1382_v60 }
  0xa9   : > { %v462_v61 = vpop.f32.mrf.mxu0 }
  0xaa   : > { %v541_v62 = vpop.f32.mrf.mxu1 }
  0xab   : > { %v542_v18 = vadd.f32 %v541_v62, %v462_v61 }
  0xb1   : > { %v664_v49 = vpop.f32.mrf.mxu2  ;;  %v464_v0 = vpop.f32.mrf.mxu0 }
  0xb2   : > { %v769_v63 = vpop.f32.mrf.mxu3  ;;  %v543_v1 = vpop.f32.mrf.mxu1  ;;  %v674_v23 = vadd.f32 %v664_v49, %v542_v18  ;;  %v2234_v49 = vld [vmem:[%s2688_s3] ss:$0 sm:$0xff] }
  0xb3   : > { %v544_v28 = vadd.f32 %v543_v1, %v464_v0 }
  0xb4   : > { %v779_v27 = vadd.f32 %v769_v63, %v674_v23 }
  0xb9   : > { %v666_v2 = vpop.f32.mrf.mxu2  ;;  %v467_v4 = vpop.f32.mrf.mxu0 }
  0xba   : > { %v771_v3 = vpop.f32.mrf.mxu3  ;;  %v546_v5 = vpop.f32.mrf.mxu1  ;;  %v675_v32 = vadd.f32 %v666_v2, %v544_v28 }
  0xbb   : > { %v547_v19 = vadd.f32 %v546_v5, %v467_v4 }
  0xbc   : > { %v780_v38 = vadd.f32 %v771_v3, %v675_v32 }
  0xc1   : > { %v669_v6 = vpop.f32.mrf.mxu2  ;;  %v469_v8 = vpop.f32.mrf.mxu0 }
  0xc2   : > { %v774_v7 = vpop.f32.mrf.mxu3  ;;  %v548_v9 = vpop.f32.mrf.mxu1  ;;  %v676_v24 = vadd.f32 %v669_v6, %v547_v19 }
  0xc3   : > { %v549_v31 = vadd.f32 %v548_v9, %v469_v8 }
  0xc4   : > { %v781_v30 = vadd.f32 %v774_v7, %v676_v24 }
  0xc9   : > { %v671_v10 = vpop.f32.mrf.mxu2  ;;  %v929_v12 = vpop.f32.mrf.mxu0 }
  0xca   : > { %v776_v11 = vpop.f32.mrf.mxu3  ;;  %v1053_v13 = vpop.f32.mrf.mxu1  ;;  %v677_v41 = vadd.f32 %v671_v10, %v549_v31  ;;  %v939_v33 = vadd.f32 %v929_v12, %v779_v27 }
  0xcc   : > { %v782_v39 = vadd.f32 %v776_v11, %v677_v41  ;;  %v1063_v40 = vadd.f32 %v1053_v13, %v939_v33 }
  0xd1   : > { %v1158_v14 = vpop.f32.mrf.mxu2  ;;  %v931_v16 = vpop.f32.mrf.mxu0 }
  0xd2   : > { %v1318_v15 = vpop.f32.mrf.mxu3  ;;  %v1055_v17 = vpop.f32.mrf.mxu1  ;;  %v1168_v44 = vadd.f32 %v1158_v14, %v1063_v40  ;;  %v940_v45 = vadd.f32 %v931_v16, %v780_v38 }
  0xd4   : > { %v1328_v29 = vadd.f32 %v1318_v15, %v1168_v44  ;;  %v1064_v48 = vadd.f32 %v1055_v17, %v940_v45 }
  0xd9   : > { %v1160_v20 = vpop.f32.mrf.mxu2  ;;  %v934_v21 = vpop.f32.mrf.mxu0 }
  0xda   : > { %v1058_v22 = vpop.f32.mrf.mxu1  ;;  %v1320_v25 = vpop.f32.mrf.mxu3  ;;  %v941_v34 = vadd.f32 %v934_v21, %v781_v30  ;;  %v1169_v54 = vadd.f32 %v1160_v20, %v1064_v48 }
  0xdc   : > { %v1065_v42 = vadd.f32 %v1058_v22, %v941_v34  ;;  %v1329_v60 = vadd.f32 %v1320_v25, %v1169_v54 }
  0xe1   : > { %v1163_v35 = vpop.f32.mrf.mxu2  ;;  %v936_v36 = vpop.f32.mrf.mxu0 }
  0xe2   : > { %v1060_v37 = vpop.f32.mrf.mxu1  ;;  %v1323_v43 = vpop.f32.mrf.mxu3  ;;  %v1170_v46 = vadd.f32 %v1163_v35, %v1065_v42  ;;  %v942_v47 = vadd.f32 %v936_v36, %v782_v39 }
  0xe4   : > { %v1330_v50 = vadd.f32 %v1323_v43, %v1170_v46  ;;  %v1066_v53 = vadd.f32 %v1060_v37, %v942_v47 }
  0xe9   : > { %v1165_v51 = vpop.f32.mrf.mxu2  ;;  %v1442_v52 = vpop.f32.mrf.mxu0 }
  0xea   : > { %v1447_v26 = vpop.f32.mrf.mxu1  ;;  %v1171_v55 = vadd.f32 %v1165_v51, %v1066_v53  ;;  %v1452_v56 = vadd.f32 %v1442_v52, %v1328_v29  ;;  %v1325_v59 = vpop.f32.mrf.mxu3 }
  0xeb   : > { %v1454_v58 = vadd.f32 %v1447_v26, %v1330_v50 }
  0xec   : > { %v1331_v61 = vadd.f32 %v1325_v59, %v1171_v55  ;;  %v1460_v62 = vmul.f32 %v2233_v57, %v1452_v56 }
  0xed   : > { %v1462_v63 = vmul.f32 %v2233_v57, %v1454_v58 }
  0xee   : > { %v1468_v4 = vadd.f32 %v2234_v49, %v1460_v62 }
  0xef   : > { %v1470_v5 = vadd.f32 %v2234_v49, %v1462_v63 }
  0xf0   : > { %v1472_v10 = vmax.f32 %v1468_v4, 0.0 }
  0xf1   : > { %v1444_v0 = vpop.f32.mrf.mxu0  ;;  %v1474_v11 = vmax.f32 %v1470_v5, 0.0 }
  0xf2   : > { %v1449_v1 = vpop.f32.mrf.mxu1  ;;  %v1453_v2 = vadd.f32 %v1444_v0, %v1329_v60 }
  0xf3   : > { %v1455_v3 = vadd.f32 %v1449_v1, %v1331_v61 }
  0xf4   : > { %v1461_v6 = vmul.f32 %v2233_v57, %v1453_v2 }
  0xf5   : > { %v1463_v7 = vmul.f32 %v2233_v57, %v1455_v3 }
  0xf6   : > { %v1469_v8 = vadd.f32 %v2234_v49, %v1461_v6 }
  0xf7   : > { %v1471_v9 = vadd.f32 %v2234_v49, %v1463_v7 }
  0xf8   : > { %v1473_v12 = vmax.f32 %v1469_v8, 0.0 }
  0xf9   : > { %v1475_v13 = vmax.f32 %v1471_v9, 0.0 }
  0xfa   : > { %v2192_v14 = vpack.c.bf16 %v1473_v12, %v1472_v10 }
  0xfb   : > { %v2197_v15 = vpack.c.bf16 %v1475_v13, %v1474_v11 }
  0xfc   : > { %2193 = vst [vmem:[%s296_s25] sm:$0xff] %v2192_v14  }
  0xfd   : > { %2199 = vst [vmem:[%s296_s25 + $0x8] sm:$0xff] %v2197_v15  }
  0xfe PF: > { %s14_s17 = sadd.s32 1, %s2257_s17   ;;  %s2694_s15 = smov %s2253_s16 }
  0xff   : > { %p11_p5 = scmp.ge.s32.totalorder %s14_s17, 4   ;;  %s2695_s16 = smov %s2697_s18 }
 0x101   :  { %13 = sbr.rel (!%p11_p5) target bundleno = 2 (0x2), region = 85 }

// kernel: anynet_forward.7
= control target key start
LH: loop header
LB: loop body
LE: loop exit
PB: predicated region body
PF: predicated region fallthrough
CT: control target
= control target key end

     0   :  { %s2884_s15 = smov 0   ;;  %s2886_s16 = smov 0   ;;  %s3528_s0 = inlined_call_operand.vmem [shape: bf16[2,10,10,128], index: 0, kind: input, shape index: {}]   ;;  %s3529_s1 = inlined_call_operand.vmem [shape: bf16[9,128,128], index: 1, kind: input, shape index: {}]   ;;  %s3530_s2 = inlined_call_operand.vmem [shape: f32[1,128], index: 2, kind: input, shape index: {}]   ;;  %s3531_s3 = inlined_call_operand.vmem [shape: f32[1,128], index: 3, kind: input, shape index: {}]   ;;  %s3532_s4 = inlined_call_operand.vmem [shape: bf16[2,64,128], index: 4, kind: output, shape index: {}]  }
   0x1   :  { %s2888_s17 = smov 0  }
   0x2 LB: > { %s33_s18 = sadd.s32 1, %s2853_s16  ;;  %p2126_p0 = scmp.ge.s32.totalorder %s2857_s17, 1  ;;  %s2857_s17 = sphi %s2888_s17, %s14_s17   ;;  %s2853_s16 = sphi %s2886_s16, %s3538_s16   ;;  %s2849_s15 = sphi %s2884_s15, %s3537_s15  }
   0x3   : > { %p35_p1 = scmp.ge.s32.totalorder %s33_s18, 2  ;;  %p220_p2 = scmp.lt.s32.totalorder %s2857_s17, 3 }
   0x5   : > { %s3540_s18 = smov (%p35_p1, %s33_s18), 0  ;;  %p221_p3 = pnand %p2126_p0, %p220_p2 }
   0x6   : > { %p266_p4 = scmp.lt.s32.totalorder (!%p221_p3), %s2849_s15, 1 }
   0x7   : > { %224 = sbr.rel (%p221_p3) target bundleno = 339 (0x153), region = 36 }
   0xc   : > { %v2704_v0 = vld [vmem:[%s3529_s1 + $0x78] sm:$0xff]  ;;  %v2703_v2 = vld [vmem:[%s3529_s1 + $0x70] sm:$0xff]  ;;  %s3542_s15 = smov (!%p266_p4, %s2849_s15), 1  ;;  %v2702_v6 = vld [vmem:[%s3529_s1 + $0x68] sm:$0xff]  ;;  %vm329_vm0 = vsmask.f32 3328 }
   0xd   : > { %v2712_v1 = vld [vmem:[%s3529_s1 + $0xb8] sm:$0xff]  ;;  %2792 = vmatpush.bf16.msra.mxu1 %v2704_v0  ;;  %525 = vmatpush.bf16.msra.mxu0 %v2704_v0  ;;  %v2711_v3 = vld [vmem:[%s3529_s1 + $0xb0] sm:$0xff]  ;;  %s2808_s29 = smul.u32 80, %s3542_s15  ;;  %v2710_v7 = vld [vmem:[%s3529_s1 + $0xa8] sm:$0xff]  ;;  %vm330_vm1 = vsmask.f32 7440 }
   0xe   : > { %795 = vmatpush.bf16.msra.mxu2 %v2712_v1  ;;  %v2724_v4 = vld [vmem:[%s3529_s1 + $0xf8] sm:$0xff]  ;;  %v2723_v5 = vld [vmem:[%s3529_s1 + $0xf0] sm:$0xff]  ;;  %v2701_v11 = vld [vmem:[%s3529_s1 + $0x60] sm:$0xff]  ;;  %vm679_vm2 = vcmask 1042432   ;;  %vm680_vm3 = vcmask 1046532   ;;  %s2684_s22 = sshll.u32 %s3542_s15, 5 }
   0xf   : > { %930 = vmatpush.bf16.msra.mxu3 %v2724_v4  ;;  %s2932_s12 = scalar_lea.vmem %s3528_s0, %s2808_s29  ;;  %v2709_v16 = vld [vmem:[%s3529_s1 + $0xa0] sm:$0xff]  ;;  %v2722_v17 = vld [vmem:[%s3529_s1 + $0xe8] sm:$0xff]  ;;  %v2700_v29 = vld [vmem:[%s3529_s1 + $0x58] sm:$0xff]  ;;  %s3492_s25 = scalar_lea.vmem %s3532_s4, %s2684_s22 }
  0x10   : > { %v301_v8 = vld [vmem:[%s2932_s12 + $0x20] sm:$0xf]  ;;  %v302_v9 = vld [vmem:[%s2932_s12 + $0x28] sm:$0xf]  ;;  %v2937_v10 = vld [vmem:[%s2932_s12 + $0x24] sm:$0x1] }
  0x11   : > { %2793 = vmatpush.bf16.msra.mxu1 %v2703_v2  ;;  %526 = vmatpush.bf16.msra.mxu0 %v2703_v2  ;;  %v2943_v12 = vld [vmem:[%s2932_s12 + $0x2c] sm:$0x1]  ;;  %v389_v13 = vshrl.u32 %v301_v8, 16  ;;  %v392_v14 = vshll.u32 %v301_v8, 16  ;;  %v403_v15 = vshrl.u32 %v302_v9, 16  ;;  %v406_v18 = vshll.u32 %v302_v9, 16  ;;  %vm2970_vm4 = vmor %vm329_vm0, %vm330_vm1 }
  0x12   : > { %796 = vmatpush.bf16.msra.mxu2 %v2711_v3  ;;  %v297_v19 = vld [vmem:[%s2932_s12] sm:$0xf]  ;;  %v398_v22 = vshll.u32 %v2937_v10, 16  ;;  %v298_v24 = vld [vmem:[%s2932_s12 + $0x8] sm:$0xf]  ;;  %v412_v26 = vshll.u32 %v2943_v12, 16  ;;  %vm2979_vm5 = vmor %vm679_vm2, %vm680_vm3 }
  0x13   : > { %931 = vmatpush.bf16.msra.mxu3 %v2723_v5  ;;  %v391_v20 = vrot.slane %v389_v13, 4  ;;  %v394_v21 = vrot.slane %v392_v14, 5  ;;  %v405_v23 = vrot.slane %v403_v15, 4  ;;  %v408_v25 = vrot.slane %v406_v18, 5  ;;  %v321_v27 = vld [vmem:[%s2932_s12 + $0x4] sm:$0x1] }
  0x14   : > { %v322_v28 = vld [vmem:[%s2932_s12 + $0xc] sm:$0x1]  ;;  %v333_v31 = vshrl.u32 %v297_v19, 16  ;;  %v336_v32 = vshll.u32 %v297_v19, 16  ;;  %v2721_v34 = vld [vmem:[%s3529_s1 + $0xe0] sm:$0xff]  ;;  %v342_v35 = vshll.u32 %v321_v27, 16 }
  0x15   : > { %2794 = vmatpush.bf16.msra.mxu1 %v2702_v6  ;;  %527 = vmatpush.bf16.msra.mxu0 %v2702_v6  ;;  %v395_v30 = vor.u32 %v394_v21, %v391_v20  ;;  %v409_v33 = vor.u32 %v408_v25, %v405_v23  ;;  %v347_v36 = vshrl.u32 %v298_v24, 16  ;;  %v350_v37 = vshll.u32 %v298_v24, 16  ;;  %v655_v38 = vld [vmem:[%s2932_s12] sm:$0xe]  ;;  %v656_v43 = vld [vmem:[%s2932_s12 + $0x8] sm:$0xe] }
  0x16   : > { %797 = vmatpush.bf16.msra.mxu2 %v2710_v7  ;;  %v400_v39 = vrot.slane %v398_v22, 5  ;;  %v335_v40 = vrot.slane %v333_v31, 4  ;;  %v338_v41 = vrot.slane %v336_v32, 5  ;;  %v356_v42 = vshll.u32 %v322_v28, 16  ;;  %v2708_v44 = vld [vmem:[%s3529_s1 + $0x98] sm:$0xff]  ;;  %v2699_v60 = vld [vmem:[%s3529_s1 + $0x50] sm:$0xff] }
  0x17   : > { %932 = vmatpush.bf16.msra.mxu3 %v2722_v17  ;;  %v396_v45 = vrot.slane %v395_v30, 4  ;;  %v414_v46 = vrot.slane %v412_v26, 5  ;;  %v349_v47 = vrot.slane %v347_v36, 4  ;;  %v352_v48 = vrot.slane %v350_v37, 5  ;;  %v2720_v56 = vld [vmem:[%s3529_s1 + $0xd8] sm:$0xff]  ;;  %v2707_v0 = vld [vmem:[%s3529_s1 + $0x90] sm:$0xff] }
  0x18   : > { %v410_v50 = vrot.slane %v409_v33, 4  ;;  %v339_v51 = vor.u32 %v338_v41, %v335_v40  ;;  %v2226_v52 = vrot.slane %v655_v38, 9  ;;  %v684_v53 = vrot.slane %v321_v27, 5  ;;  %v303_v59 = vld [vmem:[%s2932_s12 + $0x30] sm:$0xf]  ;;  %v2698_v14 = vld [vmem:[%s3529_s1 + $0x48] sm:$0xff] }
  0x19   : > { %2795 = vmatpush.bf16.msra.mxu1 %v2701_v11  ;;  %528 = vmatpush.bf16.msra.mxu0 %v2701_v11  ;;  %v344_v54 = vrot.slane %v342_v35, 5  ;;  %v353_v55 = vor.u32 %v352_v48, %v349_v47  ;;  %v2227_v58 = vrot.slane %v656_v43, 9  ;;  %v358_v62 = vrot.slane %v356_v42, 5  ;;  %v304_v3 = vld [vmem:[%s2932_s12 + $0x38] sm:$0xf]  ;;  %v2719_v11 = vld [vmem:[%s3529_s1 + $0xd0] sm:$0xff] }
  0x1a   : > { %798 = vmatpush.bf16.msra.mxu2 %v2709_v16  ;;  %v340_v61 = vrot.slane %v339_v51, 4  ;;  %v688_v63 = vrot.slane %v322_v28, 5  ;;  %v401_v1 = vsel %vm2970_vm4, %v396_v45, %v400_v39  ;;  %v415_v4 = vsel %vm2970_vm4, %v410_v50, %v414_v46  ;;  %v299_v7 = vld [vmem:[%s2932_s12 + $0x10] sm:$0xf]  ;;  %v2706_v19 = vld [vmem:[%s3529_s1 + $0x88] sm:$0xff]  ;;  %v2697_v24 = vld [vmem:[%s3529_s1 + $0x40] sm:$0xff] }
  0x1b   : > { %933 = vmatpush.bf16.msra.mxu3 %v2721_v34  ;;  %v354_v2 = vrot.slane %v353_v55, 4  ;;  %v685_v5 = vsel %vm2979_vm5, %v2226_v52, %v684_v53  ;;  %v417_v6 = vshrl.u32 %v303_v59, 16  ;;  %v420_v13 = vshll.u32 %v303_v59, 16  ;;  %v300_v22 = vld [vmem:[%s2932_s12 + $0x18] sm:$0xf]  ;;  %v2718_v31 = vld [vmem:[%s3529_s1 + $0xc8] sm:$0xff] }
  0x1c   : > { %v345_v8 = vsel %vm2970_vm4, %v340_v61, %v344_v54  ;;  %v689_v9 = vsel %vm2979_vm5, %v2227_v58, %v688_v63  ;;  %v3008_v15 = vunpack.c.l.b16 %v401_v1  ;;  %v431_v17 = vshrl.u32 %v304_v3, 16  ;;  %v3026_v32 = vld [vmem:[%s2932_s12 + $0x34] sm:$0x1]  ;;  %v3029_v36 = vld [vmem:[%s2932_s12 + $0x3c] sm:$0x1]  ;;  %v2705_v42 = vld [vmem:[%s3529_s1 + $0x80] sm:$0xff] }
  0x1d   : > { %2796 = vmatpush.bf16.msra.mxu1 %v2700_v29  ;;  %529 = vmatpush.bf16.msra.mxu0 %v2700_v29  ;;  %v359_v16 = vsel %vm2970_vm4, %v354_v2, %v358_v62  ;;  %v466_v18 = vunpack.c.l.b16 %v415_v4  ;;  %v731_v20 = vunpack.c.l.b16 %v685_v5  ;;  %v434_v21 = vshll.u32 %v304_v3, 16  ;;  %v2696_v29 = vld [vmem:[%s3529_s1 + $0x38] sm:$0xff]  ;;  %v3036_v43 = vld [vmem:[%s2932_s12 + $0x14] sm:$0x1]  ;;  %v2717_v58 = vld [vmem:[%s3529_s1 + $0xc0] sm:$0xff] }
  0x1e   : > { %799 = vmatpush.bf16.msra.mxu2 %v2708_v44  ;;  %v361_v23 = vshrl.u32 %v299_v7, 16  ;;  %v461_v25 = vunpack.c.l.b16 %v345_v8  ;;  %v732_v26 = vunpack.c.l.b16 %v689_v9  ;;  %v419_v27 = vrot.slane %v417_v6, 4  ;;  %v3039_v44 = vld [vmem:[%s2932_s12 + $0x1c] sm:$0x1]  ;;  %v2695_v52 = vld [vmem:[%s3529_s1 + $0x30] sm:$0xff] }
  0x1f   : > { %934 = vmatpush.bf16.msra.mxu3 %v2720_v56  ;;  %v364_v28 = vshll.u32 %v299_v7, 16  ;;  %v462_v30 = vunpack.c.l.b16 %v359_v16  ;;  %v422_v33 = vrot.slane %v420_v13, 5  ;;  %v433_v34 = vrot.slane %v431_v17, 4  ;;  %v2732_v45 = vld [vmem:[%s3529_s1 + $0x138] sm:$0xff]  ;;  %v2731_v59 = vld [vmem:[%s3529_s1 + $0x130] sm:$0xff] }
  0x20   : > { %v436_v35 = vrot.slane %v434_v21, 5  ;;  %v363_v37 = vrot.slane %v361_v23, 4  ;;  %v375_v39 = vshrl.u32 %v300_v22, 16  ;;  %v378_v40 = vshll.u32 %v300_v22, 16  ;;  %v2752_v48 = vld [vmem:[%s3529_s1 + $0x1b8] sm:$0xff]  ;;  %v2751_v6 = vld [vmem:[%s3529_s1 + $0x1b0] sm:$0xff] }
  0x21   : > { %2797 = vmatpush.bf16.msra.mxu1 %v2699_v60  ;;  %530 = vmatpush.bf16.msra.mxu0 %v2699_v60  ;;  %v366_v38 = vrot.slane %v364_v28, 5  ;;  %v471_v41 = vpack.c.b16 %v466_v18, %v3008_v15  ;;  %v739_v46 = vpack.c.b16 %v732_v26, %v731_v20  ;;  %v426_v47 = vshll.u32 %v3026_v32, 16  ;;  %v2713_v1 = vld [vmem:[%s2932_s12 + $0xc] sm:$0xf0]  ;;  %v2760_v2 = vld [vmem:[%s3529_s1 + $0x1f8] sm:$0xff]  ;;  %v2750_v26 = vld [vmem:[%s3529_s1 + $0x1a8] sm:$0xff] }
  0x22   : > { %800 = vmatpush.bf16.msra.mxu2 %v2707_v0  ;;  %v377_v50 = vrot.slane %v375_v39, 4  ;;  %v380_v51 = vrot.slane %v378_v40, 5  ;;  %v469_v53 = vpack.c.b16 %v462_v30, %v461_v25  ;;  %v423_v54 = vor.u32 %v422_v33, %v419_v27  ;;  %v2308_v0 = vld [vmem:[%s2932_s12 + $0x8] sm:$0xf]  ;;  %v657_v4 = vld [vmem:[%s2932_s12 + $0x10] sm:$0xe] }
  0x23   : > { %935 = vmatpush.bf16.msra.mxu3 %v2719_v11  ;;  %v437_v55 = vor.u32 %v436_v35, %v433_v34  ;;  %v440_v56 = vshll.u32 %v3029_v36, 16  ;;  %v367_v60 = vor.u32 %v366_v38, %v363_v37  ;;  %v370_v61 = vshll.u32 %v3036_v43, 16  ;;  %v658_v5 = vld [vmem:[%s2932_s12 + $0x18] sm:$0xe]  ;;  %v2354_v13 = vld [vmem:[%s2932_s12 + $0x8] sm:$0xf] }
  0x24   : > { %v381_v62 = vor.u32 %v380_v51, %v377_v50  ;;  %v384_v63 = vshll.u32 %v3039_v44, 16  ;;  %v428_v3 = vrot.slane %v426_v47, 5  ;;  %v424_v7 = vrot.slane %v423_v54, 4  ;;  %v2356_v18 = vld [vmem:[%s2932_s12 + $0x10] sm:$0xf]  ;;  %v2730_v25 = vld [vmem:[%s3529_s1 + $0x128] sm:$0xff] }
  0x25   : > { %2798 = vmatpush.bf16.msra.mxu1 %v2698_v14  ;;  %531 = vmatpush.bf16.msra.mxu0 %v2698_v14  ;;  %v438_v8 = vrot.slane %v437_v55, 4  ;;  %v442_v9 = vrot.slane %v440_v56, 5  ;;  %v2309_v11 = vor.u32 %v2713_v1, %v2308_v0  ;;  %v368_v14 = vrot.slane %v367_v60, 4  ;;  %v2693_v37 = vld [vmem:[%s3529_s1 + $0x20] sm:$0xff]  ;;  %v2758_v40 = vld [vmem:[%s3529_s1 + $0x1e8] sm:$0xff]  ;;  %v2692_v55 = vld [vmem:[%s3529_s1 + $0x18] sm:$0xff] }
  0x26   : > { %801 = vmatpush.bf16.msra.mxu2 %v2706_v19  ;;  %v372_v15 = vrot.slane %v370_v61, 5  ;;  %v382_v16 = vrot.slane %v381_v62, 4  ;;  %v386_v17 = vrot.slane %v384_v63, 5  ;;  %v2694_v19 = vld [vmem:[%s3529_s1 + $0x28] sm:$0xff]  ;;  %v2228_v20 = vrot.slane %v657_v4, 9 }
  0x27   : > { %936 = vmatpush.bf16.msra.mxu3 %v2718_v31  ;;  %v692_v21 = vrot.slane %v3036_v43, 5  ;;  %v2229_v22 = vrot.slane %v658_v5, 9  ;;  %v696_v23 = vrot.slane %v3039_v44, 5  ;;  %v429_v27 = vsel %vm2970_vm4, %v424_v7, %v428_v3  ;;  %v2729_v43 = vld [vmem:[%s3529_s1 + $0x120] sm:$0xff]  ;;  %v3111_v47 = vld [vmem:[%s2932_s12 + $0xc] sm:$0x1] }
  0x28   : > { %v443_v28 = vsel %vm2970_vm4, %v438_v8, %v442_v9  ;;  %v987_v30 = vshll.u32 %v2354_v13, 16  ;;  %v373_v31 = vsel %vm2970_vm4, %v368_v14, %v372_v15  ;;  %v387_v33 = vsel %vm2970_vm4, %v382_v16, %v386_v17  ;;  %v2749_v44 = vld [vmem:[%s3529_s1 + $0x1a0] sm:$0xff]  ;;  %v3117_v56 = vld [vmem:[%s2932_s12 + $0x14] sm:$0x1]  ;;  %v2312_v62 = vld [vmem:[%s2932_s12 + $0x18] sm:$0xf] }
  0x29   : > { %2799 = vmatpush.bf16.msra.mxu1 %v2697_v24  ;;  %532 = vmatpush.bf16.msra.mxu0 %v2697_v24  ;;  %v2759_v24 = vld [vmem:[%s3529_s1 + $0x1f0] sm:$0xff]  ;;  %v998_v34 = vshrl.u32 %v2356_v18, 16  ;;  %v1001_v35 = vshll.u32 %v2356_v18, 16  ;;  %v693_v38 = vsel %vm2979_vm5, %v2228_v20, %v692_v21  ;;  %v697_v39 = vsel %vm2979_vm5, %v2229_v22, %v696_v23  ;;  %v2714_v63 = vld [vmem:[%s2932_s12 + $0x1c] sm:$0xf0]  ;;  %v2748_v17 = vld [vmem:[%s3529_s1 + $0x198] sm:$0xff] }
  0x2a   : > { %802 = vmatpush.bf16.msra.mxu2 %v2705_v42  ;;  %v468_v42 = vunpack.c.l.b16 %v443_v28  ;;  %v989_v50 = vrot.slane %v987_v30, 5  ;;  %v733_v51 = vunpack.c.l.b16 %v693_v38  ;;  %v659_v1 = vld [vmem:[%s2932_s12 + $0x20] sm:$0xe]  ;;  %v1007_v4 = vshll.u32 %v3117_v56, 16  ;;  %v660_v5 = vld [vmem:[%s2932_s12 + $0x28] sm:$0xe] }
  0x2b   : > { %937 = vmatpush.bf16.msra.mxu3 %v2717_v58  ;;  %v1003_v54 = vrot.slane %v1001_v35, 5  ;;  %v2728_v58 = vld [vmem:[%s3529_s1 + $0x118] sm:$0xff]  ;;  %v2727_v7 = vld [vmem:[%s3529_s1 + $0x110] sm:$0xff]  ;;  %v2313_v8 = vor.u32 %v2714_v63, %v2312_v62  ;;  %v700_v14 = vrot.slane %v2937_v10, 5  ;;  %v2231_v15 = vrot.slane %v660_v5, 9  ;;  %v2757_v21 = vld [vmem:[%s3529_s1 + $0x1e0] sm:$0xff] }
  0x2c   : > { %543 = vmatmul.bf16.vlgmr.msra.gmra.mxu1 %v471_v41  ;;  %533 = vmatmul.bf16.vlgmr.msra.gmra.mxu0 %v469_v53  ;;  %v467_v41 = vunpack.c.l.b16 %v429_v27  ;;  %v1000_v53 = vrot.slane %v998_v34, 4  ;;  %v704_v16 = vrot.slane %v2943_v12, 5  ;;  %v2358_v20 = vld [vmem:[%s2932_s12 + $0x18] sm:$0xf]  ;;  %v2690_v10 = vld [vmem:[%s3529_s1 + $0x8] sm:$0xff]  ;;  %v2747_v23 = vld [vmem:[%s3529_s1 + $0x190] sm:$0xff] }
  0x2d   : > { %626 = vmatpush.bf16.msrb.mxu1 %v2696_v29  ;;  %1176 = vmatpush.bf16.msrb.mxu0 %v2732_v45  ;;  %v984_v29 = vshrl.u32 %v2354_v13, 16  ;;  %v463_v45 = vunpack.c.l.b16 %v373_v31  ;;  %v2360_v22 = vld [vmem:[%s2932_s12 + $0x20] sm:$0xf]  ;;  %v2726_v12 = vld [vmem:[%s3529_s1 + $0x108] sm:$0xff]  ;;  %v1012_v28 = vshrl.u32 %v2358_v20, 16  ;;  %v1015_v30 = vshll.u32 %v2358_v20, 16 }
  0x2e   : > { %1485 = vmatpush.bf16.msrb.mxu2 %v2752_v48  ;;  %938 = vmatmul.bf16.vlgmr.msra.gmra.mxu3 %v2309_v11  ;;  %v472_v60 = vpack.c.b16 %v468_v42, %v467_v41  ;;  %v1004_v3 = vor.u32 %v1003_v54, %v1000_v53  ;;  %v2230_v11 = vrot.slane %v659_v1, 9  ;;  %v705_v27 = vsel %vm2979_vm5, %v2231_v15, %v704_v16  ;;  %v2689_v34 = vld [vmem:[%s3529_s1] sm:$0xff]  ;;  %v2739_v53 = vld [vmem:[%s3529_s1 + $0x170] sm:$0xff]  ;;  %v662_v5 = vld [vmem:[%s2932_s12 + $0x38] sm:$0xe] }
  0x2f   : > { %803 = vmatmul.bf16.vlgmr.msra.gmra.mxu2 %v739_v46  ;;  %1731 = vmatpush.bf16.msrb.mxu3 %v2760_v2  ;;  %v464_v46 = vunpack.c.l.b16 %v387_v33  ;;  %v986_v48 = vrot.slane %v984_v29, 4  ;;  %v1026_v31 = vshrl.u32 %v2360_v22, 16  ;;  %v1029_v33 = vshll.u32 %v2360_v22, 16  ;;  %v2180_v35 = vld [vmem:[%s2932_s12] sm:$0xf]  ;;  %v3197_v1 = vld [vmem:[%s3529_s1 + $0x230] sm:$0xff] }
  0x30   : > { %v1005_v18 = vrot.slane %v1004_v3, 4  ;;  %v2725_v38 = vld [vmem:[%s3529_s1 + $0x100] sm:$0xff]  ;;  %v2715_v62 = vld [vmem:[%s2932_s12 + $0x2c] sm:$0xf0]  ;;  %v2362_v3 = vld [vmem:[%s2932_s12 + $0x28] sm:$0xf] }
  0x31   : > { %627 = vmatpush.bf16.msrb.mxu1 %v2695_v52  ;;  %1177 = vmatpush.bf16.msrb.mxu0 %v2731_v59  ;;  %v734_v52 = vunpack.c.l.b16 %v697_v39  ;;  %v993_v59 = vshll.u32 %v3111_v47, 16  ;;  %v470_v61 = vpack.c.b16 %v464_v46, %v463_v45  ;;  %v990_v0 = vor.u32 %v989_v50, %v986_v48  ;;  %v2685_v39 = vld [vmem:[%s2932_s12 + $0x4] sm:$0xf0]  ;;  %v3181_v45 = vld [vmem:[%s3529_s1 + $0x238] sm:$0xff]  ;;  %v3184_v46 = vld [vmem:[%s2932_s12 + $0x24] sm:$0x1] }
  0x32   : > { %1486 = vmatpush.bf16.msrb.mxu2 %v2751_v6  ;;  %v2691_v6 = vld [vmem:[%s3529_s1 + $0x10] sm:$0xff]  ;;  %v1014_v48 = vrot.slane %v1012_v28, 4  ;;  %v1017_v50 = vrot.slane %v1015_v30, 5  ;;  %v2181_v54 = vor.u32 %v2685_v39, %v2180_v35  ;;  %v1040_v15 = vshrl.u32 %v2362_v3, 16  ;;  %v2745_v22 = vld [vmem:[%s3529_s1 + $0x180] sm:$0xff] }
  0x33   : > { %1732 = vmatpush.bf16.msrb.mxu3 %v2759_v24  ;;  %v740_v2 = vpack.c.b16 %v734_v52, %v733_v51  ;;  %v995_v9 = vrot.slane %v993_v59, 5  ;;  %v991_v13 = vrot.slane %v990_v0, 4  ;;  %v2756_v24 = vld [vmem:[%s3529_s1 + $0x1d8] sm:$0xff]  ;;  %v1028_v51 = vrot.slane %v1026_v31, 4  ;;  %v3237_v28 = vld [vmem:[%s3529_s1 + $0x220] sm:$0xff] }
  0x34   : > { %v1031_v52 = vrot.slane %v1029_v33, 5  ;;  %v1035_v59 = vshll.u32 %v3184_v46, 16  ;;  %v1018_v63 = vor.u32 %v1017_v50, %v1014_v48  ;;  %v1043_v16 = vshll.u32 %v2362_v3, 16  ;;  %v2736_v31 = vld [vmem:[%s3529_s1 + $0x158] sm:$0xff]  ;;  %v3247_v33 = vld [vmem:[%s2932_s12 + $0x2c] sm:$0x1] }
  0x35   : > { %628 = vmatpush.bf16.msrb.mxu1 %v2694_v19  ;;  %1178 = vmatpush.bf16.msrb.mxu0 %v2730_v25  ;;  %v1009_v19 = vrot.slane %v1007_v4, 5  ;;  %v996_v25 = vsel %vm2970_vm4, %v991_v13, %v995_v9  ;;  %v661_v4 = vld [vmem:[%s2932_s12 + $0x30] sm:$0xe]  ;;  %v708_v20 = vrot.slane %v3026_v32, 5  ;;  %v2754_v32 = vld [vmem:[%s3529_s1 + $0x1c8] sm:$0xff] }
  0x36   : > { %1487 = vmatpush.bf16.msrb.mxu2 %v2750_v26  ;;  %v701_v26 = vsel %vm2979_vm5, %v2230_v11, %v700_v14  ;;  %v1032_v0 = vor.u32 %v1031_v52, %v1028_v51  ;;  %v1037_v9 = vrot.slane %v1035_v59, 5  ;;  %v2364_v11 = vld [vmem:[%s2932_s12 + $0x30] sm:$0xf]  ;;  %v1019_v13 = vrot.slane %v1018_v63, 4  ;;  %v3250_v39 = vld [vmem:[%s2932_s12 + $0x34] sm:$0x1] }
  0x37   : > { %1733 = vmatpush.bf16.msrb.mxu3 %v2758_v40  ;;  %v1010_v29 = vsel %vm2970_vm4, %v1005_v18, %v1009_v19  ;;  %v1112_v40 = vunpack.c.l.b16 %v996_v25  ;;  %v735_v42 = vunpack.c.l.b16 %v701_v26  ;;  %v3216_v18 = vld [vmem:[%s3529_s1 + $0x228] sm:$0xff]  ;;  %v2232_v19 = vrot.slane %v661_v4, 9  ;;  %v2556_v51 = vld [vmem:[%s2932_s12 + $0x18] sm:$0xf]  ;;  %v2716_v63 = vld [vmem:[%s2932_s12 + $0x3c] sm:$0xf0] }
  0x38   : > { %v1113_v41 = vunpack.c.l.b16 %v1010_v29  ;;  %v1033_v14 = vrot.slane %v1032_v0, 4  ;;  %v1042_v26 = vrot.slane %v1040_v15, 4  ;;  %v1049_v52 = vshll.u32 %v3247_v33, 16  ;;  %v2366_v0 = vld [vmem:[%s2932_s12 + $0x38] sm:$0xf] }
  0x39   : > { %629 = vmatpush.bf16.msrb.mxu1 %v2693_v37  ;;  %1179 = vmatpush.bf16.msrb.mxu0 %v2729_v43  ;;  %v2740_v37 = vld [vmem:[%s3529_s1 + $0x178] sm:$0xff]  ;;  %v736_v43 = vunpack.c.l.b16 %v705_v27  ;;  %v1045_v27 = vrot.slane %v1043_v16, 5  ;;  %v709_v29 = vsel %vm2979_vm5, %v2232_v19, %v708_v20  ;;  %v1063_v59 = vshll.u32 %v3250_v39, 16  ;;  %v2368_v16 = vld [vmem:[%s2932_s12 + $0x40] sm:$0xf] }
  0x3a   : > { %1488 = vmatpush.bf16.msrb.mxu2 %v2749_v44  ;;  %v3176_v44 = vld [vmem:[%s2932_s12 + $0x1c] sm:$0x1]  ;;  %v1038_v25 = vsel %vm2970_vm4, %v1033_v14, %v1037_v9  ;;  %v2753_v19 = vld [vmem:[%s3529_s1 + $0x1c0] sm:$0xff]  ;;  %v1071_v20 = vshll.u32 %v2366_v0, 16 }
  0x3b   : > { %1734 = vmatpush.bf16.msrb.mxu3 %v2757_v21  ;;  %v2233_v21 = vrot.slane %v662_v5, 9  ;;  %v1046_v50 = vor.u32 %v1045_v27, %v1042_v26  ;;  %v3268_v5 = vld [vmem:[%s2932_s12 + $0x14] sm:$0x1]  ;;  %v1065_v15 = vrot.slane %v1063_v59, 5 }
  0x3c   : > { %548 = vmatmul.bf16.gmra.mxu1 %v472_v60  ;;  %538 = vmatmul.bf16.gmra.mxu0 %v470_v61  ;;  %v741_v60 = vpack.c.b16 %v736_v43, %v735_v42  ;;  %v2316_v61 = vld [vmem:[%s2932_s12 + $0x28] sm:$0xf]  ;;  %v2686_v42 = vld [vmem:[%s2932_s12 + $0x14] sm:$0xf0]  ;;  %v737_v43 = vunpack.c.l.b16 %v709_v29  ;;  %v3290_v27 = vld [vmem:[%s3529_s1 + $0x210] sm:$0xff] }
  0x3d   : > { %630 = vmatpush.bf16.msrb.mxu1 %v2692_v55  ;;  %1180 = vmatpush.bf16.msrb.mxu0 %v2728_v58  ;;  %v1120_v55 = vpack.c.b16 %v1113_v41, %v1112_v40  ;;  %v1021_v58 = vshll.u32 %v3176_v44, 16  ;;  %v2554_v40 = vld [vmem:[%s2932_s12 + $0x10] sm:$0xf]  ;;  %v1047_v4 = vrot.slane %v1046_v50, 4  ;;  %v2418_v29 = vld [vmem:[%s2932_s12 + $0x8] sm:$0xe] }
  0x3e   : > { %1489 = vmatpush.bf16.msrb.mxu2 %v2748_v17  ;;  %943 = vmatmul.bf16.gmra.mxu3 %v2313_v8  ;;  %v2755_v17 = vld [vmem:[%s3529_s1 + $0x1d0] sm:$0xff] }
  0x3f   : > { %808 = vmatmul.bf16.gmra.mxu2 %v740_v2  ;;  %1735 = vmatpush.bf16.msrb.mxu3 %v2756_v24  ;;  %v2738_v2 = vld [vmem:[%s3529_s1 + $0x168] sm:$0xff]  ;;  %v1023_v8 = vrot.slane %v1021_v58, 5  ;;  %v1057_v24 = vshll.u32 %v2364_v11, 16  ;;  %v2184_v41 = vld [vmem:[%s2932_s12 + $0x10] sm:$0xf] }
  0x41   : > { %631 = vmatpush.bf16.msrb.mxu1 %v2691_v6  ;;  %1181 = vmatpush.bf16.msrb.mxu0 %v2727_v7  ;;  %v2746_v6 = vld [vmem:[%s3529_s1 + $0x188] sm:$0xff]  ;;  %v2317_v7 = vor.u32 %v2715_v62, %v2316_v61  ;;  %v1059_v35 = vrot.slane %v1057_v24, 5  ;;  %v2185_v61 = vor.u32 %v2686_v42, %v2184_v41  ;;  %v3303_v42 = vld [vmem:[%s2932_s12 + $0x3c] sm:$0x1] }
  0x42   : > { %1490 = vmatpush.bf16.msrb.mxu2 %v2747_v23  ;;  %v1054_v23 = vshrl.u32 %v2364_v11, 16 }
  0x43   : > { %1736 = vmatpush.bf16.msrb.mxu3 %v2755_v17  ;;  %v1068_v17 = vshrl.u32 %v2366_v0, 16 }
  0x45   : > { %632 = vmatpush.bf16.msrb.mxu1 %v2690_v10  ;;  %1182 = vmatpush.bf16.msrb.mxu0 %v2726_v12  ;;  %v712_v10 = vrot.slane %v3029_v36, 5  ;;  %v2737_v12 = vld [vmem:[%s3529_s1 + $0x160] sm:$0xff]  ;;  %v1024_v36 = vsel %vm2970_vm4, %v1019_v13, %v1023_v8 }
  0x46   : > { %1491 = vmatpush.bf16.msrb.mxu2 %v2746_v6  ;;  %v1051_v6 = vrot.slane %v1049_v52, 5 }
  0x47   : > { %v713_v30 = vsel %vm2979_vm5, %v2233_v21, %v712_v10  ;;  %1737 = vmatpush.bf16.msrb.mxu3 %v2754_v32  ;;  %v1548_v10 = vshll.u32 %v3268_v5, 16  ;;  %v1243_v32 = vrot.slane %v3117_v56, 5  ;;  %v1070_v56 = vrot.slane %v1068_v17, 4 }
  0x48   : > { %v738_v48 = vunpack.c.l.b16 %v713_v30 }
  0x49   : > { %633 = vmatpush.bf16.msrb.mxu1 %v2689_v34  ;;  %1183 = vmatpush.bf16.msrb.mxu0 %v2725_v38  ;;  %v1056_v34 = vrot.slane %v1054_v23, 4  ;;  %v1115_v38 = vunpack.c.l.b16 %v1038_v25  ;;  %v1239_v23 = vrot.slane %v3111_v47, 5  ;;  %v1085_v25 = vshll.u32 %v2368_v16, 16 }
  0x4a   : > { %1492 = vmatpush.bf16.msrb.mxu2 %v2745_v22  ;;  %v742_v3 = vpack.c.b16 %v738_v48, %v737_v43  ;;  %v1052_v47 = vsel %vm2970_vm4, %v1047_v4, %v1051_v6  ;;  %v2508_v4 = vld [vmem:[%s2932_s12 + $0x10] sm:$0xf] }
  0x4b   : > { %v1060_v58 = vor.u32 %v1059_v35, %v1056_v34  ;;  %1738 = vmatpush.bf16.msrb.mxu3 %v2753_v19  ;;  %v2419_v34 = vld [vmem:[%s2932_s12 + $0x10] sm:$0xe]  ;;  %v2426_v35 = vrot.slane %v2418_v29, 9  ;;  %v1087_v52 = vrot.slane %v1085_v25, 5 }
  0x4c   : > { %634 = vmatmul.bf16.vlgmr.msrb.gmra.mxu1 %v2181_v54  ;;  %1184 = vmatmul.bf16.vlgmr.msrb.gmra.mxu0 %v1120_v55  ;;  %v1542_v54 = vshll.u32 %v2554_v40, 16  ;;  %v1553_v55 = vshrl.u32 %v2556_v51, 16  ;;  %v2427_v41 = vrot.slane %v2419_v34, 9  ;;  %v2761_v34 = vld [vmem:[%s3529_s1 + $0x200] sm:$0xff] }
  0x4d   : > { %1350 = vmatpush.bf16.msra.mxu1 %v2740_v37  ;;  %1905 = vmatpush.bf16.msra.mxu0 %v3181_v45  ;;  %v1114_v37 = vunpack.c.l.b16 %v1024_v36  ;;  %v1061_v14 = vrot.slane %v1060_v58, 4  ;;  %v1082_v36 = vshrl.u32 %v2368_v16, 16  ;;  %v1240_v50 = vsel %vm2979_vm5, %v2426_v35, %v1239_v23  ;;  %v3335_v23 = vld [vmem:[%s2932_s12 + $0x2c] sm:$0x1] }
  0x4e   : > { %948 = vmatmul.bf16.gmra.mxu3 %v2317_v7  ;;  %2800 = vmatpush.bf16.msra.mxu2 %v3181_v45  ;;  %v2320_v45 = vld [vmem:[%s2932_s12 + $0x38] sm:$0xf]  ;;  %v3271_v7 = vld [vmem:[%s2932_s12 + $0x1c] sm:$0x1]  ;;  %v1544_v9 = vrot.slane %v1542_v54, 5  ;;  %v1555_v11 = vrot.slane %v1553_v55, 4  ;;  %v1286_v54 = vunpack.c.l.b16 %v1240_v50  ;;  %v1116_v58 = vunpack.c.l.b16 %v1052_v47 }
  0x4f   : > { %813 = vmatmul.bf16.gmra.mxu2 %v741_v60  ;;  %v2735_v60 = vld [vmem:[%s3529_s1 + $0x150] sm:$0xff]  ;;  %v1121_v62 = vpack.c.b16 %v1115_v38, %v1114_v37  ;;  %v2321_v13 = vor.u32 %v2716_v63, %v2320_v45  ;;  %v1562_v24 = vshll.u32 %v3271_v7, 16  ;;  %v1066_v30 = vsel %vm2970_vm4, %v1061_v14, %v1065_v15  ;;  %v2188_v55 = vld [vmem:[%s2932_s12 + $0x20] sm:$0xf]  ;;  %v2687_v45 = vld [vmem:[%s2932_s12 + $0x24] sm:$0xf0] }
  0x50   : > { %v1073_v37 = vrot.slane %v1071_v20, 5  ;;  %v1117_v59 = vunpack.c.l.b16 %v1066_v30  ;;  %v1077_v63 = vshll.u32 %v3303_v42, 16  ;;  %v2189_v17 = vor.u32 %v2687_v45, %v2188_v55  ;;  %v2192_v55 = vld [vmem:[%s2932_s12 + $0x30] sm:$0xf] }
  0x51   : > { %1351 = vmatpush.bf16.msra.mxu1 %v2739_v53  ;;  %1906 = vmatpush.bf16.msra.mxu0 %v3197_v1  ;;  %v1539_v53 = vshrl.u32 %v2554_v40, 16  ;;  %v1550_v40 = vrot.slane %v1548_v10, 5  ;;  %v1564_v48 = vrot.slane %v1562_v24, 5 }
  0x52   : > { %2801 = vmatpush.bf16.msra.mxu2 %v3197_v1  ;;  %v2734_v1 = vld [vmem:[%s3529_s1 + $0x148] sm:$0xff] }
  0x53   : > { %v1541_v8 = vrot.slane %v1539_v53, 4  ;;  %v1244_v53 = vsel %vm2979_vm5, %v2427_v41, %v1243_v32 }
  0x55   : > { %1352 = vmatpush.bf16.msra.mxu1 %v2738_v2  ;;  %1907 = vmatpush.bf16.msra.mxu0 %v3216_v18  ;;  %v1556_v2 = vshll.u32 %v2556_v51, 16  ;;  %v1545_v21 = vor.u32 %v1544_v9, %v1541_v8  ;;  %v1084_v51 = vrot.slane %v1082_v36, 4 }
  0x56   : > { %2802 = vmatpush.bf16.msra.mxu2 %v3216_v18  ;;  %v2762_v18 = vld [vmem:[%s3529_s1 + $0x208] sm:$0xff] }
  0x57   : > { %v1558_v22 = vrot.slane %v1556_v2, 5  ;;  %v1546_v38 = vrot.slane %v1545_v21, 4  ;;  %v2558_v2 = vld [vmem:[%s2932_s12 + $0x20] sm:$0xf] }
  0x58   : > { %v1567_v9 = vshrl.u32 %v2558_v2, 16 }
  0x59   : > { %1353 = vmatpush.bf16.msra.mxu1 %v2737_v12  ;;  %1908 = vmatpush.bf16.msra.mxu0 %v3237_v28  ;;  %v2764_v12 = vld [vmem:[%s3529_s1 + $0x218] sm:$0xff]  ;;  %v1559_v26 = vor.u32 %v1558_v22, %v1555_v11  ;;  %v1551_v0 = vsel %vm2970_vm4, %v1546_v38, %v1550_v40  ;;  %v1570_v11 = vshll.u32 %v2558_v2, 16  ;;  %v3332_v22 = vld [vmem:[%s2932_s12 + $0x24] sm:$0x1]  ;;  %v2421_v38 = vld [vmem:[%s2932_s12 + $0x20] sm:$0xe] }
  0x5a   : > { %2803 = vmatpush.bf16.msra.mxu2 %v3237_v28  ;;  %v1088_v28 = vor.u32 %v1087_v52, %v1084_v51  ;;  %v1569_v19 = vrot.slane %v1567_v9, 4  ;;  %v1667_v21 = vunpack.c.l.b16 %v1551_v0  ;;  %v1247_v52 = vrot.slane %v3176_v44, 5 }
  0x5b   : > { %v1560_v43 = vrot.slane %v1559_v26, 4  ;;  %v1572_v20 = vrot.slane %v1570_v11, 5  ;;  %v1079_v26 = vrot.slane %v1077_v63, 5  ;;  %v2618_v63 = vld [vmem:[%s2932_s12 + $0x10] sm:$0xe] }
  0x5c   : > { %639 = vmatmul.bf16.gmra.mxu1 %v2185_v61  ;;  %1189 = vmatmul.bf16.gmra.mxu0 %v1121_v62  ;;  %v1287_v61 = vunpack.c.l.b16 %v1244_v53  ;;  %v1074_v62 = vor.u32 %v1073_v37, %v1070_v56  ;;  %v1089_v29 = vrot.slane %v1088_v28, 4  ;;  %v1576_v56 = vshll.u32 %v3332_v22, 16  ;;  %v2420_v37 = vld [vmem:[%s2932_s12 + $0x18] sm:$0xe] }
  0x5d   : > { %1354 = vmatpush.bf16.msra.mxu1 %v2736_v31  ;;  %1909 = vmatpush.bf16.msra.mxu0 %v2764_v12  ;;  %v2733_v31 = vld [vmem:[%s3529_s1 + $0x140] sm:$0xff]  ;;  %v1565_v6 = vsel %vm2970_vm4, %v1560_v43, %v1564_v48  ;;  %v1573_v30 = vor.u32 %v1572_v20, %v1569_v19  ;;  %v2428_v50 = vrot.slane %v2420_v37, 9  ;;  %v2429_v53 = vrot.slane %v2421_v38, 9 }
  0x5e   : > { %953 = vmatmul.bf16.gmra.mxu3 %v2321_v13  ;;  %v3327_v8 = vpack.c.b16 %v1287_v61, %v1286_v54  ;;  %v2741_v13 = vld [vmem:[%s2932_s12 + $0x14] sm:$0xf0]  ;;  %2804 = vmatpush.bf16.msra.mxu2 %v2764_v12  ;;  %v1668_v10 = vunpack.c.l.b16 %v1565_v6  ;;  %v1075_v25 = vrot.slane %v1074_v62, 4  ;;  %v1590_v12 = vshll.u32 %v3335_v23, 16 }
  0x5f   : > { %818 = vmatmul.bf16.gmra.mxu2 %v742_v3  ;;  %v2560_v3 = vld [vmem:[%s2932_s12 + $0x28] sm:$0xf]  ;;  %v2509_v36 = vor.u32 %v2741_v13, %v2508_v4  ;;  %v1578_v43 = vrot.slane %v1576_v56, 5  ;;  %v1251_v54 = vrot.slane %v3184_v46, 5  ;;  %v1794_v62 = vrot.slane %v3268_v5, 5 }
  0x60   : > { %v1581_v15 = vshrl.u32 %v2560_v3, 16  ;;  %v1584_v16 = vshll.u32 %v2560_v3, 16  ;;  %v1080_v40 = vsel %vm2970_vm4, %v1075_v25, %v1079_v26  ;;  %v1592_v48 = vrot.slane %v1590_v12, 5  ;;  %v2619_v3 = vld [vmem:[%s2932_s12 + $0x18] sm:$0xe] }
  0x61   : > { %1355 = vmatpush.bf16.msra.mxu1 %v2735_v60  ;;  %1910 = vmatpush.bf16.msra.mxu0 %v3290_v27  ;;  %v3316_v60 = vld [vmem:[%s2932_s12 + $0x44] sm:$0x1]  ;;  %v1118_v45 = vunpack.c.l.b16 %v1080_v40  ;;  %v1252_v61 = vsel %vm2979_vm5, %v2429_v53, %v1251_v54  ;;  %v2562_v4 = vld [vmem:[%s2932_s12 + $0x30] sm:$0xf]  ;;  %v2564_v6 = vld [vmem:[%s2932_s12 + $0x38] sm:$0xf] }
  0x62   : > { %v1091_v14 = vshll.u32 %v3316_v60, 16  ;;  %v1583_v24 = vrot.slane %v1581_v15, 4  ;;  %v1586_v32 = vrot.slane %v1584_v16, 5  ;;  %2805 = vmatpush.bf16.msra.mxu2 %v3290_v27  ;;  %v1574_v27 = vrot.slane %v1573_v30, 4  ;;  %v2512_v16 = vld [vmem:[%s2932_s12 + $0x20] sm:$0xf] }
  0x63   : > { %v1289_v0 = vunpack.c.l.b16 %v1252_v61  ;;  %v1595_v11 = vshrl.u32 %v2562_v4, 16  ;;  %v1598_v13 = vshll.u32 %v2562_v4, 16  ;;  %v1609_v5 = vshrl.u32 %v2564_v6, 16  ;;  %v2422_v53 = vld [vmem:[%s2932_s12 + $0x28] sm:$0xe] }
  0x64   : > { %v1093_v47 = vrot.slane %v1091_v14, 5  ;;  %v1587_v35 = vor.u32 %v1586_v32, %v1583_v24  ;;  %v1579_v46 = vsel %vm2970_vm4, %v1574_v27, %v1578_v43  ;;  %v1798_v15 = vrot.slane %v3271_v7, 5  ;;  %v2423_v54 = vld [vmem:[%s2932_s12 + $0x30] sm:$0xe]  ;;  %v2620_v4 = vld [vmem:[%s2932_s12 + $0x20] sm:$0xe] }
  0x65   : > { %1356 = vmatpush.bf16.msra.mxu1 %v2734_v1  ;;  %1911 = vmatpush.bf16.msra.mxu0 %v2762_v18  ;;  %v1122_v1 = vpack.c.b16 %v1117_v59, %v1116_v58  ;;  %v1248_v59 = vsel %vm2979_vm5, %v2428_v50, %v1247_v52  ;;  %v1669_v19 = vunpack.c.l.b16 %v1579_v46  ;;  %v1597_v24 = vrot.slane %v1595_v11, 4  ;;  %v2516_v50 = vld [vmem:[%s2932_s12 + $0x30] sm:$0xf]  ;;  %v2621_v11 = vld [vmem:[%s2932_s12 + $0x28] sm:$0xe] }
  0x66   : > { %v1094_v41 = vsel %vm2970_vm4, %v1089_v29, %v1093_v47  ;;  %2806 = vmatpush.bf16.msra.mxu2 %v2762_v18  ;;  %v1588_v51 = vrot.slane %v1587_v35, 4  ;;  %v2688_v18 = vld [vmem:[%s2932_s12 + $0x34] sm:$0xf0]  ;;  %v1288_v44 = vunpack.c.l.b16 %v1248_v59  ;;  %v1600_v32 = vrot.slane %v1598_v13, 5  ;;  %v3372_v29 = vld [vmem:[%s2932_s12 + $0x34] sm:$0x1] }
  0x67   : > { %v1119_v58 = vunpack.c.l.b16 %v1094_v41  ;;  %v2193_v28 = vor.u32 %v2688_v18, %v2192_v55  ;;  %v3375_v47 = vld [vmem:[%s2932_s12 + $0x3c] sm:$0x1]  ;;  %v2566_v55 = vld [vmem:[%s2932_s12 + $0x40] sm:$0xf]  ;;  %v2431_v59 = vrot.slane %v2423_v54, 9  ;;  %v1259_v61 = vrot.slane %v3250_v39, 5 }
  0x68   : > { %v1593_v2 = vsel %vm2970_vm4, %v1588_v51, %v1592_v48  ;;  %v3366_v9 = vpack.c.b16 %v1289_v0, %v1288_v44  ;;  %v1601_v12 = vor.u32 %v1600_v32, %v1597_v24  ;;  %v1618_v35 = vshll.u32 %v3375_v47, 16  ;;  %v2568_v18 = vld [vmem:[%s2932_s12 + $0x48] sm:$0xf] }
  0x69   : > { %1357 = vmatpush.bf16.msra.mxu1 %v2733_v31  ;;  %v1675_v31 = vpack.c.b16 %v1668_v10, %v1667_v21  ;;  %1912 = vmatpush.bf16.msra.mxu0 %v2761_v34  ;;  %v1123_v14 = vpack.c.b16 %v1119_v58, %v1118_v45  ;;  %v1670_v20 = vunpack.c.l.b16 %v1593_v2  ;;  %v2626_v21 = vrot.slane %v2618_v63, 9 }
  0x6a   : > { %2807 = vmatpush.bf16.msra.mxu2 %v2761_v34  ;;  %v2627_v10 = vrot.slane %v2619_v3, 9  ;;  %v1602_v40 = vrot.slane %v1601_v12, 4  ;;  %v1620_v43 = vrot.slane %v1618_v35, 5  ;;  %v2430_v45 = vrot.slane %v2422_v53, 9 }
  0x6b   : > { %v1676_v30 = vpack.c.b16 %v1670_v20, %v1669_v19  ;;  %v1795_v7 = vsel %vm2979_vm5, %v2626_v21, %v1794_v62  ;;  %v1255_v58 = vrot.slane %v3247_v33, 5  ;;  %v2743_v62 = vld [vmem:[%s2932_s12 + $0x34] sm:$0xf0]  ;;  %v1623_v63 = vshrl.u32 %v2566_v55, 16 }
  0x6c   : > { %644 = vmatmul.bf16.gmra.mxu1 %v2189_v17  ;;  %1194 = vmatmul.bf16.gmra.mxu0 %v1122_v1  ;;  %v2742_v17 = vld [vmem:[%s2932_s12 + $0x24] sm:$0xf0]  ;;  %v1612_v1 = vshll.u32 %v2564_v6, 16  ;;  %v1799_v56 = vsel %vm2979_vm5, %v2627_v10, %v1798_v15  ;;  %v1841_v37 = vunpack.c.l.b16 %v1795_v7  ;;  %v1626_v44 = vshll.u32 %v2566_v55, 16  ;;  %v3402_v15 = vld [vmem:[%s2932_s12 + $0x44] sm:$0x1] }
  0x6d   : > { %v2513_v26 = vor.u32 %v2742_v17, %v2512_v16  ;;  %v1842_v38 = vunpack.c.l.b16 %v1799_v56  ;;  %v1637_v0 = vshrl.u32 %v2568_v18, 16  ;;  %v1640_v46 = vshll.u32 %v2568_v18, 16  ;;  %v3405_v16 = vld [vmem:[%s2932_s12 + $0x4c] sm:$0x1] }
  0x6e   : > { %1739 = vmatmul.bf16.vlgmr.msrb.gmra.mxu3 %v1675_v31  ;;  %v1614_v25 = vrot.slane %v1612_v1, 5  ;;  %v1604_v31 = vshll.u32 %v3372_v29, 16  ;;  %v1256_v6 = vsel %vm2979_vm5, %v2430_v45, %v1255_v58  ;;  %v1260_v33 = vsel %vm2979_vm5, %v2431_v59, %v1259_v61  ;;  %v2623_v61 = vld [vmem:[%s2932_s12 + $0x38] sm:$0xe] }
  0x6f   : > { %1493 = vmatmul.bf16.vlgmr.msrb.gmra.mxu2 %v2509_v36  ;;  %v1611_v36 = vrot.slane %v1609_v5, 4  ;;  %v1849_v48 = vpack.c.b16 %v1842_v38, %v1841_v37  ;;  %v1290_v13 = vunpack.c.l.b16 %v1256_v6  ;;  %v1291_v39 = vunpack.c.l.b16 %v1260_v33  ;;  %v2424_v38 = vld [vmem:[%s2932_s12 + $0x38] sm:$0xe] }
  0x70   : > { %v1606_v41 = vrot.slane %v1604_v31, 5  ;;  %v1625_v5 = vrot.slane %v1623_v63, 4  ;;  %v1639_v17 = vrot.slane %v1637_v0, 4  ;;  %v1642_v1 = vrot.slane %v1640_v46, 5  ;;  %v2625_v63 = vld [vmem:[%s2932_s12 + $0x48] sm:$0xe] }
  0x71   : > { %v1615_v34 = vor.u32 %v1614_v25, %v1611_v36  ;;  %v2628_v19 = vrot.slane %v2620_v4, 9  ;;  %v3407_v20 = vpack.c.b16 %v1291_v39, %v1290_v13  ;;  %v1802_v10 = vrot.slane %v3332_v22, 5 }
  0x72   : > { %v1607_v51 = vsel %vm2970_vm4, %v1602_v40, %v1606_v41  ;;  %v2629_v24 = vrot.slane %v2621_v11, 9  ;;  %v1806_v32 = vrot.slane %v3335_v23, 5  ;;  %v1632_v25 = vshll.u32 %v3402_v15, 16  ;;  %v2425_v40 = vld [vmem:[%s2932_s12 + $0x40] sm:$0xe] }
  0x73   : > { %v1616_v27 = vrot.slane %v1615_v34, 4  ;;  %v1671_v2 = vunpack.c.l.b16 %v1607_v51  ;;  %v1803_v7 = vsel %vm2979_vm5, %v2628_v19, %v1802_v10  ;;  %v2432_v41 = vrot.slane %v2424_v38, 9  ;;  %v2744_v51 = vld [vmem:[%s2932_s12 + $0x44] sm:$0xf0] }
  0x74   : > { %v1807_v22 = vsel %vm2979_vm5, %v2629_v24, %v1806_v32  ;;  %v1634_v23 = vrot.slane %v1632_v25, 5  ;;  %v1843_v31 = vunpack.c.l.b16 %v1803_v7  ;;  %v1810_v0 = vrot.slane %v3372_v29, 5 }
  0x75   : > { %v1621_v52 = vsel %vm2970_vm4, %v1616_v27, %v1620_v43  ;;  %v1844_v34 = vunpack.c.l.b16 %v1807_v22  ;;  %v1263_v27 = vrot.slane %v3303_v42, 5  ;;  %v2433_v43 = vrot.slane %v2425_v40, 9  ;;  %v2622_v42 = vld [vmem:[%s2932_s12 + $0x30] sm:$0xe] }
  0x76   : > { %v1672_v3 = vunpack.c.l.b16 %v1621_v52  ;;  %v2631_v46 = vrot.slane %v2623_v61, 9  ;;  %v1822_v4 = vrot.slane %v3405_v16, 5  ;;  %v2633_v33 = vrot.slane %v2625_v63, 9 }
  0x77   : > { %v1850_v52 = vpack.c.b16 %v1844_v34, %v1843_v31  ;;  %v1264_v53 = vsel %vm2979_vm5, %v2432_v41, %v1263_v27 }
  0x78   : > { %v1677_v21 = vpack.c.b16 %v1672_v3, %v1671_v2  ;;  %v1292_v45 = vunpack.c.l.b16 %v1264_v53  ;;  %v1814_v2 = vrot.slane %v3375_v47, 5  ;;  %v1818_v3 = vrot.slane %v3402_v15, 5 }
  0x79   : > { %v1823_v29 = vsel %vm2979_vm5, %v2633_v33, %v1822_v4 }
  0x7c   : > { %649 = vmatmul.bf16.gmra.mxu1 %v2193_v28  ;;  %1199 = vmatmul.bf16.gmra.mxu0 %v1123_v14  ;;  %v1628_v28 = vrot.slane %v1626_v44, 5  ;;  %v2517_v14 = vor.u32 %v2743_v62, %v2516_v50  ;;  %v2520_v50 = vld [vmem:[%s2932_s12 + $0x40] sm:$0xf]  ;;  %v2630_v44 = vrot.slane %v2622_v42, 9 }
  0x7d   : > { %v2521_v59 = vor.u32 %v2744_v51, %v2520_v50  ;;  %v2624_v62 = vld [vmem:[%s2932_s12 + $0x40] sm:$0xe] }
  0x7e   : > { %1744 = vmatmul.bf16.gmra.mxu3 %v1676_v30  ;;  %v1629_v36 = vor.u32 %v1628_v28, %v1625_v5  ;;  %v1646_v30 = vshll.u32 %v3405_v16, 16  ;;  %v2632_v6 = vrot.slane %v2624_v62, 9  ;;  %v1811_v11 = vsel %vm2979_vm5, %v2630_v44, %v1810_v0 }
  0x7f   : > { %1498 = vmatmul.bf16.gmra.mxu2 %v2513_v26  ;;  %v1643_v26 = vor.u32 %v1642_v1, %v1639_v17  ;;  %v1845_v47 = vunpack.c.l.b16 %v1811_v11  ;;  %v1848_v28 = vunpack.c.l.b16 %v1823_v29 }
  0x80   : > { %v1648_v12 = vrot.slane %v1646_v30, 5  ;;  %v1819_v13 = vsel %vm2979_vm5, %v2632_v6, %v1818_v3 }
  0x81   : > { %v1644_v56 = vrot.slane %v1643_v26, 4  ;;  %v1847_v5 = vunpack.c.l.b16 %v1819_v13 }
  0x83   : > { %v1649_v37 = vsel %vm2970_vm4, %v1644_v56, %v1648_v12  ;;  %v1852_v17 = vpack.c.b16 %v1848_v28, %v1847_v5 }
  0x84   : > { %v1674_v55 = vunpack.c.l.b16 %v1649_v37 }
  0x8c   : > { %1358 = vmatmul.bf16.vlgmr.msra.gmra.mxu1 %v3327_v8  ;;  %1913 = vmatmul.bf16.vlgmr.msra.gmra.mxu0 %v1849_v48  ;;  %v1630_v8 = vrot.slane %v1629_v36, 4  ;;  %v1267_v48 = vrot.slane %v3316_v60, 5 }
  0x8e   : > { %1749 = vmatmul.bf16.gmra.mxu3 %v1677_v21  ;;  %v1635_v35 = vsel %vm2970_vm4, %v1630_v8, %v1634_v23  ;;  %v1268_v49 = vsel %vm2979_vm5, %v2433_v43, %v1267_v48 }
  0x8f   : > { %1503 = vmatmul.bf16.gmra.mxu2 %v2517_v14  ;;  %v1673_v54 = vunpack.c.l.b16 %v1635_v35  ;;  %v1293_v58 = vunpack.c.l.b16 %v1268_v49 }
  0x91   : > { %v1297_v18 = vpack.c.b16 %v1293_v58, %v1292_v45  ;;  %v1678_v60 = vpack.c.b16 %v1674_v55, %v1673_v54 }
  0x9c   : > { %1363 = vmatmul.bf16.gmra.mxu1 %v3366_v9  ;;  %1918 = vmatmul.bf16.gmra.mxu0 %v1850_v52  ;;  %v1815_v9 = vsel %vm2979_vm5, %v2631_v46, %v1814_v2 }
  0x9d   : > { %v1846_v39 = vunpack.c.l.b16 %v1815_v9 }
  0x9e   : > { %1754 = vmatmul.bf16.gmra.mxu3 %v1678_v60 }
  0x9f   : > { %1508 = vmatmul.bf16.gmra.mxu2 %v2521_v59  ;;  %v1851_v14 = vpack.c.b16 %v1846_v39, %v1845_v47 }
  0xa9   : > { %v544_v15 = vpop.f32.mrf.mxu1  ;;  %v534_v16 = vpop.f32.mrf.mxu0 }
  0xac   : > { %1368 = vmatmul.bf16.gmra.mxu1 %v3407_v20  ;;  %1923 = vmatmul.bf16.gmra.mxu0 %v1851_v14 }
  0xaf   : > { %1928 = vmatmul.bf16.vlgmr.msra.gmra.mxu2 %v1852_v17 }
  0xb1   : > { %v546_v19 = vpop.f32.mrf.mxu1  ;;  %v536_v21 = vpop.f32.mrf.mxu0 }
  0xb2   : > { %v804_v1 = vpop.f32.mrf.mxu2  ;;  %v939_v10 = vpop.f32.mrf.mxu3 }
  0xb9   : > { %v549_v32 = vpop.f32.mrf.mxu1  ;;  %v539_v57 = vpop.f32.mrf.mxu0 }
  0xba   : > { %v806_v24 = vpop.f32.mrf.mxu2  ;;  %v3450_v36 = vpop.f32.mrf.mxu3 }
  0xbc   : > { %1373 = vmatmul.bf16.gmra.mxu1 %v1297_v18 }
  0xc1   : > { %v551_v26 = vpop.f32.mrf.mxu1  ;;  %v541_v30 = vpop.f32.mrf.mxu0 }
  0xc2   : > { %v809_v25 = vpop.f32.mrf.mxu2  ;;  %v944_v7 = vpop.f32.mrf.mxu3 }
  0xc9   : > { %v635_v8 = vpop.f32.mrf.mxu1  ;;  %v1185_v23 = vpop.f32.mrf.mxu0 }
  0xca   : > { %v811_v22 = vpop.f32.mrf.mxu2  ;;  %v636_v20 = vadd.f32 %v635_v8, %v534_v16  ;;  %v3452_v12 = vpop.f32.mrf.mxu3 }
  0xcc   : > { %v824_v56 = vadd.f32 %v804_v1, %v636_v20 }
  0xce   : > { %v959_v31 = vadd.f32 %v939_v10, %v824_v56 }
  0xd0   : > { %v1205_v34 = vadd.f32 %v1185_v23, %v959_v31 }
  0xd1   : > { %v637_v37 = vpop.f32.mrf.mxu1  ;;  %v1187_v38 = vpop.f32.mrf.mxu0 }
  0xd2   : > { %v814_v35 = vpop.f32.mrf.mxu2  ;;  %v638_v40 = vadd.f32 %v637_v37, %v536_v21  ;;  %v949_v27 = vpop.f32.mrf.mxu3 }
  0xd4   : > { %v825_v41 = vadd.f32 %v806_v24, %v638_v40 }
  0xd9   : > { %v640_v48 = vpop.f32.mrf.mxu1  ;;  %v1190_v50 = vpop.f32.mrf.mxu0 }
  0xda   : > { %v816_v43 = vpop.f32.mrf.mxu2  ;;  %v641_v51 = vadd.f32 %v640_v48, %v539_v57  ;;  %v3454_v55 = vpop.f32.mrf.mxu3 }
  0xdc   : > { %v826_v52 = vadd.f32 %v809_v25, %v641_v51 }
  0xde   : > { %v961_v53 = vadd.f32 %v944_v7, %v826_v52 }
  0xe0   : > { %v1207_v49 = vadd.f32 %v1190_v50, %v961_v53 }
  0xe1   : > { %v642_v45 = vpop.f32.mrf.mxu1  ;;  %v3456_v58 = vpop.f32.mrf.mxu0 }
  0xe2   : > { %v819_v54 = vpop.f32.mrf.mxu2  ;;  %v643_v59 = vadd.f32 %v642_v45, %v541_v30  ;;  %v954_v60 = vpop.f32.mrf.mxu3  ;;  %v960_v30 = vadd.f32 %v3450_v36, %v825_v41  ;;  %v3482_v36 = vld [vmem:[%s3531_s3] ss:$0 sm:$0xff] }
  0xe4   : > { %v827_v42 = vadd.f32 %v811_v22, %v643_v59  ;;  %v1206_v22 = vadd.f32 %v1187_v38, %v960_v30 }
  0xe6   : > { %v962_v51 = vadd.f32 %v3452_v12, %v827_v42 }
  0xe9   : > { %v645_v18 = vpop.f32.mrf.mxu1  ;;  %v1195_v62 = vpop.f32.mrf.mxu0 }
  0xea   : > { %v821_v61 = vpop.f32.mrf.mxu2  ;;  %v646_v63 = vadd.f32 %v645_v18, %v544_v15  ;;  %v3464_v11 = vpop.f32.mrf.mxu3 }
  0xec   : > { %v828_v44 = vadd.f32 %v814_v35, %v646_v63 }
  0xee   : > { %v963_v0 = vadd.f32 %v949_v27, %v828_v44 }
  0xf0   : > { %v3458_v46 = vadd.f32 %v1195_v62, %v963_v0  ;;  %v1208_v62 = vadd.f32 %v3456_v58, %v962_v51 }
  0xf1   : > { %v647_v3 = vpop.f32.mrf.mxu1  ;;  %v3460_v4 = vpop.f32.mrf.mxu0 }
  0xf2   : > { %v1494_v2 = vpop.f32.mrf.mxu2  ;;  %v648_v6 = vadd.f32 %v647_v3, %v546_v19  ;;  %v1740_v28 = vpop.f32.mrf.mxu3 }
  0xf4   : > { %v3462_v33 = vadd.f32 %v816_v43, %v648_v6 }
  0xf9   : > { %v650_v13 = vpop.f32.mrf.mxu1  ;;  %v1200_v29 = vpop.f32.mrf.mxu0 }
  0xfa   : > { %v1496_v9 = vpop.f32.mrf.mxu2  ;;  %v651_v47 = vadd.f32 %v650_v13, %v549_v32  ;;  %v1742_v19 = vpop.f32.mrf.mxu3 }
  0xfc   : > { %v830_v39 = vadd.f32 %v819_v54, %v651_v47 }
  0xfe   : > { %v965_v5 = vadd.f32 %v954_v60, %v830_v39 }
 0x100   : > { %v3466_v14 = vadd.f32 %v1200_v29, %v965_v5  ;;  %v964_v5 = vadd.f32 %v3454_v55, %v3462_v33 }
 0x101   : > { %v652_v16 = vpop.f32.mrf.mxu1  ;;  %v3468_v17 = vpop.f32.mrf.mxu0 }
 0x102   : > { %v1499_v15 = vpop.f32.mrf.mxu2  ;;  %v653_v1 = vadd.f32 %v652_v16, %v551_v26  ;;  %v3476_v26 = vld [vmem:[%s3530_s2] ss:$0 sm:$0xff]  ;;  %v1745_v31 = vpop.f32.mrf.mxu3 }
 0x104   : > { %v3470_v21 = vadd.f32 %v821_v61, %v653_v1 }
 0x109   : > { %v1359_v10 = vpop.f32.mrf.mxu1  ;;  %v1914_v24 = vpop.f32.mrf.mxu0 }
 0x10a   : > { %v1379_v57 = vadd.f32 %v1359_v10, %v1205_v34  ;;  %v1501_v25 = vpop.f32.mrf.mxu2  ;;  %v1747_v54 = vpop.f32.mrf.mxu3  ;;  %v1210_v10 = vadd.f32 %v3460_v4, %v964_v5 }
 0x10c   : > { %v1514_v32 = vadd.f32 %v1494_v2, %v1379_v57 }
 0x10e   : > { %v1760_v7 = vadd.f32 %v1740_v28, %v1514_v32 }
 0x110   : > { %v1934_v20 = vadd.f32 %v1914_v24, %v1760_v7 }
 0x111   : > { %v1361_v8 = vpop.f32.mrf.mxu1  ;;  %v1916_v23 = vpop.f32.mrf.mxu0 }
 0x112   : > { %v1380_v56 = vadd.f32 %v1361_v8, %v1206_v22  ;;  %v1504_v37 = vpop.f32.mrf.mxu2  ;;  %v1946_v34 = vmul.f32 %v3476_v26, %v1934_v20  ;;  %v1750_v3 = vpop.f32.mrf.mxu3 }
 0x114   : > { %v1515_v35 = vadd.f32 %v1496_v9, %v1380_v56  ;;  %v1958_v43 = vadd.f32 %v3482_v36, %v1946_v34 }
 0x116   : > { %v1761_v38 = vadd.f32 %v1742_v19, %v1515_v35  ;;  %v1966_v45 = vmax.f32 %v1958_v43, 0.0  ;;  %v966_v35 = vadd.f32 %v3464_v11, %v3470_v21 }
 0x118   : > { %v1935_v40 = vadd.f32 %v1916_v23, %v1761_v38  ;;  %v1212_v43 = vadd.f32 %v3468_v17, %v966_v35 }
 0x119   : > { %v1364_v41 = vpop.f32.mrf.mxu1  ;;  %v1919_v27 = vpop.f32.mrf.mxu0 }
 0x11a   : > { %v1947_v48 = vmul.f32 %v3476_v26, %v1935_v40  ;;  %v1381_v50 = vadd.f32 %v1364_v41, %v1207_v49  ;;  %v1506_v18 = vpop.f32.mrf.mxu2  ;;  %v1752_v57 = vpop.f32.mrf.mxu3 }
 0x11c   : > { %v1959_v52 = vadd.f32 %v3482_v36, %v1947_v48  ;;  %v1516_v53 = vadd.f32 %v1499_v15, %v1381_v50 }
 0x11e   : > { %v1967_v59 = vmax.f32 %v1959_v52, 0.0  ;;  %v1762_v61 = vadd.f32 %v1745_v31, %v1516_v53 }
 0x120   : > { %v2772_v49 = vpack.c.bf16 %v1967_v59, %v1966_v45  ;;  %v1936_v42 = vadd.f32 %v1919_v27, %v1762_v61 }
 0x121   : > { %v1366_v63 = vpop.f32.mrf.mxu1  ;;  %v1921_v12 = vpop.f32.mrf.mxu0 }
 0x122   : > { %2773 = vst [vmem:[%s3492_s25] sm:$0xff] %v2772_v49   ;;  %v1382_v60 = vadd.f32 %v1366_v63, %v1208_v62  ;;  %v1948_v0 = vmul.f32 %v3476_v26, %v1936_v42  ;;  %v1509_v9 = vpop.f32.mrf.mxu2  ;;  %v1755_v31 = vpop.f32.mrf.mxu3 }
 0x124   : > { %v1517_v44 = vadd.f32 %v1501_v25, %v1382_v60  ;;  %v1960_v29 = vadd.f32 %v3482_v36, %v1948_v0 }
 0x126   : > { %v1763_v2 = vadd.f32 %v1747_v54, %v1517_v44  ;;  %v1968_v16 = vmax.f32 %v1960_v29, 0.0 }
 0x128   : > { %v1937_v6 = vadd.f32 %v1921_v12, %v1763_v2 }
 0x129   : > { %v1369_v13 = vpop.f32.mrf.mxu1  ;;  %v1924_v39 = vpop.f32.mrf.mxu0 }
 0x12a   : > { %v1949_v47 = vmul.f32 %v3476_v26, %v1937_v6  ;;  %v1383_v58 = vadd.f32 %v1369_v13, %v3458_v46  ;;  %v1511_v7 = vpop.f32.mrf.mxu2  ;;  %v1757_v53 = vpop.f32.mrf.mxu3 }
 0x12c   : > { %v1961_v28 = vadd.f32 %v3482_v36, %v1949_v47  ;;  %v1518_v15 = vadd.f32 %v1504_v37, %v1383_v58 }
 0x12e   : > { %v1969_v1 = vmax.f32 %v1961_v28, 0.0  ;;  %v1764_v19 = vadd.f32 %v1750_v3, %v1518_v15 }
 0x130   : > { %v2777_v24 = vpack.c.bf16 %v1969_v1, %v1968_v16  ;;  %v1938_v30 = vadd.f32 %v1924_v39, %v1764_v19 }
 0x131   : > { %v1371_v25 = vpop.f32.mrf.mxu1  ;;  %v1926_v22 = vpop.f32.mrf.mxu0 }
 0x132   : > { %2789 = vst [vmem:[%s3492_s25 + $0x8] sm:$0xff] %v2777_v24   ;;  %v1384_v32 = vadd.f32 %v1371_v25, %v1210_v10  ;;  %v1950_v8 = vmul.f32 %v3476_v26, %v1938_v30  ;;  %v1929_v38 = vpop.f32.mrf.mxu2 }
 0x134   : > { %v1519_v46 = vadd.f32 %v1506_v18, %v1384_v32  ;;  %v1962_v20 = vadd.f32 %v3482_v36, %v1950_v8 }
 0x136   : > { %v1765_v55 = vadd.f32 %v1752_v57, %v1519_v46  ;;  %v1970_v40 = vmax.f32 %v1962_v20, 0.0 }
 0x138   : > { %v1939_v33 = vadd.f32 %v1926_v22, %v1765_v55 }
 0x139   : > { %v1374_v23 = vpop.f32.mrf.mxu1 }
 0x13a   : > { %v1951_v56 = vmul.f32 %v3476_v26, %v1939_v33  ;;  %v1385_v4 = vadd.f32 %v1374_v23, %v3466_v14  ;;  %v1931_v21 = vpop.f32.mrf.mxu2 }
 0x13c   : > { %v1963_v37 = vadd.f32 %v3482_v36, %v1951_v56  ;;  %v1520_v34 = vadd.f32 %v1509_v9, %v1385_v4 }
 0x13e   : > { %v1971_v41 = vmax.f32 %v1963_v37, 0.0  ;;  %v1766_v27 = vadd.f32 %v1755_v31, %v1520_v34 }
 0x140   : > { %v2782_v48 = vpack.c.bf16 %v1971_v41, %v1970_v40  ;;  %v1940_v51 = vadd.f32 %v1929_v38, %v1766_v27 }
 0x141   : > { %v1376_v50 = vpop.f32.mrf.mxu1 }
 0x142   : > { %2790 = vst [vmem:[%s3492_s25 + $0x10] sm:$0xff] %v2782_v48   ;;  %v1386_v52 = vadd.f32 %v1376_v50, %v1212_v43  ;;  %v1952_v54 = vmul.f32 %v3476_v26, %v1940_v51 }
 0x144   : > { %v1521_v14 = vadd.f32 %v1511_v7, %v1386_v52  ;;  %v1964_v59 = vadd.f32 %v3482_v36, %v1952_v54 }
 0x146   : > { %v1767_v11 = vadd.f32 %v1757_v53, %v1521_v14  ;;  %v1972_v17 = vmax.f32 %v1964_v59, 0.0 }
 0x148   : > { %v1941_v45 = vadd.f32 %v1931_v21, %v1767_v11 }
 0x14a   : > { %v1953_v61 = vmul.f32 %v3476_v26, %v1941_v45 }
 0x14c   : > { %v1965_v18 = vadd.f32 %v3482_v36, %v1953_v61 }
 0x14e   : > { %v1973_v62 = vmax.f32 %v1965_v18, 0.0 }
 0x150   : > { %v2787_v49 = vpack.c.bf16 %v1973_v62, %v1972_v17 }
 0x152   : > { %2791 = vst [vmem:[%s3492_s25 + $0x18] sm:$0xff] %v2787_v49  }
 0x153 PF: > { %s14_s17 = sadd.s32 1, %s2857_s17   ;;  %s3537_s15 = smov %s2853_s16 }
 0x154   : > { %p11_p5 = scmp.ge.s32.totalorder %s14_s17, 4   ;;  %s3538_s16 = smov %s3540_s18 }
 0x156   :  { %13 = sbr.rel (!%p11_p5) target bundleno = 2 (0x2), region = 85 }

// kernel: anynet_forward.11
= control target key start
LH: loop header
LB: loop body
LE: loop exit
PB: predicated region body
PF: predicated region fallthrough
CT: control target
= control target key end

     0   :  { %s281_s0 = inlined_call_operand.vmem [shape: bf16[2,16,128], index: 0, kind: input, shape index: {}]   ;;  %s282_s1 = inlined_call_operand.vmem [shape: bf16[128,128], index: 1, kind: input, shape index: {}]   ;;  %s283_s2 = inlined_call_operand.vmem [shape: f32[1,128], index: 2, kind: input, shape index: {}]   ;;  %s284_s3 = inlined_call_operand.hbm [shape: f32[2,128], index: 3, kind: output, shape index: {}]  }
   0x1   :  { %v186_v0 = vld [vmem:[%s282_s1 + $0x38] sm:$0xff]  ;;  %v185_v1 = vld [vmem:[%s282_s1 + $0x30] sm:$0xff]  ;;  %v188_v2 = vld [vmem:[%s281_s0] sm:$0xff]  }
   0x2   :  { %117 = vmatpush.bf16.msra.mxu0 %v186_v0  ;;  %v189_v3 = vunpack.c.l.bf16 %v188_v2  ;;  %v190_v4 = vunpack.c.h.bf16 %v188_v2  ;;  %v195_v5 = vld [vmem:[%s281_s0 + $0x8] sm:$0xff]  }
   0x3   :  { %v193_v6 = vunpack.c.l.bf16 %v195_v5  ;;  %v194_v7 = vunpack.c.h.bf16 %v195_v5 }
   0x4   :  { %8 = vsyncpa [#allocation4], 0  ;;  %v23_v8 = vadd.f32 %v190_v4, %v189_v3  ;;  %v184_v9 = vld [vmem:[%s282_s1 + $0x28] sm:$0xff]  ;;  %v183_v14 = vld [vmem:[%s282_s1 + $0x20] sm:$0xff]  ;;  %vm65_vm0 = vcmask 1041409   ;;  %s224_s6 = smov [#allocation3]  }
   0x5   :  { %v30_v10 = vadd.f32 %v194_v7, %v193_v6  ;;  %v182_v19 = vld [vmem:[%s282_s1 + $0x18] sm:$0xff]  ;;  %v181_v24 = vld [vmem:[%s282_s1 + $0x10] sm:$0xff]  ;;  %v180_v29 = vld [vmem:[%s282_s1 + $0x8] sm:$0xff]  ;;  %s136_s7 = sshll.u32 %s224_s6, 4  ;;  %s138_s10 = sshll.u32 %s284_s3, 4  ;;  %s137_s7 = int_to_ptr.vmem [resolvable:$true] %s136_s7  ;;  %s139_s10 = int_to_ptr.hbm [resolvable:$true] %s138_s10 }
   0x6   :  { %118 = vmatpush.bf16.msra.mxu0 %v185_v1  ;;  %v24_v11 = vrot.slane %v23_v8, 4  ;;  %v179_v33 = vld [vmem:[%s282_s1] sm:$0xff] }
   0x7   :  { %v31_v12 = vrot.slane %v30_v10, 4  ;;  %v197_v36 = vld [vmem:[%s283_s2] ss:$0 sm:$0xff] }
   0x8   :  { %v25_v13 = vadd.f32 %v24_v11, %v23_v8 }
   0x9   :  { %v32_v15 = vadd.f32 %v31_v12, %v30_v10 }
   0xa   :  { %119 = vmatpush.bf16.msra.mxu0 %v184_v9  ;;  %v26_v16 = vrot.slane %v25_v13, 2 }
   0xb   :  { %v33_v17 = vrot.slane %v32_v15, 2 }
   0xc   :  { %v27_v18 = vadd.f32 %v26_v16, %v25_v13 }
   0xd   :  { %v34_v20 = vadd.f32 %v33_v17, %v32_v15 }
   0xe   :  { %120 = vmatpush.bf16.msra.mxu0 %v183_v14  ;;  %v28_v21 = vrot.slane %v27_v18, 1 }
   0xf   :  { %v35_v22 = vrot.slane %v34_v20, 1 }
  0x10   :  { %v29_v23 = vadd.f32 %v28_v21, %v27_v18 }
  0x11   :  { %v36_v25 = vadd.f32 %v35_v22, %v34_v20 }
  0x12   :  { %121 = vmatpush.bf16.msra.mxu0 %v182_v19  ;;  %v37_v26 = vmul.f32 0.0625, %v29_v23 }
  0x13   :  { %v38_v27 = vmul.f32 0.0625, %v36_v25 }
  0x14   :  { %v39_v28 = vpack.c.bf16 %v37_v26, %v37_v26 }
  0x15   :  { %v40_v30 = vpack.c.bf16 %v38_v27, %v38_v27 }
  0x16   :  { %122 = vmatpush.bf16.msra.mxu0 %v181_v24  ;;  %v63_v31 = vunpack.c.l.b16 %v39_v28 }
  0x17   :  { %v64_v32 = vunpack.c.l.b16 %v40_v30 }
  0x19   :  { %v66_v34 = vsel %vm65_vm0, %v64_v32, %v63_v31 }
  0x1a   :  { %123 = vmatpush.bf16.msra.mxu0 %v180_v29  ;;  %v67_v35 = vpack.c.b16 %v66_v34, %v66_v34 }
  0x1e   :  { %124 = vmatpush.bf16.msra.mxu0 %v179_v33 }
  0x21   :  { %125 = vmatmul.bf16.vlgmr.msra.gmra.mxu0 %v67_v35 }
  0x9e   :  { %v126_v37 = vpop.f32.mrf.mxu0 }
  0x9f   :  { %v127_v38 = vadd.f32 %v197_v36, %v126_v37 }
  0xa1   :  { %130 = vst [vmem:[#allocation3] sm:$0x3] %v127_v38 }
  0xa2   :  { %141 = dma.vmem_to_hbm [thread:$0]  %s137_s7, 32, %s139_s10, [#allocation4]  }
  0xa6   :  { %v128_v39 = vpop.f32.mrf.mxu0 }
  0xa7   :  { %222 = dma.done.wait [#allocation4], 32  }
  0xa8   :  { %223 = vsyncadd [#allocation4], 4294967264 }
  0xa9   :  { %146 = vsyncpa [#allocation4], 1 }

</bundles_post_ra>
